<compile_context>
chip_gen: v6e
topology: v6e:2x2x1
jax: 0.10.0
libtpu: 0.0.40
codegen_flags: <defaults>
</compile_context>

<pallas_src>
import functools

import jax
import jax.numpy as jnp
from jax import lax
from jax.experimental import pallas as pl
from jax.experimental.pallas import tpu as pltpu


def _round_up(x, m):
    return (x + m - 1) // m * m


# ----------------------------- Pallas kernel -------------------------------- #

def _fused_msg_kernel(layer_counts, pad_cols, *refs):
    """Fused multi-scale shared MLP (+ folded eval-mode BN + ReLU) and max over K.

    refs = (x_0, ..., x_{S-1},                 # [tile, K_s, Cin_pad]  bf16
            (W, scale, shift) per layer ...,   # bf16 / f32 / f32
            out_ref)                           # [tile, out_w_pad]     f32
    """
    n_scales = len(layer_counts)
    x_refs = refs[:n_scales]
    out_ref = refs[-1]
    params = refs[n_scales:-1]

    T = x_refs[0].shape[0]
    pieces = []
    p = 0
    for s in range(n_scales):
        _, K, Cin = x_refs[s].shape
        h = x_refs[s][...].reshape(T * K, Cin)              # bf16 MXU operand
        for j in range(layer_counts[s]):
            w = params[p][...]                              # [Cin_j, Cout_j] bf16
            sc = params[p + 1][...]                         # [1, Cout_j]     f32
            sh = params[p + 2][...]                         # [1, Cout_j]     f32
            p += 3
            acc = jnp.dot(h, w, preferred_element_type=jnp.float32)
            acc = jnp.maximum(acc * sc + sh, 0.0)           # BN (eval) + ReLU in f32
            if j + 1 < layer_counts[s]:
                h = acc.astype(jnp.bfloat16)                # bf16 input for next MXU dot
            else:
                h = acc                                     # last layer stays f32
        cout = h.shape[-1]
        pieces.append(jnp.max(h.reshape(T, K, cout), axis=1))   # max over neighbors
    if pad_cols:
        pieces.append(jnp.zeros((T, pad_cols), jnp.float32))
    slab = pieces[0] if len(pieces) == 1 else jnp.concatenate(pieces, axis=-1)
    out_ref[...] = slab                                     # lane-dense (128-mult) store


def _choose_tile(bs, target):
    """Row tile: as large as sensible, multiple of 8, keep >= 2 grid steps
    (so the 'parallel' grid axis can be sharded across both TCs on v7x)."""
    tile = max(8, _round_up(min(target, bs), 8))
    while tile > 8 and pl.cdiv(bs, tile) < 2:
        tile //= 2
    return max(8, _round_up(tile, 8))


def fused_msg_mlp_max(grouped_list, params_list, *, target_tile=512):
    """grouped_list[s]: [BS, K_s, Cin_pad] bf16.
    params_list[s]: list of (W[Cin_j, Cout_j] bf16, scale[1,Cout_j] f32, shift[1,Cout_j] f32).
    Returns [BS, sum(Cout_last)] f32 (per-scale MLP stacks + max over K, concatenated)."""
    bs = grouped_list[0].shape[0]
    tile = _choose_tile(bs, target_tile)
    grid = pl.cdiv(bs, tile)
    bs_pad = grid * tile

    couts = [layers[-1][0].shape[1] for layers in params_list]
    total = sum(couts)
    out_w = _round_up(total, 128)
    pad_cols = out_w - total

    args, in_specs, layer_counts = [], [], []
    for g in grouped_list:
        if bs_pad != bs:
            g = jnp.pad(g, ((0, bs_pad - bs), (0, 0), (0, 0)))
        _, K, Cin = g.shape
        in_specs.append(pl.BlockSpec((tile, K, Cin), lambda i: (i, 0, 0)))
        args.append(g)
    for layers in params_list:
        layer_counts.append(len(layers))
        for w, sc, sh in layers:
            # TODO(synk): these grid-invariant params could use pipeline_mode=pl.Buffered(1)
            # to skip double-buffering; they are tiny, so the default is kept for safety.
            in_specs.append(pl.BlockSpec(w.shape, lambda i: (0, 0)))
            in_specs.append(pl.BlockSpec(sc.shape, lambda i: (0, 0)))
            in_specs.append(pl.BlockSpec(sh.shape, lambda i: (0, 0)))
            args += [w, sc, sh]

    out_spec = pl.BlockSpec((tile, out_w), lambda i: (i, 0))
    kernel = functools.partial(_fused_msg_kernel, tuple(layer_counts), pad_cols)

    out = pl.pallas_call(
        kernel,
        out_shape=jax.ShapeDtypeStruct((bs_pad, out_w), jnp.float32),
        grid_spec=pltpu.PrefetchScalarGridSpec(
            num_scalar_prefetch=0,
            grid=(grid,),
            in_specs=in_specs,
            out_specs=out_spec,
        ),
        compiler_params=pltpu.CompilerParams(
            dimension_semantics=("parallel",),
            # sized to fit v7x's 64 MiB/TC VMEM; generous headroom on v5e/v6e (128 MiB).
            vmem_limit_bytes=48 * 1024 * 1024,
        ),
    )(*args)
    return out[:bs, :total]


def _mlp_reference(grouped_list, params_list):
    """Plain-JAX reference of the kernel math (same bf16 rounding points)."""
    outs = []
    for g, layers in zip(grouped_list, params_list):
        bs, K, cin = g.shape
        h = g.astype(jnp.float32).reshape(bs * K, cin)
        for j, (w, sc, sh) in enumerate(layers):
            h = jnp.maximum((h @ w.astype(jnp.float32)) * sc + sh, 0.0)
            if j + 1 < len(layers):
                h = h.astype(jnp.bfloat16).astype(jnp.float32)
        outs.append(jnp.max(h.reshape(bs, K, -1), axis=1))
    return jnp.concatenate(outs, axis=-1)


# ---------------------------- plain-JAX glue --------------------------------- #

def square_distance(src, dst):
    # src [B, N, C], dst [B, M, C] -> [B, N, M]
    return jnp.sum((src[:, :, None, :] - dst[:, None, :, :]) ** 2, axis=-1)


def index_points(points, idx):
    # points [B, N, C], idx [B, ...] -> [B, ..., C]
    B = points.shape[0]
    raw = idx.shape
    idx_flat = idx.reshape(B, -1)
    idx_exp = jnp.broadcast_to(idx_flat[..., None],
                               (B, idx_flat.shape[1], points.shape[-1]))
    out = jnp.take_along_axis(points, idx_exp, axis=1)
    return out.reshape(raw + (points.shape[-1],))


def farthest_point_sample(xyz, npoint):
    # TODO(synk): torch seeds the first centroid with torch.randint; we start
    # deterministically at index 0 (pass seed_idx for exact parity tests).
    B, N, _ = xyz.shape

    def body(i, carry):
        centroids, distance, farthest = carry
        centroids = centroids.at[:, i].set(farthest)
        centroid = jnp.take_along_axis(
            xyz, farthest[:, None, None].astype(jnp.int32), axis=1)  # [B,1,3]
        dist = jnp.sum((xyz - centroid) ** 2, axis=-1)
        distance = jnp.minimum(distance, dist)
        farthest = jnp.argmax(distance, axis=-1).astype(jnp.int32)
        return centroids, distance, farthest

    centroids = jnp.zeros((B, npoint), dtype=jnp.int32)
    distance = jnp.full((B, N), 1e10, dtype=jnp.float32)
    farthest = jnp.zeros((B,), dtype=jnp.int32)
    centroids, _, _ = lax.fori_loop(0, npoint, body,
                                    (centroids, distance, farthest))
    return centroids


def query_ball_point(radius, nsample, xyz, new_xyz):
    B, N, _ = xyz.shape
    _, S, _ = new_xyz.shape
    sqr = square_distance(new_xyz, xyz)                                 # [B,S,N]
    gidx = jnp.broadcast_to(jnp.arange(N, dtype=jnp.int32), (B, S, N))
    gidx = jnp.where(sqr > radius ** 2, N, gidx)
    gidx = jnp.sort(gidx, axis=-1)[:, :, :nsample]
    gfirst = jnp.broadcast_to(gidx[:, :, :1], (B, S, nsample))
    gidx = jnp.where(gidx == N, gfirst, gidx)
    return gidx


# ------------------------------ module port ---------------------------------- #

class PointNetSetAbstractionMsg:
    def __init__(self, npoint, radius_list, nsample_list, in_channel, mlp_list,
                 key, knn=False, target_tile=512):
        self.npoint = npoint
        self.radius_list = radius_list
        self.nsample_list = nsample_list
        self.knn = knn
        self.target_tile = target_tile
        self.cin = in_channel + 3
        self.cin_pad = _round_up(self.cin, 8)      # pad ragged contraction dim
        eps = 1e-5
        # TODO(synk): BatchNorm2d is implemented in eval mode (running_mean=0,
        # running_var=1 folded into scale/shift); training-mode batch statistics
        # would require a cross-tile reduction per layer.
        self.params = []  # per scale: [(W[Cin_pad,Cout] bf16, scale[1,Cout] f32, shift[1,Cout] f32), ...]
        for mlp in mlp_list:
            last, last_pad = self.cin, self.cin_pad
            layers = []
            for out_c in mlp:
                key, k1, k2 = jax.random.split(key, 3)
                W = jax.random.normal(k1, (last, out_c), jnp.float32) * 0.1
                b = jax.random.normal(k2, (out_c,), jnp.float32) * 0.1
                gamma = jnp.ones((out_c,), jnp.float32)
                beta = jnp.zeros((out_c,), jnp.float32)
                mean = jnp.zeros((out_c,), jnp.float32)
                var = jnp.ones((out_c,), jnp.float32)
                scale = gamma / jnp.sqrt(var + eps)
                shift = beta + (b - mean) * scale
                if last_pad != last:
                    W = jnp.pad(W, ((0, last_pad - last), (0, 0)))   # zero rows: no-op
                layers.append((W.astype(jnp.bfloat16),
                               scale.reshape(1, out_c).astype(jnp.float32),
                               shift.reshape(1, out_c).astype(jnp.float32)))
                last, last_pad = out_c, out_c
            self.params.append(layers)

    def __call__(self, xyz, points, seed_idx=None, use_kernel=True):
        """xyz: [B, N, 3], points: [B, N, D] or None.
        Returns new_xyz [B, S, 3], new_points_concat [B, S, sum(Cout_last)]."""
        B, N, C = xyz.shape
        S = self.npoint
        fps_idx = farthest_point_sample(xyz, S) if seed_idx is None else seed_idx
        new_xyz = index_points(xyz, fps_idx)                  # [B, S, 3]

        grouped_list = []
        for i, radius in enumerate(self.radius_list):
            K = self.nsample_list[i]
            if self.knn:
                dists = square_distance(new_xyz, xyz)
                group_idx = jnp.argsort(dists, axis=-1)[:, :, :K]
            else:
                group_idx = query_ball_point(radius, K, xyz, new_xyz)
            # TODO(synk): the neighbor gather still runs as an XLA gather through HBM;
            # pulling it in-kernel (scalar-prefetched group_idx + per-row DMA) would
            # remove one full HBM round trip on the grouped tensor.
            grouped_xyz = index_points(xyz, group_idx) - new_xyz[:, :, None, :]
            if points is not None:
                gp = index_points(points, group_idx)
                grouped = jnp.concatenate([gp, grouped_xyz], axis=-1)
            else:
                grouped = grouped_xyz
            cin = grouped.shape[-1]
            if self.cin_pad != cin:
                grouped = jnp.pad(grouped,
                                  ((0, 0), (0, 0), (0, 0), (0, self.cin_pad - cin)))
            grouped = grouped.reshape(B * S, K, self.cin_pad).astype(jnp.bfloat16)
            grouped_list.append(grouped)

        if use_kernel:
            out = fused_msg_mlp_max(grouped_list, self.params,
                                    target_tile=self.target_tile)
        else:
            out = _mlp_reference(grouped_list, self.params)
        new_points_concat = out.reshape(B, S, -1)             # [B, S, sum Cout]
        return new_xyz, new_points_concat


# --------------------------------- demo -------------------------------------- #

if __name__ == "__main__":
    key = jax.random.PRNGKey(0)
    kx, kp, kparams = jax.random.split(key, 3)

    B, N, D = 2, 128, 16
    xyz = jax.random.normal(kx, (B, N, 3), jnp.float32)
    points = jax.random.normal(kp, (B, N, D), jnp.float32)

    module = PointNetSetAbstractionMsg(
        npoint=32,
        radius_list=[0.4, 0.8],
        nsample_list=[16, 32],
        in_channel=D,
        mlp_list=[[32, 32, 64], [32, 48, 64]],
        key=kparams,
    )

    new_xyz, new_points = module(xyz, points)
    _, new_points_ref = module(xyz, points, use_kernel=False)
    jax.block_until_ready((new_xyz, new_points, new_points_ref))

    assert new_xyz.shape == (B, 32, 3), new_xyz.shape
    assert new_points.shape == (B, 32, 64 + 64), new_points.shape
    assert bool(jnp.all(jnp.isfinite(new_points)))
    err = float(jnp.max(jnp.abs(new_points - new_points_ref)))
    assert err < 5e-2, f"max |kernel - ref| = {err}"
    print("KERNEL_OK")
</pallas_src>

<mosaic_0001>
module attributes {stable_mosaic.version = 11 : i64} {
  func.func @_fused_msg_kernel(%arg0: i32, %arg1: memref<32x16x24xbf16, #tpu.memory_space<vmem>>, %arg2: memref<32x32x24xbf16, #tpu.memory_space<vmem>>, %arg3: memref<24x32xbf16, #tpu.memory_space<vmem>>, %arg4: memref<1x32xf32, #tpu.memory_space<vmem>>, %arg5: memref<1x32xf32, #tpu.memory_space<vmem>>, %arg6: memref<32x32xbf16, #tpu.memory_space<vmem>>, %arg7: memref<1x32xf32, #tpu.memory_space<vmem>>, %arg8: memref<1x32xf32, #tpu.memory_space<vmem>>, %arg9: memref<32x64xbf16, #tpu.memory_space<vmem>>, %arg10: memref<1x64xf32, #tpu.memory_space<vmem>>, %arg11: memref<1x64xf32, #tpu.memory_space<vmem>>, %arg12: memref<24x32xbf16, #tpu.memory_space<vmem>>, %arg13: memref<1x32xf32, #tpu.memory_space<vmem>>, %arg14: memref<1x32xf32, #tpu.memory_space<vmem>>, %arg15: memref<32x48xbf16, #tpu.memory_space<vmem>>, %arg16: memref<1x48xf32, #tpu.memory_space<vmem>>, %arg17: memref<1x48xf32, #tpu.memory_space<vmem>>, %arg18: memref<48x64xbf16, #tpu.memory_space<vmem>>, %arg19: memref<1x64xf32, #tpu.memory_space<vmem>>, %arg20: memref<1x64xf32, #tpu.memory_space<vmem>>, %arg21: memref<32x128xf32, #tpu.memory_space<vmem>>) attributes {dimension_semantics = [#tpu.dimension_semantics<parallel>], iteration_bounds = array<i64: 2>, scalar_prefetch = 0 : i64, scratch_operands = 0 : i64, tpu.core_type = #tpu.core_type<tc>, window_params = [{transform_indices = @transform_0, window_bounds = array<i64: 32, 16, 24>}, {transform_indices = @transform_1, window_bounds = array<i64: 32, 32, 24>}, {pipeline_mode = #tpu.pipeline_mode<synchronous>, transform_indices = @transform_2, window_bounds = array<i64: 24, 32>}, {pipeline_mode = #tpu.pipeline_mode<synchronous>, transform_indices = @transform_3, window_bounds = array<i64: 1, 32>}, {pipeline_mode = #tpu.pipeline_mode<synchronous>, transform_indices = @transform_4, window_bounds = array<i64: 1, 32>}, {pipeline_mode = #tpu.pipeline_mode<synchronous>, transform_indices = @transform_5, window_bounds = array<i64: 32, 32>}, {pipeline_mode = #tpu.pipeline_mode<synchronous>, transform_indices = @transform_6, window_bounds = array<i64: 1, 32>}, {pipeline_mode = #tpu.pipeline_mode<synchronous>, transform_indices = @transform_7, window_bounds = array<i64: 1, 32>}, {pipeline_mode = #tpu.pipeline_mode<synchronous>, transform_indices = @transform_8, window_bounds = array<i64: 32, 64>}, {pipeline_mode = #tpu.pipeline_mode<synchronous>, transform_indices = @transform_9, window_bounds = array<i64: 1, 64>}, {pipeline_mode = #tpu.pipeline_mode<synchronous>, transform_indices = @transform_10, window_bounds = array<i64: 1, 64>}, {pipeline_mode = #tpu.pipeline_mode<synchronous>, transform_indices = @transform_11, window_bounds = array<i64: 24, 32>}, {pipeline_mode = #tpu.pipeline_mode<synchronous>, transform_indices = @transform_12, window_bounds = array<i64: 1, 32>}, {pipeline_mode = #tpu.pipeline_mode<synchronous>, transform_indices = @transform_13, window_bounds = array<i64: 1, 32>}, {pipeline_mode = #tpu.pipeline_mode<synchronous>, transform_indices = @transform_14, window_bounds = array<i64: 32, 48>}, {pipeline_mode = #tpu.pipeline_mode<synchronous>, transform_indices = @transform_15, window_bounds = array<i64: 1, 48>}, {pipeline_mode = #tpu.pipeline_mode<synchronous>, transform_indices = @transform_16, window_bounds = array<i64: 1, 48>}, {pipeline_mode = #tpu.pipeline_mode<synchronous>, transform_indices = @transform_17, window_bounds = array<i64: 48, 64>}, {pipeline_mode = #tpu.pipeline_mode<synchronous>, transform_indices = @transform_18, window_bounds = array<i64: 1, 64>}, {pipeline_mode = #tpu.pipeline_mode<synchronous>, transform_indices = @transform_19, window_bounds = array<i64: 1, 64>}, {transform_indices = @transform_20, window_bounds = array<i64: 32, 128>}]} {
    %c0 = arith.constant 0 : index
    %c0_0 = arith.constant 0 : index
    %c0_1 = arith.constant 0 : index
    %0 = vector.load %arg1[%c0, %c0_0, %c0_1] : memref<32x16x24xbf16, #tpu.memory_space<vmem>>, vector<32x16x24xbf16>
    %1 = vector.shape_cast %0 : vector<32x16x24xbf16> to vector<512x24xbf16>
    %c0_2 = arith.constant 0 : index
    %c0_3 = arith.constant 0 : index
    %2 = vector.load %arg3[%c0_2, %c0_3] : memref<24x32xbf16, #tpu.memory_space<vmem>>, vector<24x32xbf16>
    %c0_4 = arith.constant 0 : index
    %c0_5 = arith.constant 0 : index
    %3 = vector.load %arg4[%c0_4, %c0_5] : memref<1x32xf32, #tpu.memory_space<vmem>>, vector<1x32xf32>
    %c0_6 = arith.constant 0 : index
    %c0_7 = arith.constant 0 : index
    %4 = vector.load %arg5[%c0_6, %c0_7] : memref<1x32xf32, #tpu.memory_space<vmem>>, vector<1x32xf32>
    %cst = arith.constant dense<0.000000e+00> : vector<512x32xf32>
    %5 = tpu.matmul %1, %2, %cst {dimension_numbers = #tpu.dot_dimension_numbers<[1], [0], [0], [1], [0, 0, 1, 1], [], []>} : vector<512x24xbf16>, vector<24x32xbf16>, vector<512x32xf32> -> vector<512x32xf32>
    %6 = vector.broadcast %3 : vector<1x32xf32> to vector<512x32xf32>
    %7 = arith.mulf %5, %6 : vector<512x32xf32>
    %8 = vector.broadcast %4 : vector<1x32xf32> to vector<512x32xf32>
    %9 = arith.addf %7, %8 : vector<512x32xf32>
    %cst_8 = arith.constant 0.000000e+00 : f32
    %10 = vector.broadcast %cst_8 : f32 to vector<512x32xf32>
    %11 = arith.maximumf %9, %10 : vector<512x32xf32>
    %12 = arith.truncf %11 : vector<512x32xf32> to vector<512x32xbf16>
    %c0_9 = arith.constant 0 : index
    %c0_10 = arith.constant 0 : index
    %13 = vector.load %arg6[%c0_9, %c0_10] : memref<32x32xbf16, #tpu.memory_space<vmem>>, vector<32x32xbf16>
    %c0_11 = arith.constant 0 : index
    %c0_12 = arith.constant 0 : index
    %14 = vector.load %arg7[%c0_11, %c0_12] : memref<1x32xf32, #tpu.memory_space<vmem>>, vector<1x32xf32>
    %c0_13 = arith.constant 0 : index
    %c0_14 = arith.constant 0 : index
    %15 = vector.load %arg8[%c0_13, %c0_14] : memref<1x32xf32, #tpu.memory_space<vmem>>, vector<1x32xf32>
    %cst_15 = arith.constant dense<0.000000e+00> : vector<512x32xf32>
    %16 = tpu.matmul %12, %13, %cst_15 {dimension_numbers = #tpu.dot_dimension_numbers<[1], [0], [0], [1], [0, 0, 1, 1], [], []>} : vector<512x32xbf16>, vector<32x32xbf16>, vector<512x32xf32> -> vector<512x32xf32>
    %17 = vector.broadcast %14 : vector<1x32xf32> to vector<512x32xf32>
    %18 = arith.mulf %16, %17 : vector<512x32xf32>
    %19 = vector.broadcast %15 : vector<1x32xf32> to vector<512x32xf32>
    %20 = arith.addf %18, %19 : vector<512x32xf32>
    %cst_16 = arith.constant 0.000000e+00 : f32
    %21 = vector.broadcast %cst_16 : f32 to vector<512x32xf32>
    %22 = arith.maximumf %20, %21 : vector<512x32xf32>
    %23 = arith.truncf %22 : vector<512x32xf32> to vector<512x32xbf16>
    %c0_17 = arith.constant 0 : index
    %c0_18 = arith.constant 0 : index
    %24 = vector.load %arg9[%c0_17, %c0_18] : memref<32x64xbf16, #tpu.memory_space<vmem>>, vector<32x64xbf16>
    %c0_19 = arith.constant 0 : index
    %c0_20 = arith.constant 0 : index
    %25 = vector.load %arg10[%c0_19, %c0_20] : memref<1x64xf32, #tpu.memory_space<vmem>>, vector<1x64xf32>
    %c0_21 = arith.constant 0 : index
    %c0_22 = arith.constant 0 : index
    %26 = vector.load %arg11[%c0_21, %c0_22] : memref<1x64xf32, #tpu.memory_space<vmem>>, vector<1x64xf32>
    %cst_23 = arith.constant dense<0.000000e+00> : vector<512x64xf32>
    %27 = tpu.matmul %23, %24, %cst_23 {dimension_numbers = #tpu.dot_dimension_numbers<[1], [0], [0], [1], [0, 0, 1, 1], [], []>} : vector<512x32xbf16>, vector<32x64xbf16>, vector<512x64xf32> -> vector<512x64xf32>
    %28 = vector.broadcast %25 : vector<1x64xf32> to vector<512x64xf32>
    %29 = arith.mulf %27, %28 : vector<512x64xf32>
    %30 = vector.broadcast %26 : vector<1x64xf32> to vector<512x64xf32>
    %31 = arith.addf %29, %30 : vector<512x64xf32>
    %cst_24 = arith.constant 0.000000e+00 : f32
    %32 = vector.broadcast %cst_24 : f32 to vector<512x64xf32>
    %33 = arith.maximumf %31, %32 : vector<512x64xf32>
    %34 = vector.shape_cast %33 : vector<512x64xf32> to vector<32x16x64xf32>
    %cst_25 = arith.constant dense<0xFF800000> : vector<32x64xf32>
    %35 = vector.multi_reduction <maximumf>, %34, %cst_25 [1] : vector<32x16x64xf32> to vector<32x64xf32>
    %c0_26 = arith.constant 0 : index
    %c0_27 = arith.constant 0 : index
    %c0_28 = arith.constant 0 : index
    %36 = vector.load %arg2[%c0_26, %c0_27, %c0_28] : memref<32x32x24xbf16, #tpu.memory_space<vmem>>, vector<32x32x24xbf16>
    %37 = vector.shape_cast %36 : vector<32x32x24xbf16> to vector<1024x24xbf16>
    %c0_29 = arith.constant 0 : index
    %c0_30 = arith.constant 0 : index
    %38 = vector.load %arg12[%c0_29, %c0_30] : memref<24x32xbf16, #tpu.memory_space<vmem>>, vector<24x32xbf16>
    %c0_31 = arith.constant 0 : index
    %c0_32 = arith.constant 0 : index
    %39 = vector.load %arg13[%c0_31, %c0_32] : memref<1x32xf32, #tpu.memory_space<vmem>>, vector<1x32xf32>
    %c0_33 = arith.constant 0 : index
    %c0_34 = arith.constant 0 : index
    %40 = vector.load %arg14[%c0_33, %c0_34] : memref<1x32xf32, #tpu.memory_space<vmem>>, vector<1x32xf32>
    %cst_35 = arith.constant dense<0.000000e+00> : vector<1024x32xf32>
    %41 = tpu.matmul %37, %38, %cst_35 {dimension_numbers = #tpu.dot_dimension_numbers<[1], [0], [0], [1], [0, 0, 1, 1], [], []>} : vector<1024x24xbf16>, vector<24x32xbf16>, vector<1024x32xf32> -> vector<1024x32xf32>
    %42 = vector.broadcast %39 : vector<1x32xf32> to vector<1024x32xf32>
    %43 = arith.mulf %41, %42 : vector<1024x32xf32>
    %44 = vector.broadcast %40 : vector<1x32xf32> to vector<1024x32xf32>
    %45 = arith.addf %43, %44 : vector<1024x32xf32>
    %cst_36 = arith.constant 0.000000e+00 : f32
    %46 = vector.broadcast %cst_36 : f32 to vector<1024x32xf32>
    %47 = arith.maximumf %45, %46 : vector<1024x32xf32>
    %48 = arith.truncf %47 : vector<1024x32xf32> to vector<1024x32xbf16>
    %c0_37 = arith.constant 0 : index
    %c0_38 = arith.constant 0 : index
    %49 = vector.load %arg15[%c0_37, %c0_38] : memref<32x48xbf16, #tpu.memory_space<vmem>>, vector<32x48xbf16>
    %c0_39 = arith.constant 0 : index
    %c0_40 = arith.constant 0 : index
    %50 = vector.load %arg16[%c0_39, %c0_40] : memref<1x48xf32, #tpu.memory_space<vmem>>, vector<1x48xf32>
    %c0_41 = arith.constant 0 : index
    %c0_42 = arith.constant 0 : index
    %51 = vector.load %arg17[%c0_41, %c0_42] : memref<1x48xf32, #tpu.memory_space<vmem>>, vector<1x48xf32>
    %cst_43 = arith.constant dense<0.000000e+00> : vector<1024x48xf32>
    %52 = tpu.matmul %48, %49, %cst_43 {dimension_numbers = #tpu.dot_dimension_numbers<[1], [0], [0], [1], [0, 0, 1, 1], [], []>} : vector<1024x32xbf16>, vector<32x48xbf16>, vector<1024x48xf32> -> vector<1024x48xf32>
    %53 = vector.broadcast %50 : vector<1x48xf32> to vector<1024x48xf32>
    %54 = arith.mulf %52, %53 : vector<1024x48xf32>
    %55 = vector.broadcast %51 : vector<1x48xf32> to vector<1024x48xf32>
    %56 = arith.addf %54, %55 : vector<1024x48xf32>
    %cst_44 = arith.constant 0.000000e+00 : f32
    %57 = vector.broadcast %cst_44 : f32 to vector<1024x48xf32>
    %58 = arith.maximumf %56, %57 : vector<1024x48xf32>
    %59 = arith.truncf %58 : vector<1024x48xf32> to vector<1024x48xbf16>
    %c0_45 = arith.constant 0 : index
    %c0_46 = arith.constant 0 : index
    %60 = vector.load %arg18[%c0_45, %c0_46] : memref<48x64xbf16, #tpu.memory_space<vmem>>, vector<48x64xbf16>
    %c0_47 = arith.constant 0 : index
    %c0_48 = arith.constant 0 : index
    %61 = vector.load %arg19[%c0_47, %c0_48] : memref<1x64xf32, #tpu.memory_space<vmem>>, vector<1x64xf32>
    %c0_49 = arith.constant 0 : index
    %c0_50 = arith.constant 0 : index
    %62 = vector.load %arg20[%c0_49, %c0_50] : memref<1x64xf32, #tpu.memory_space<vmem>>, vector<1x64xf32>
    %cst_51 = arith.constant dense<0.000000e+00> : vector<1024x64xf32>
    %63 = tpu.matmul %59, %60, %cst_51 {dimension_numbers = #tpu.dot_dimension_numbers<[1], [0], [0], [1], [0, 0, 1, 1], [], []>} : vector<1024x48xbf16>, vector<48x64xbf16>, vector<1024x64xf32> -> vector<1024x64xf32>
    %64 = vector.broadcast %61 : vector<1x64xf32> to vector<1024x64xf32>
    %65 = arith.mulf %63, %64 : vector<1024x64xf32>
    %66 = vector.broadcast %62 : vector<1x64xf32> to vector<1024x64xf32>
    %67 = arith.addf %65, %66 : vector<1024x64xf32>
    %cst_52 = arith.constant 0.000000e+00 : f32
    %68 = vector.broadcast %cst_52 : f32 to vector<1024x64xf32>
    %69 = arith.maximumf %67, %68 : vector<1024x64xf32>
    %70 = vector.shape_cast %69 : vector<1024x64xf32> to vector<32x32x64xf32>
    %cst_53 = arith.constant dense<0xFF800000> : vector<32x64xf32>
    %71 = vector.multi_reduction <maximumf>, %70, %cst_53 [1] : vector<32x32x64xf32> to vector<32x64xf32>
    %72 = tpu.concatenate %35, %71 in 1 : vector<32x64xf32>, vector<32x64xf32> -> vector<32x128xf32>
    %c0_54 = arith.constant 0 : index
    %c0_55 = arith.constant 0 : index
    %73 = vector.load %arg21[%c0_54, %c0_55] : memref<32x128xf32, #tpu.memory_space<vmem>>, vector<32x128xf32>
    tpu.vector_store %arg21[%c0_54, %c0_55], %72 {strides = array<i32>} : memref<32x128xf32, #tpu.memory_space<vmem>>, vector<32x128xf32>,
    return
  }
  func.func @transform_0(%arg0: i32) -> (i32, i32, i32) {
    %c0_i32 = arith.constant 0 : i32
    %c0_i32_0 = arith.constant 0 : i32
    %c0_i32_1 = arith.constant 0 : i32
    return %arg0, %c0_i32, %c0_i32_0 : i32, i32, i32
  }
  func.func @transform_1(%arg0: i32) -> (i32, i32, i32) {
    %c0_i32 = arith.constant 0 : i32
    %c0_i32_0 = arith.constant 0 : i32
    %c0_i32_1 = arith.constant 0 : i32
    return %arg0, %c0_i32, %c0_i32_0 : i32, i32, i32
  }
  func.func @transform_2(%arg0: i32) -> (i32, i32) {
    %c0_i32 = arith.constant 0 : i32
    %c0_i32_0 = arith.constant 0 : i32
    %c0_i32_1 = arith.constant 0 : i32
    return %c0_i32, %c0_i32_0 : i32, i32
  }
  func.func @transform_3(%arg0: i32) -> (i32, i32) {
    %c0_i32 = arith.constant 0 : i32
    %c0_i32_0 = arith.constant 0 : i32
    %c0_i32_1 = arith.constant 0 : i32
    return %c0_i32, %c0_i32_0 : i32, i32
  }
  func.func @transform_4(%arg0: i32) -> (i32, i32) {
    %c0_i32 = arith.constant 0 : i32
    %c0_i32_0 = arith.constant 0 : i32
    %c0_i32_1 = arith.constant 0 : i32
    return %c0_i32, %c0_i32_0 : i32, i32
  }
  func.func @transform_5(%arg0: i32) -> (i32, i32) {
    %c0_i32 = arith.constant 0 : i32
    %c0_i32_0 = arith.constant 0 : i32
    %c0_i32_1 = arith.constant 0 : i32
    return %c0_i32, %c0_i32_0 : i32, i32
  }
  func.func @transform_6(%arg0: i32) -> (i32, i32) {
    %c0_i32 = arith.constant 0 : i32
    %c0_i32_0 = arith.constant 0 : i32
    %c0_i32_1 = arith.constant 0 : i32
    return %c0_i32, %c0_i32_0 : i32, i32
  }
  func.func @transform_7(%arg0: i32) -> (i32, i32) {
    %c0_i32 = arith.constant 0 : i32
    %c0_i32_0 = arith.constant 0 : i32
    %c0_i32_1 = arith.constant 0 : i32
    return %c0_i32, %c0_i32_0 : i32, i32
  }
  func.func @transform_8(%arg0: i32) -> (i32, i32) {
    %c0_i32 = arith.constant 0 : i32
    %c0_i32_0 = arith.constant 0 : i32
    %c0_i32_1 = arith.constant 0 : i32
    return %c0_i32, %c0_i32_0 : i32, i32
  }
  func.func @transform_9(%arg0: i32) -> (i32, i32) {
    %c0_i32 = arith.constant 0 : i32
    %c0_i32_0 = arith.constant 0 : i32
    %c0_i32_1 = arith.constant 0 : i32
    return %c0_i32, %c0_i32_0 : i32, i32
  }
  func.func @transform_10(%arg0: i32) -> (i32, i32) {
    %c0_i32 = arith.constant 0 : i32
    %c0_i32_0 = arith.constant 0 : i32
    %c0_i32_1 = arith.constant 0 : i32
    return %c0_i32, %c0_i32_0 : i32, i32
  }
  func.func @transform_11(%arg0: i32) -> (i32, i32) {
    %c0_i32 = arith.constant 0 : i32
    %c0_i32_0 = arith.constant 0 : i32
    %c0_i32_1 = arith.constant 0 : i32
    return %c0_i32, %c0_i32_0 : i32, i32
  }
  func.func @transform_12(%arg0: i32) -> (i32, i32) {
    %c0_i32 = arith.constant 0 : i32
    %c0_i32_0 = arith.constant 0 : i32
    %c0_i32_1 = arith.constant 0 : i32
    return %c0_i32, %c0_i32_0 : i32, i32
  }
  func.func @transform_13(%arg0: i32) -> (i32, i32) {
    %c0_i32 = arith.constant 0 : i32
    %c0_i32_0 = arith.constant 0 : i32
    %c0_i32_1 = arith.constant 0 : i32
    return %c0_i32, %c0_i32_0 : i32, i32
  }
  func.func @transform_14(%arg0: i32) -> (i32, i32) {
    %c0_i32 = arith.constant 0 : i32
    %c0_i32_0 = arith.constant 0 : i32
    %c0_i32_1 = arith.constant 0 : i32
    return %c0_i32, %c0_i32_0 : i32, i32
  }
  func.func @transform_15(%arg0: i32) -> (i32, i32) {
    %c0_i32 = arith.constant 0 : i32
    %c0_i32_0 = arith.constant 0 : i32
    %c0_i32_1 = arith.constant 0 : i32
    return %c0_i32, %c0_i32_0 : i32, i32
  }
  func.func @transform_16(%arg0: i32) -> (i32, i32) {
    %c0_i32 = arith.constant 0 : i32
    %c0_i32_0 = arith.constant 0 : i32
    %c0_i32_1 = arith.constant 0 : i32
    return %c0_i32, %c0_i32_0 : i32, i32
  }
  func.func @transform_17(%arg0: i32) -> (i32, i32) {
    %c0_i32 = arith.constant 0 : i32
    %c0_i32_0 = arith.constant 0 : i32
    %c0_i32_1 = arith.constant 0 : i32
    return %c0_i32, %c0_i32_0 : i32, i32
  }
  func.func @transform_18(%arg0: i32) -> (i32, i32) {
    %c0_i32 = arith.constant 0 : i32
    %c0_i32_0 = arith.constant 0 : i32
    %c0_i32_1 = arith.constant 0 : i32
    return %c0_i32, %c0_i32_0 : i32, i32
  }
  func.func @transform_19(%arg0: i32) -> (i32, i32) {
    %c0_i32 = arith.constant 0 : i32
    %c0_i32_0 = arith.constant 0 : i32
    %c0_i32_1 = arith.constant 0 : i32
    return %c0_i32, %c0_i32_0 : i32, i32
  }
  func.func @transform_20(%arg0: i32) -> (i32, i32) {
    %c0_i32 = arith.constant 0 : i32
    %c0_i32_0 = arith.constant 0 : i32
    return %arg0, %c0_i32 : i32, i32
  }
}

</mosaic_0001>

<bundles_post_ra>
// kernel: tpu_custom_call.1
= control target key start
LH: loop header
LB: loop body
LE: loop exit
PB: predicated region body
PF: predicated region fallthrough
CT: control target
= control target key end

     0   :  { %s12396_s0 = inlined_call_operand.vmem [shape: bf16[64,16,24], index: 0, kind: input, shape index: {}]   ;;  %s12397_s1 = inlined_call_operand.vmem [shape: bf16[64,32,24], index: 1, kind: input, shape index: {}]   ;;  %s12398_s2 = inlined_call_operand.vmem [shape: bf16[24,32], index: 2, kind: input, shape index: {}]   ;;  %s12399_s3 = inlined_call_operand.vmem [shape: f32[1,32], index: 3, kind: input, shape index: {}]   ;;  %s12400_s4 = inlined_call_operand.vmem [shape: f32[1,32], index: 4, kind: input, shape index: {}]   ;;  %s12401_s5 = inlined_call_operand.vmem [shape: bf16[32,32], index: 5, kind: input, shape index: {}]   ;;  %s12402_s6 = inlined_call_operand.vmem [shape: f32[1,32], index: 6, kind: input, shape index: {}]   ;;  %s12403_s7 = inlined_call_operand.vmem [shape: f32[1,32], index: 7, kind: input, shape index: {}]   ;;  %s12404_s8 = inlined_call_operand.vmem [shape: bf16[32,64], index: 8, kind: input, shape index: {}]   ;;  %s12405_s9 = inlined_call_operand.vmem [shape: f32[1,64], index: 9, kind: input, shape index: {}]   ;;  %s12406_s10 = inlined_call_operand.vmem [shape: f32[1,64], index: 10, kind: input, shape index: {}]   ;;  %s12407_s11 = inlined_call_operand.vmem [shape: bf16[24,32], index: 11, kind: input, shape index: {}]   ;;  %s12408_s12 = inlined_call_operand.vmem [shape: f32[1,32], index: 12, kind: input, shape index: {}]   ;;  %s12409_s13 = inlined_call_operand.vmem [shape: f32[1,32], index: 13, kind: input, shape index: {}]   ;;  %s12410_s14 = inlined_call_operand.vmem [shape: bf16[32,48], index: 14, kind: input, shape index: {}]   ;;  %s12411_s15 = inlined_call_operand.vmem [shape: f32[1,48], index: 15, kind: input, shape index: {}]   ;;  %s12412_s16 = inlined_call_operand.vmem [shape: f32[1,48], index: 16, kind: input, shape index: {}]   ;;  %s12413_s17 = inlined_call_operand.vmem [shape: bf16[48,64], index: 17, kind: input, shape index: {}]   ;;  %s12414_s18 = inlined_call_operand.vmem [shape: f32[1,64], index: 18, kind: input, shape index: {}]   ;;  %s12415_s19 = inlined_call_operand.vmem [shape: f32[1,64], index: 19, kind: input, shape index: {}]   ;;  %s12416_s20 = inlined_call_operand.hbm [shape: f32[64,128], index: 20, kind: output, shape index: {}]  }
   0x1   :  { %12436 = sst [smem:[#allocation46_spill]] %s12396_s0 }
   0x2   :  { %12437 = sst [smem:[#allocation47_spill]] %s12397_s1 }
   0x3   :  { %12438 = sst [smem:[#allocation48_spill]] %s12398_s2 }
   0x4   :  { %12439 = sst [smem:[#allocation49_spill]] %s12399_s3 }
   0x5   :  { %12440 = sst [smem:[#allocation50_spill]] %s12400_s4 }
   0x6   :  { %12441 = sst [smem:[#allocation51_spill]] %s12401_s5 }
   0x7   :  { %25 = vsyncpa [#allocation3], 0 }
   0x8   :  { %27 = vsyncpa [#allocation3 + $0x1], 0  ;;  %s9422_s1 = smov 0   ;;  %s9424_s22 = smov 0  }
   0x9   :  { %s9426_s23 = smov 0   ;;  %s9428_s24 = smov 0  }
   0xa LB: > { %12442 = sst [smem:[#allocation5_spill]] %s9307_s23  ;;  %s9443_s2 = sadd.s32 4294967295, %s9311_s24   ;;  %s9311_s24 = sphi %s9428_s24, %s12555_s24   ;;  %s9307_s23 = sphi %s9426_s23, %s12560_s23   ;;  %s9303_s22 = sphi %s9424_s22, %s12559_s22   ;;  %s9299_s1 = sphi %s9422_s1, %s12558_s1  }
   0xb   : > { %s7752_s25 = sadd.s32 4294967294, %s9311_s24   ;;  %s9447_s3 = sadd.s32 1, %s9311_s24  }
   0xc   : > { %12443 = sst [smem:[#allocation6_spill]] %s9447_s3  ;;  %s470_s26 = sadd.s32 1, %s9307_s23 }
   0xd   : > { %s467_s27 = ssub.s32 %s9311_s24, %s9447_s3  ;;  %p480_p0 = scmp.ne.s32.totalorder %s9307_s23, %s9303_s22 }
   0xe   : > { %p468_p1 = scmp.eq.s32.totalorder %s467_s27, 0  ;;  %p481_p2 = scmp.eq.s32.totalorder %s9443_s2, 1 }
   0xf   : > { %p486_p3 = scmp.ne.s32.totalorder %s9303_s22, %s9299_s1  ;;  %p487_p4 = scmp.eq.s32.totalorder %s7752_s25, 1 }
  0x10   : > { %s9458_s28 = scalar_select %p468_p1, %s9307_s23, %s470_s26  }
  0x11   : > { %p9460_p5 = por %p481_p2, %p480_p0  ;;  %p9464_p6 = por %p487_p4, %p486_p3 }
  0x12   : > { %12444 = sst [smem:[#allocation7_spill]] %s9458_s28  ;;  %p7755_p7 = scmp.ge.s32.totalorder %s9311_s24, 1 }
  0x13   : > { %s12446_s29 = scalar_select %p9464_p6, 1, 0 }
  0x14   : > { %p579_p8 = scmp.lt.s32.totalorder %s9311_s24, 3 }
  0x15   : > { %12447 = sst [smem:[#allocation8_spill]] %s12446_s29 }
  0x16   : > { %p580_p9 = pnand %p7755_p7, %p579_p8 }
  0x18   : > { %583 = sbr.rel (%p580_p9) target bundleno = 1440 (0x5a0), region = 100 }
  0x1d   : > { %s12448_s21 = sld [smem:[#allocation48_spill]]  ;;  %vm995_vm0 = vcmask 1043456   ;;  %s7757_s27 = sshll.u32 %s9443_s2, 5  ;;  %vm898_vm1 = vcmask 195584   ;;  %v9566_v37 = vld [vmem:[%s12407_s11 + $0x8] ss:$0 sps:$4 sm:$0xff]  }
  0x1e   : > { %p645_p10 = scmp.lt.s32.totalorder %s7757_s27, 63  ;;  %s12449_s5 = sld [smem:[#allocation51_spill]]  ;;  %vm1542_vm2 = vcmask 261120   ;;  %vm2771_vm3 = vcmask 523264   ;;  %vm5963_vm4 = vcmask 392192   ;;  %vm7545_vm5 = vcmask 1041409  }
  0x1f   : > { %s12450_s3 = sld [smem:[#allocation46_spill]]  ;;  %vm7547_vm6 = vcmask 1042434   ;;  %vm7549_vm7 = vcmask 1043459   ;;  %vm7551_vm8 = vcmask 1044484   ;;  %vm7553_vm9 = vcmask 1045509  }
  0x20   : > { %s12562_s27 = smov (!%p645_p10, %s7757_s27), 63  ;;  %s12453_s28 = sld [smem:[#allocation50_spill]]  ;;  %vm7555_vm10 = vcmask 1046534   ;;  %vm7557_vm11 = vcmask 1047559  }
  0x21   : > { %s8177_s25 = sshll.u32 %s12562_s27, 3  ;;  %s8178_s23 = sshll.u32 %s12562_s27, 4 }
  0x22   : > { %s641_s27 = sand.u32 1, %s9303_s22  }
  0x23   : > { %v9131_v0 = vld [vmem:[%s12448_s21 + $0x8] ss:$0 sps:$4 sm:$0xff]   ;;  %v9132_v1 = vld [vmem:[%s12448_s21] sm:$0xff]   ;;  %s12451_s21 = sld [smem:[#allocation47_spill]]  ;;  %s7756_s0 = sshll.u32 %s641_s27, 5 }
  0x24   : > { %9087 = vmatprep.subr.msk.bf16.mxu0 %vm995_vm0, %v9131_v0  ;;  %v997_v2 = vsel %vm995_vm0, %v9131_v0, 0  ;;  %v9154_v3 = vld [vmem:[%s12449_s5 + $0x8] sm:$0xff]   ;;  %v9166_v4 = vld [vmem:[%s12449_s5] sm:$0xff]  }
  0x25   : > { %8482 = vmatpush3.bf16.msra.mxu0 %v997_v2  ;;  %9083 = vmatprep.subr.bf16.mxu1 %v9154_v3  ;;  %s9491_s29 = scalar_lea.vmem %s12450_s3, %s8177_s25  ;;  %s12203_s25 = scalar_lea.vmem [#allocation2], %s7756_s0 }
  0x26   : > { %8483 = vmatprep.subr.bf16.mxu0 %v9132_v1  ;;  %9085 = vmatpush3.bf16.msra.mxu1 %v9154_v3  ;;  %v9133_v5 = vld [vmem:[%s9491_s29] sm:$0xff]   ;;  %v9134_v6 = vld [vmem:[%s9491_s29 + $0x8] sm:$0xff]   ;;  %v9135_v7 = vld [vmem:[%s9491_s29 + $0x10] sm:$0xff]   ;;  %s7678_s26 = sshll.u32 %s12203_s25, 4  ;;  %s12344_s26 = int_to_ptr.vmem [resolvable:$true] %s7678_s26 }
  0x27   : > { %9084 = vmatprep.subr.bf16.mxu1 %v9166_v4  ;;  %8485 = vmatprep.mubr.msk.bf16.mxu0 %vm898_vm1, %v9133_v5  ;;  %v9136_v8 = vld [vmem:[%s9491_s29 + $0x18] sm:$0xff]   ;;  %v9137_v9 = vld [vmem:[%s9491_s29 + $0x20] sm:$0xff]   ;;  %v9138_v10 = vld [vmem:[%s9491_s29 + $0x28] sm:$0xff]  }
  0x28   : > { %v9139_v11 = vld [vmem:[%s9491_s29 + $0x30] sm:$0xff]   ;;  %v9140_v12 = vld [vmem:[%s9491_s29 + $0x38] sm:$0xff]   ;;  %v9141_v13 = vld [vmem:[%s9491_s29 + $0x40] sm:$0xff]  }
  0x29   : > { %8484 = vmatpush3.bf16.msra.mxu0 %v9132_v1  ;;  %v9142_v14 = vld [vmem:[%s9491_s29 + $0x48] sm:$0xff]   ;;  %s9516_s30 = scalar_lea.vmem %s12451_s21, %s8178_s23  ;;  %v9143_v15 = vld [vmem:[%s9491_s29 + $0x50] sm:$0xff]   ;;  %v9144_v16 = vld [vmem:[%s9491_s29 + $0x58] sm:$0xff]   ;;  %s12452_s23 = sld [smem:[#allocation49_spill]] }
  0x2a   : > { %8549 = vmatprep.subr.bf16.mxu0 %v9154_v3  ;;  %9086 = vmatpush3.bf16.msra.mxu1 %v9166_v4  ;;  %v9145_v17 = vld [vmem:[%s9491_s29 + $0x60] sm:$0xff]   ;;  %v9146_v18 = vld [vmem:[%s9491_s29 + $0x68] sm:$0xff]   ;;  %v9147_v19 = vld [vmem:[%s9491_s29 + $0x70] sm:$0xff]   ;;  %s9251_s21 = scalar_lea.vmem %s12344_s26, 512 }
  0x2b   : > { %v9148_v20 = vld [vmem:[%s9491_s29 + $0x78] sm:$0xff]   ;;  %v9149_v21 = vld [vmem:[%s9491_s29 + $0x80] sm:$0xff]   ;;  %v9150_v22 = vld [vmem:[%s9491_s29 + $0x88] sm:$0xff]   ;;  %9088 = vmatprep.subr.msk.bf16.mxu1 %vm995_vm0, %v9566_v37  ;;  %p9252_p11 = scmp.ne.s32.totalorder %s12344_s26, %s9251_s21 }
  0x2c   : > { %8486 = vmatmul.mubr.msk.bf16.vlgmr.msra.gmra.mxu0 %vm898_vm1, %v9134_v6  ;;  %v9151_v23 = vld [vmem:[%s9491_s29 + $0x90] sm:$0xff]   ;;  %v9152_v24 = vld [vmem:[%s9491_s29 + $0x98] sm:$0xff]   ;;  %v9153_v25 = vld [vmem:[%s9491_s29 + $0xa0] sm:$0xff]  }
  0x2d   : > { %8489 = vmatprep.mubr.msk.bf16.mxu0 %vm898_vm1, %v9135_v7  ;;  %8550 = vmatpush3.bf16.msra.mxu0 %v9154_v3  ;;  %v9155_v26 = vld [vmem:[%s9491_s29 + $0xa8] sm:$0xff]   ;;  %v9156_v27 = vld [vmem:[%s9491_s29 + $0xb0] sm:$0xff]   ;;  %v9157_v28 = vld [vmem:[%s9491_s29 + $0xb8] sm:$0xff]   ;;  %p9253_p12 = pnand %p9252_p11, %p9460_p5 }
  0x2e   : > { %8551 = vmatprep.subr.bf16.mxu0 %v9166_v4  ;;  %v9158_v29 = vld [vmem:[%s9491_s29 + $0xc0] sm:$0xff]   ;;  %v9159_v30 = vld [vmem:[%s9491_s29 + $0xc8] sm:$0xff]   ;;  %v9160_v31 = vld [vmem:[%s9491_s29 + $0xd0] sm:$0xff]  }
  0x2f   : > { %v9161_v32 = vld [vmem:[%s9491_s29 + $0xd8] sm:$0xff]   ;;  %v9162_v33 = vld [vmem:[%s9491_s29 + $0xe0] sm:$0xff]   ;;  %v9163_v34 = vld [vmem:[%s9491_s29 + $0xe8] sm:$0xff]   ;;  %p9254_p13 = pneg %p9253_p12 }
  0x30   : > { %v9164_v35 = vld [vmem:[%s9491_s29 + $0xf0] sm:$0xff]   ;;  %v9165_v36 = vld [vmem:[%s9491_s29 + $0xf8] sm:$0xff]   ;;  %v9573_v39 = vld [vmem:[%s12452_s23] ss:$0 sm:$0xff]  ;;  %s8179_s23 = sshll.u32 %s9443_s2, 9  ;;  %s9314_s2 = smov [#allocation2]  }
  0x31   : > { %8552 = vmatpush3.bf16.msra.mxu0 %v9166_v4  ;;  %v9580_v44 = vld [vmem:[%s12453_s28] ss:$0 sm:$0xff]  ;;  %s12349_s28 = scalar_lea.hbm %s12416_s20, %s8179_s23  ;;  %s9255_s0 = sshll.u32 %s9314_s2, 4  ;;  %s9256_s0 = int_to_ptr.vmem [resolvable:$false] %s9255_s0 }
  0x32   : > { %s9257_s5 = scalar_lea.vmem %s9256_s0, 1024  ;;  %p9258_p0 = scmp.lt.s32.totalorder %s12344_s26, %s9256_s0 }
  0x33   : > { %p9259_p1 = scmp.lt.s32.totalorder %s9257_s5, %s9251_s21 }
  0x34   : > { %8490 = vmatmul.mubr.msk.bf16.gmra.mxu0 %vm898_vm1, %v9136_v8 }
  0x35   : > { %8493 = vmatprep.mubr.msk.bf16.mxu0 %vm898_vm1, %v9137_v9  ;;  %p9260_p2 = por %p9259_p1, %p9258_p0 }
  0x37   : > { %p9261_p3 = pnand %p9260_p2, %p9254_p13 }
  0x3c   : > { %8494 = vmatmul.mubr.msk.bf16.gmra.mxu0 %vm898_vm1, %v9138_v10 }
  0x3d   : > { %8497 = vmatprep.mubr.msk.bf16.mxu0 %vm898_vm1, %v9139_v11 }
  0x44   : > { %8498 = vmatmul.mubr.msk.bf16.gmra.mxu0 %vm898_vm1, %v9140_v12 }
  0x45   : > { %8501 = vmatprep.mubr.msk.bf16.mxu0 %vm898_vm1, %v9141_v13 }
  0x4c   : > { %8502 = vmatmul.mubr.msk.bf16.gmra.mxu0 %vm898_vm1, %v9142_v14 }
  0x4d   : > { %8505 = vmatprep.mubr.msk.bf16.mxu0 %vm898_vm1, %v9143_v15 }
  0x54   : > { %8506 = vmatmul.mubr.msk.bf16.gmra.mxu0 %vm898_vm1, %v9144_v16 }
  0x55   : > { %8509 = vmatprep.mubr.msk.bf16.mxu0 %vm898_vm1, %v9145_v17 }
  0x5c   : > { %8510 = vmatmul.mubr.msk.bf16.gmra.mxu0 %vm898_vm1, %v9146_v18 }
  0x5d   : > { %8513 = vmatprep.mubr.msk.bf16.mxu0 %vm898_vm1, %v9147_v19 }
  0x64   : > { %8514 = vmatmul.mubr.msk.bf16.gmra.mxu0 %vm898_vm1, %v9148_v20 }
  0x65   : > { %8517 = vmatprep.mubr.msk.bf16.mxu0 %vm898_vm1, %v9149_v21 }
  0x6c   : > { %8518 = vmatmul.mubr.msk.bf16.gmra.mxu0 %vm898_vm1, %v9150_v22 }
  0x6d   : > { %8521 = vmatprep.mubr.msk.bf16.mxu0 %vm898_vm1, %v9151_v23 }
  0x74   : > { %8522 = vmatmul.mubr.msk.bf16.gmra.mxu0 %vm898_vm1, %v9152_v24  ;;  %v9173_v24 = vld [vmem:[%s12404_s8 + $0x8] sm:$0xff]  }
  0x75   : > { %8525 = vmatprep.mubr.msk.bf16.mxu0 %vm898_vm1, %v9153_v25  ;;  %8617 = vmatprep.subr.bf16.mxu0 %v9173_v24 }
  0x7c   : > { %8526 = vmatmul.mubr.msk.bf16.gmra.mxu0 %vm898_vm1, %v9155_v26 }
  0x7d   : > { %8529 = vmatprep.mubr.msk.bf16.mxu0 %vm898_vm1, %v9156_v27 }
  0x84   : > { %8530 = vmatmul.mubr.msk.bf16.gmra.mxu0 %vm898_vm1, %v9157_v28 }
  0x85   : > { %8533 = vmatprep.mubr.msk.bf16.mxu0 %vm898_vm1, %v9158_v29 }
  0x8c   : > { %8534 = vmatmul.mubr.msk.bf16.gmra.mxu0 %vm898_vm1, %v9159_v30 }
  0x8d   : > { %8537 = vmatprep.mubr.msk.bf16.mxu0 %vm898_vm1, %v9160_v31 }
  0x94   : > { %8538 = vmatmul.mubr.msk.bf16.gmra.mxu0 %vm898_vm1, %v9161_v32 }
  0x95   : > { %8541 = vmatprep.mubr.msk.bf16.mxu0 %vm898_vm1, %v9162_v33 }
  0x9c   : > { %8542 = vmatmul.mubr.msk.bf16.gmra.mxu0 %vm898_vm1, %v9163_v34 }
  0x9d   : > { %8545 = vmatprep.mubr.msk.bf16.mxu0 %vm898_vm1, %v9164_v35 }
  0xa4   : > { %8546 = vmatmul.mubr.msk.bf16.gmra.mxu0 %vm898_vm1, %v9165_v36 }
  0xec   : > { %v8487_v38 = vpop.f32.mrf.mxu0 }
  0xed   : > { %v1296_v42 = vmul.f32 %v8487_v38, %v9573_v39 }
  0xee   : > { %v1033_v40 = vpop.f32.mrf.mxu0 }
  0xef   : > { %v1294_v41 = vmul.f32 %v9573_v39, %v1033_v40  ;;  %v1366_v50 = vadd.f32 %v9580_v44, %v1296_v42 }
  0xf0   : > { %v8488_v43 = vpop.f32.mrf.mxu0 }
  0xf1   : > { %v1297_v45 = vmul.f32 %v8488_v43, %v9573_v39  ;;  %v1364_v47 = vadd.f32 %v9580_v44, %v1294_v41  ;;  %v1430_v58 = vmax.f32 %v1366_v50, 0.0 }
  0xf2   : > { %v1036_v46 = vpop.f32.mrf.mxu0 }
  0xf3   : > { %v1367_v48 = vadd.f32 %v9580_v44, %v1297_v45  ;;  %v1295_v49 = vmul.f32 %v9573_v39, %v1036_v46  ;;  %v1428_v55 = vmax.f32 %v1364_v47, 0.0 }
  0xf4   : > { %v8491_v51 = vpop.f32.mrf.mxu0 }
  0xf5   : > { %v1365_v52 = vadd.f32 %v9580_v44, %v1295_v49  ;;  %v1431_v53 = vmax.f32 %v1367_v48, 0.0  ;;  %v1300_v59 = vmul.f32 %v8491_v51, %v9573_v39 }
  0xf6   : > { %v1049_v54 = vpop.f32.mrf.mxu0 }
  0xf7   : > { %v1429_v56 = vmax.f32 %v1365_v52, 0.0  ;;  %v1298_v57 = vmul.f32 %v9573_v39, %v1049_v54  ;;  %v1493_v63 = vpack.c.bf16 %v1431_v53, %v1430_v58  ;;  %v1370_v4 = vadd.f32 %v9580_v44, %v1300_v59 }
  0xf8   : > { %v8492_v60 = vpop.f32.mrf.mxu0 }
  0xf9   : > { %v1492_v61 = vpack.c.bf16 %v1429_v56, %v1428_v55  ;;  %v1301_v62 = vmul.f32 %v8492_v60, %v9573_v39  ;;  %v1368_v1 = vadd.f32 %v9580_v44, %v1298_v57  ;;  %v1434_v12 = vmax.f32 %v1370_v4, 0.0 }
  0xfa   : > { %v1052_v0 = vpop.f32.mrf.mxu0 }
  0xfb   : > { %v1371_v2 = vadd.f32 %v9580_v44, %v1301_v62  ;;  %v1299_v3 = vmul.f32 %v9573_v39, %v1052_v0  ;;  %8553 = vmatprep.mubr.msk.bf16.mxu0 %vm1542_vm2, %v1492_v61  ;;  %v1432_v9 = vmax.f32 %v1368_v1, 0.0 }
  0xfc   : > { %v8495_v5 = vpop.f32.mrf.mxu0  ;;  %8554 = vmatmul.mubr.msk.bf16.vlgmr.msra.gmra.mxu0 %vm1542_vm2, %v1493_v63 }
  0xfd   : > { %v1369_v6 = vadd.f32 %v9580_v44, %v1299_v3  ;;  %v1435_v7 = vmax.f32 %v1371_v2, 0.0  ;;  %v1304_v13 = vmul.f32 %v8495_v5, %v9573_v39  ;;  %8618 = vmatpush3.bf16.msra.mxu0 %v9173_v24 }
  0xfe   : > { %v1065_v8 = vpop.f32.mrf.mxu0 }
  0xff   : > { %v1433_v10 = vmax.f32 %v1369_v6, 0.0  ;;  %v1302_v11 = vmul.f32 %v9573_v39, %v1065_v8  ;;  %v1495_v17 = vpack.c.bf16 %v1435_v7, %v1434_v12  ;;  %v1374_v22 = vadd.f32 %v9580_v44, %v1304_v13 }
 0x100   : > { %v8496_v14 = vpop.f32.mrf.mxu0 }
 0x101   : > { %v1494_v15 = vpack.c.bf16 %v1433_v10, %v1432_v9  ;;  %v1305_v16 = vmul.f32 %v8496_v14, %v9573_v39  ;;  %v1372_v19 = vadd.f32 %v9580_v44, %v1302_v11  ;;  %v1438_v31 = vmax.f32 %v1374_v22, 0.0 }
 0x102   : > { %v1068_v18 = vpop.f32.mrf.mxu0 }
 0x103   : > { %v1375_v20 = vadd.f32 %v9580_v44, %v1305_v16  ;;  %v1303_v21 = vmul.f32 %v9573_v39, %v1068_v18  ;;  %8557 = vmatprep.mubr.msk.bf16.mxu0 %vm1542_vm2, %v1494_v15  ;;  %v1436_v28 = vmax.f32 %v1372_v19, 0.0 }
 0x104   : > { %v8499_v23 = vpop.f32.mrf.mxu0  ;;  %8558 = vmatmul.mubr.msk.bf16.gmra.mxu0 %vm1542_vm2, %v1495_v17 }
 0x105   : > { %v1373_v25 = vadd.f32 %v9580_v44, %v1303_v21  ;;  %v1439_v26 = vmax.f32 %v1375_v20, 0.0  ;;  %v1308_v32 = vmul.f32 %v8499_v23, %v9573_v39 }
 0x106   : > { %v1081_v27 = vpop.f32.mrf.mxu0 }
 0x107   : > { %v1437_v29 = vmax.f32 %v1373_v25, 0.0  ;;  %v1306_v30 = vmul.f32 %v9573_v39, %v1081_v27  ;;  %v1497_v36 = vpack.c.bf16 %v1439_v26, %v1438_v31  ;;  %v1378_v43 = vadd.f32 %v9580_v44, %v1308_v32 }
 0x108   : > { %v8500_v33 = vpop.f32.mrf.mxu0 }
 0x109   : > { %v1496_v34 = vpack.c.bf16 %v1437_v29, %v1436_v28  ;;  %v1309_v35 = vmul.f32 %v8500_v33, %v9573_v39  ;;  %v1376_v40 = vadd.f32 %v9580_v44, %v1306_v30  ;;  %v1442_v52 = vmax.f32 %v1378_v43, 0.0 }
 0x10a   : > { %v1084_v38 = vpop.f32.mrf.mxu0 }
 0x10b   : > { %v1379_v41 = vadd.f32 %v9580_v44, %v1309_v35  ;;  %v1307_v42 = vmul.f32 %v9573_v39, %v1084_v38  ;;  %8561 = vmatprep.mubr.msk.bf16.mxu0 %vm1542_vm2, %v1496_v34  ;;  %v1440_v49 = vmax.f32 %v1376_v40, 0.0 }
 0x10c   : > { %v8503_v45 = vpop.f32.mrf.mxu0  ;;  %8562 = vmatmul.mubr.msk.bf16.gmra.mxu0 %vm1542_vm2, %v1497_v36  ;;  %v9182_v36 = vld [vmem:[%s12404_s8] sm:$0xff]  }
 0x10d   : > { %v1377_v46 = vadd.f32 %v9580_v44, %v1307_v42  ;;  %v1443_v47 = vmax.f32 %v1379_v41, 0.0  ;;  %v1312_v53 = vmul.f32 %v8503_v45, %v9573_v39  ;;  %8619 = vmatprep.subr.bf16.mxu0 %v9182_v36 }
 0x10e   : > { %v1097_v48 = vpop.f32.mrf.mxu0  ;;  %8620 = vmatpush3.bf16.msra.mxu0 %v9182_v36 }
 0x10f   : > { %v1441_v50 = vmax.f32 %v1377_v46, 0.0  ;;  %v1310_v51 = vmul.f32 %v9573_v39, %v1097_v48  ;;  %v1499_v57 = vpack.c.bf16 %v1443_v47, %v1442_v52  ;;  %v1382_v62 = vadd.f32 %v9580_v44, %v1312_v53 }
 0x110   : > { %v8504_v54 = vpop.f32.mrf.mxu0 }
 0x111   : > { %v1498_v55 = vpack.c.bf16 %v1441_v50, %v1440_v49  ;;  %v1313_v56 = vmul.f32 %v8504_v54, %v9573_v39  ;;  %v1380_v59 = vadd.f32 %v9580_v44, %v1310_v51  ;;  %v1446_v6 = vmax.f32 %v1382_v62, 0.0 }
 0x112   : > { %v1100_v58 = vpop.f32.mrf.mxu0 }
 0x113   : > { %v1383_v60 = vadd.f32 %v9580_v44, %v1313_v56  ;;  %v1311_v61 = vmul.f32 %v9573_v39, %v1100_v58  ;;  %8565 = vmatprep.mubr.msk.bf16.mxu0 %vm1542_vm2, %v1498_v55  ;;  %v1444_v3 = vmax.f32 %v1380_v59, 0.0 }
 0x114   : > { %v8507_v63 = vpop.f32.mrf.mxu0  ;;  %8566 = vmatmul.mubr.msk.bf16.gmra.mxu0 %vm1542_vm2, %v1499_v57 }
 0x115   : > { %v1381_v0 = vadd.f32 %v9580_v44, %v1311_v61  ;;  %v1447_v1 = vmax.f32 %v1383_v60, 0.0  ;;  %v1316_v7 = vmul.f32 %v8507_v63, %v9573_v39 }
 0x116   : > { %v1113_v2 = vpop.f32.mrf.mxu0 }
 0x117   : > { %v1445_v4 = vmax.f32 %v1381_v0, 0.0  ;;  %v1314_v5 = vmul.f32 %v9573_v39, %v1113_v2  ;;  %v1501_v11 = vpack.c.bf16 %v1447_v1, %v1446_v6  ;;  %v1386_v16 = vadd.f32 %v9580_v44, %v1316_v7 }
 0x118   : > { %v8508_v8 = vpop.f32.mrf.mxu0 }
 0x119   : > { %v1500_v9 = vpack.c.bf16 %v1445_v4, %v1444_v3  ;;  %v1317_v10 = vmul.f32 %v8508_v8, %v9573_v39  ;;  %v1384_v13 = vadd.f32 %v9580_v44, %v1314_v5  ;;  %v1450_v24 = vmax.f32 %v1386_v16, 0.0 }
 0x11a   : > { %v1116_v12 = vpop.f32.mrf.mxu0 }
 0x11b   : > { %v1387_v14 = vadd.f32 %v9580_v44, %v1317_v10  ;;  %v1315_v15 = vmul.f32 %v9573_v39, %v1116_v12  ;;  %8569 = vmatprep.mubr.msk.bf16.mxu0 %vm1542_vm2, %v1500_v9  ;;  %v1448_v21 = vmax.f32 %v1384_v13, 0.0 }
 0x11c   : > { %v8511_v17 = vpop.f32.mrf.mxu0  ;;  %8570 = vmatmul.mubr.msk.bf16.gmra.mxu0 %vm1542_vm2, %v1501_v11 }
 0x11d   : > { %v1385_v18 = vadd.f32 %v9580_v44, %v1315_v15  ;;  %v1451_v19 = vmax.f32 %v1387_v14, 0.0  ;;  %v1320_v25 = vmul.f32 %v8511_v17, %v9573_v39 }
 0x11e   : > { %v1129_v20 = vpop.f32.mrf.mxu0 }
 0x11f   : > { %v1449_v22 = vmax.f32 %v1385_v18, 0.0  ;;  %v1318_v23 = vmul.f32 %v9573_v39, %v1129_v20  ;;  %v1503_v29 = vpack.c.bf16 %v1451_v19, %v1450_v24  ;;  %v1390_v34 = vadd.f32 %v9580_v44, %v1320_v25 }
 0x120   : > { %v8512_v26 = vpop.f32.mrf.mxu0  ;;  %v3715_v25 = vsel %vm995_vm0, %v9566_v37, 0 }
 0x121   : > { %v1502_v27 = vpack.c.bf16 %v1449_v22, %v1448_v21  ;;  %v1321_v28 = vmul.f32 %v8512_v26, %v9573_v39  ;;  %v1388_v31 = vadd.f32 %v9580_v44, %v1318_v23  ;;  %v1454_v46 = vmax.f32 %v1390_v34, 0.0  ;;  %v9168_v26 = vld [vmem:[%s12407_s11] sm:$0xff]  }
 0x122   : > { %v1132_v30 = vpop.f32.mrf.mxu0 }
 0x123   : > { %v1391_v32 = vadd.f32 %v9580_v44, %v1321_v28  ;;  %v1319_v33 = vmul.f32 %v9573_v39, %v1132_v30  ;;  %8573 = vmatprep.mubr.msk.bf16.mxu0 %vm1542_vm2, %v1502_v27  ;;  %v1452_v42 = vmax.f32 %v1388_v31, 0.0 }
 0x124   : > { %v8515_v35 = vpop.f32.mrf.mxu0  ;;  %8574 = vmatmul.mubr.msk.bf16.gmra.mxu0 %vm1542_vm2, %v1503_v29 }
 0x125   : > { %v1389_v38 = vadd.f32 %v9580_v44, %v1319_v33  ;;  %v1455_v40 = vmax.f32 %v1391_v32, 0.0  ;;  %v1324_v47 = vmul.f32 %v8515_v35, %v9573_v39 }
 0x126   : > { %v1145_v41 = vpop.f32.mrf.mxu0 }
 0x127   : > { %v1453_v43 = vmax.f32 %v1389_v38, 0.0  ;;  %v1322_v45 = vmul.f32 %v9573_v39, %v1145_v41  ;;  %v1505_v51 = vpack.c.bf16 %v1455_v40, %v1454_v46  ;;  %v1394_v56 = vadd.f32 %v9580_v44, %v1324_v47 }
 0x128   : > { %v8516_v48 = vpop.f32.mrf.mxu0 }
 0x129   : > { %v1504_v49 = vpack.c.bf16 %v1453_v43, %v1452_v42  ;;  %v1325_v50 = vmul.f32 %v8516_v48, %v9573_v39  ;;  %v1392_v53 = vadd.f32 %v9580_v44, %v1322_v45  ;;  %v1458_v0 = vmax.f32 %v1394_v56, 0.0 }
 0x12a   : > { %v1148_v52 = vpop.f32.mrf.mxu0 }
 0x12b   : > { %v1395_v54 = vadd.f32 %v9580_v44, %v1325_v50  ;;  %v1323_v55 = vmul.f32 %v9573_v39, %v1148_v52  ;;  %8577 = vmatprep.mubr.msk.bf16.mxu0 %vm1542_vm2, %v1504_v49  ;;  %v1456_v61 = vmax.f32 %v1392_v53, 0.0 }
 0x12c   : > { %v8519_v57 = vpop.f32.mrf.mxu0  ;;  %8578 = vmatmul.mubr.msk.bf16.gmra.mxu0 %vm1542_vm2, %v1505_v51 }
 0x12d   : > { %v1393_v58 = vadd.f32 %v9580_v44, %v1323_v55  ;;  %v1459_v59 = vmax.f32 %v1395_v54, 0.0  ;;  %v1328_v1 = vmul.f32 %v8519_v57, %v9573_v39 }
 0x12e   : > { %v1161_v60 = vpop.f32.mrf.mxu0 }
 0x12f   : > { %v1457_v62 = vmax.f32 %v1393_v58, 0.0  ;;  %v1326_v63 = vmul.f32 %v9573_v39, %v1161_v60  ;;  %v1507_v5 = vpack.c.bf16 %v1459_v59, %v1458_v0  ;;  %v1398_v10 = vadd.f32 %v9580_v44, %v1328_v1 }
 0x130   : > { %v8520_v2 = vpop.f32.mrf.mxu0 }
 0x131   : > { %v1506_v3 = vpack.c.bf16 %v1457_v62, %v1456_v61  ;;  %v1329_v4 = vmul.f32 %v8520_v2, %v9573_v39  ;;  %v1396_v7 = vadd.f32 %v9580_v44, %v1326_v63  ;;  %v1462_v18 = vmax.f32 %v1398_v10, 0.0 }
 0x132   : > { %v1164_v6 = vpop.f32.mrf.mxu0 }
 0x133   : > { %v1399_v8 = vadd.f32 %v9580_v44, %v1329_v4  ;;  %v1327_v9 = vmul.f32 %v9573_v39, %v1164_v6  ;;  %8581 = vmatprep.mubr.msk.bf16.mxu0 %vm1542_vm2, %v1506_v3  ;;  %v1460_v15 = vmax.f32 %v1396_v7, 0.0 }
 0x134   : > { %v8523_v11 = vpop.f32.mrf.mxu0  ;;  %8582 = vmatmul.mubr.msk.bf16.gmra.mxu0 %vm1542_vm2, %v1507_v5 }
 0x135   : > { %v1397_v12 = vadd.f32 %v9580_v44, %v1327_v9  ;;  %v1463_v13 = vmax.f32 %v1399_v8, 0.0  ;;  %v1332_v19 = vmul.f32 %v8523_v11, %v9573_v39 }
 0x136   : > { %v1177_v14 = vpop.f32.mrf.mxu0 }
 0x137   : > { %v1330_v16 = vmul.f32 %v9573_v39, %v1177_v14  ;;  %v1461_v17 = vmax.f32 %v1397_v12, 0.0  ;;  %v1509_v23 = vpack.c.bf16 %v1463_v13, %v1462_v18  ;;  %v1402_v30 = vadd.f32 %v9580_v44, %v1332_v19 }
 0x138   : > { %v8524_v20 = vpop.f32.mrf.mxu0 }
 0x139   : > { %v1333_v21 = vmul.f32 %v8524_v20, %v9573_v39  ;;  %v1508_v22 = vpack.c.bf16 %v1461_v17, %v1460_v15  ;;  %v1400_v27 = vadd.f32 %v9580_v44, %v1330_v16  ;;  %v1466_v38 = vmax.f32 %v1402_v30, 0.0  ;;  %v9715_v17 = vld [vmem:[%s12410_s14 + $0x8] sm:$0xff]  }
 0x13a   : > { %v1180_v24 = vpop.f32.mrf.mxu0  ;;  %8817 = vmatprep.subr.bf16.mxu0 %v9715_v17 }
 0x13b   : > { %v1403_v28 = vadd.f32 %v9580_v44, %v1333_v21  ;;  %v1331_v29 = vmul.f32 %v9573_v39, %v1180_v24  ;;  %8585 = vmatprep.mubr.msk.bf16.mxu1 %vm1542_vm2, %v1508_v22  ;;  %v1464_v34 = vmax.f32 %v1400_v27, 0.0 }
 0x13c   : > { %v8527_v31 = vpop.f32.mrf.mxu0  ;;  %8586 = vmatmul.mubr.msk.bf16.vlgmr.msra.gmra.mxu1 %vm1542_vm2, %v1509_v23 }
 0x13d   : > { %v1401_v32 = vadd.f32 %v9580_v44, %v1331_v29  ;;  %8686 = vmatpush3.bf16.msra.mxu1 %v3715_v25  ;;  %v1467_v37 = vmax.f32 %v1403_v28, 0.0  ;;  %v1336_v40 = vmul.f32 %v8527_v31, %v9573_v39 }
 0x13e   : > { %v1193_v33 = vpop.f32.mrf.mxu0  ;;  %8687 = vmatprep.subr.bf16.mxu1 %v9168_v26 }
 0x13f   : > { %v1465_v35 = vmax.f32 %v1401_v32, 0.0  ;;  %v1334_v36 = vmul.f32 %v9573_v39, %v1193_v33  ;;  %v1511_v45 = vpack.c.bf16 %v1467_v37, %v1466_v38  ;;  %v1406_v50 = vadd.f32 %v9580_v44, %v1336_v40 }
 0x140   : > { %v8528_v41 = vpop.f32.mrf.mxu0 }
 0x141   : > { %v1510_v42 = vpack.c.bf16 %v1465_v35, %v1464_v34  ;;  %v1337_v43 = vmul.f32 %v8528_v41, %v9573_v39  ;;  %8688 = vmatpush3.bf16.msra.mxu1 %v9168_v26  ;;  %v1404_v47 = vadd.f32 %v9580_v44, %v1334_v36  ;;  %v1470_v58 = vmax.f32 %v1406_v50, 0.0 }
 0x142   : > { %v1196_v46 = vpop.f32.mrf.mxu0 }
 0x143   : > { %v1407_v48 = vadd.f32 %v9580_v44, %v1337_v43  ;;  %v1335_v49 = vmul.f32 %v9573_v39, %v1196_v46  ;;  %8589 = vmatprep.mubr.msk.bf16.mxu1 %vm1542_vm2, %v1510_v42  ;;  %v1468_v55 = vmax.f32 %v1404_v47, 0.0 }
 0x144   : > { %v8531_v51 = vpop.f32.mrf.mxu0  ;;  %8590 = vmatmul.mubr.msk.bf16.gmra.mxu1 %vm1542_vm2, %v1511_v45 }
 0x145   : > { %v1405_v52 = vadd.f32 %v9580_v44, %v1335_v49  ;;  %v1471_v53 = vmax.f32 %v1407_v48, 0.0  ;;  %v1340_v59 = vmul.f32 %v8531_v51, %v9573_v39 }
 0x146   : > { %v1209_v54 = vpop.f32.mrf.mxu0 }
 0x147   : > { %v1469_v56 = vmax.f32 %v1405_v52, 0.0  ;;  %v1338_v57 = vmul.f32 %v9573_v39, %v1209_v54  ;;  %v1513_v63 = vpack.c.bf16 %v1471_v53, %v1470_v58  ;;  %v1410_v4 = vadd.f32 %v9580_v44, %v1340_v59 }
 0x148   : > { %v8532_v60 = vpop.f32.mrf.mxu0 }
 0x149   : > { %v1512_v61 = vpack.c.bf16 %v1469_v56, %v1468_v55  ;;  %v1341_v62 = vmul.f32 %v8532_v60, %v9573_v39  ;;  %v1408_v1 = vadd.f32 %v9580_v44, %v1338_v57  ;;  %v1474_v12 = vmax.f32 %v1410_v4, 0.0 }
 0x14a   : > { %v1212_v0 = vpop.f32.mrf.mxu0 }
 0x14b   : > { %v1411_v2 = vadd.f32 %v9580_v44, %v1341_v62  ;;  %v1339_v3 = vmul.f32 %v9573_v39, %v1212_v0  ;;  %8593 = vmatprep.mubr.msk.bf16.mxu1 %vm1542_vm2, %v1512_v61  ;;  %v1472_v9 = vmax.f32 %v1408_v1, 0.0 }
 0x14c   : > { %v8535_v5 = vpop.f32.mrf.mxu0  ;;  %8594 = vmatmul.mubr.msk.bf16.gmra.mxu1 %vm1542_vm2, %v1513_v63 }
 0x14d   : > { %v1409_v6 = vadd.f32 %v9580_v44, %v1339_v3  ;;  %v1475_v7 = vmax.f32 %v1411_v2, 0.0  ;;  %v1344_v13 = vmul.f32 %v8535_v5, %v9573_v39 }
 0x14e   : > { %v1225_v8 = vpop.f32.mrf.mxu0 }
 0x14f   : > { %v1473_v10 = vmax.f32 %v1409_v6, 0.0  ;;  %v1342_v11 = vmul.f32 %v9573_v39, %v1225_v8  ;;  %v1515_v18 = vpack.c.bf16 %v1475_v7, %v1474_v12  ;;  %v1414_v23 = vadd.f32 %v9580_v44, %v1344_v13 }
 0x150   : > { %v8536_v14 = vpop.f32.mrf.mxu0 }
 0x151   : > { %v1514_v15 = vpack.c.bf16 %v1473_v10, %v1472_v9  ;;  %v1345_v16 = vmul.f32 %v8536_v14, %v9573_v39  ;;  %v1412_v20 = vadd.f32 %v9580_v44, %v1342_v11  ;;  %v1478_v31 = vmax.f32 %v1414_v23, 0.0  ;;  %v9169_v23 = vld [vmem:[%s9516_s30] sm:$0xff]  }
 0x152   : > { %v1228_v19 = vpop.f32.mrf.mxu0 }
 0x153   : > { %v1415_v21 = vadd.f32 %v9580_v44, %v1345_v16  ;;  %v1343_v22 = vmul.f32 %v9573_v39, %v1228_v19  ;;  %8597 = vmatprep.mubr.msk.bf16.mxu1 %vm1542_vm2, %v1514_v15  ;;  %v1476_v28 = vmax.f32 %v1412_v20, 0.0 }
 0x154   : > { %v8539_v24 = vpop.f32.mrf.mxu0  ;;  %8598 = vmatmul.mubr.msk.bf16.gmra.mxu1 %vm1542_vm2, %v1515_v18 }
 0x155   : > { %v1413_v25 = vadd.f32 %v9580_v44, %v1343_v22  ;;  %v1479_v26 = vmax.f32 %v1415_v21, 0.0  ;;  %v1348_v32 = vmul.f32 %v8539_v24, %v9573_v39  ;;  %v9170_v24 = vld [vmem:[%s9516_s30 + $0x8] sm:$0xff]  }
 0x156   : > { %v1241_v27 = vpop.f32.mrf.mxu0 }
 0x157   : > { %v1477_v29 = vmax.f32 %v1413_v25, 0.0  ;;  %v1346_v30 = vmul.f32 %v9573_v39, %v1241_v27  ;;  %v1517_v35 = vpack.c.bf16 %v1479_v26, %v1478_v31  ;;  %v1418_v42 = vadd.f32 %v9580_v44, %v1348_v32  ;;  %v9172_v25 = vld [vmem:[%s9516_s30 + $0x18] sm:$0xff]   ;;  %v9174_v26 = vld [vmem:[%s9516_s30 + $0x20] sm:$0xff]   ;;  %v9175_v27 = vld [vmem:[%s9516_s30 + $0x28] sm:$0xff]  }
 0x158   : > { %v8540_v37 = vpop.f32.mrf.mxu0  ;;  %v9179_v31 = vld [vmem:[%s9516_s30 + $0x48] sm:$0xff]   ;;  %v9180_v32 = vld [vmem:[%s9516_s30 + $0x50] sm:$0xff]  }
 0x159   : > { %v1516_v33 = vpack.c.bf16 %v1477_v29, %v1476_v28  ;;  %v1349_v34 = vmul.f32 %v8540_v37, %v9573_v39  ;;  %v1416_v38 = vadd.f32 %v9580_v44, %v1346_v30  ;;  %v1482_v51 = vmax.f32 %v1418_v42, 0.0  ;;  %v9176_v28 = vld [vmem:[%s9516_s30 + $0x30] sm:$0xff]   ;;  %v9177_v29 = vld [vmem:[%s9516_s30 + $0x38] sm:$0xff]   ;;  %v9178_v30 = vld [vmem:[%s9516_s30 + $0x40] sm:$0xff]  }
 0x15a   : > { %v1244_v36 = vpop.f32.mrf.mxu0  ;;  %v9181_v37 = vld [vmem:[%s9516_s30 + $0x58] sm:$0xff]   ;;  %v9189_v42 = vld [vmem:[%s9516_s30 + $0x90] sm:$0xff]  }
 0x15b   : > { %v1419_v40 = vadd.f32 %v9580_v44, %v1349_v34  ;;  %v1347_v41 = vmul.f32 %v9573_v39, %v1244_v36  ;;  %8601 = vmatprep.mubr.msk.bf16.mxu1 %vm1542_vm2, %v1516_v33  ;;  %v1480_v48 = vmax.f32 %v1416_v38, 0.0  ;;  %v9183_v33 = vld [vmem:[%s9516_s30 + $0x60] sm:$0xff]   ;;  %v9214_v34 = vld [vmem:[%s12413_s17 + $0x10] sm:$0xff]   ;;  %v9186_v38 = vld [vmem:[%s9516_s30 + $0x78] sm:$0xff]  }
 0x15c   : > { %v8543_v43 = vpop.f32.mrf.mxu0  ;;  %8602 = vmatmul.mubr.msk.bf16.gmra.mxu1 %vm1542_vm2, %v1517_v35  ;;  %8949 = vmatprep.subr.bf16.mxu1 %v9214_v34  ;;  %v9184_v35 = vld [vmem:[%s9516_s30 + $0x68] sm:$0xff]   ;;  %v9185_v36 = vld [vmem:[%s9516_s30 + $0x70] sm:$0xff]  }
 0x15d   : > { %v1417_v45 = vadd.f32 %v9580_v44, %v1347_v41  ;;  %v1483_v46 = vmax.f32 %v1419_v40, 0.0  ;;  %v1352_v52 = vmul.f32 %v8543_v43, %v9573_v39  ;;  %v9187_v40 = vld [vmem:[%s9516_s30 + $0x80] sm:$0xff]   ;;  %v9188_v41 = vld [vmem:[%s9516_s30 + $0x88] sm:$0xff]  }
 0x15e   : > { %v1257_v47 = vpop.f32.mrf.mxu0 }
 0x15f   : > { %v1481_v49 = vmax.f32 %v1417_v45, 0.0  ;;  %v1350_v50 = vmul.f32 %v9573_v39, %v1257_v47  ;;  %v1519_v56 = vpack.c.bf16 %v1483_v46, %v1482_v51  ;;  %v1422_v61 = vadd.f32 %v9580_v44, %v1352_v52  ;;  %v9800_v45 = vld [vmem:[%s12402_s6] ss:$0 sm:$0xff] }
 0x160   : > { %v8544_v53 = vpop.f32.mrf.mxu0  ;;  %v9809_v51 = vld [vmem:[%s12403_s7] ss:$0 sm:$0xff] }
 0x161   : > { %v1518_v54 = vpack.c.bf16 %v1481_v49, %v1480_v48  ;;  %v1353_v55 = vmul.f32 %v8544_v53, %v9573_v39  ;;  %v1420_v58 = vadd.f32 %v9580_v44, %v1350_v50  ;;  %v1486_v5 = vmax.f32 %v1422_v61, 0.0  ;;  %v9190_v50 = vld [vmem:[%s9516_s30 + $0x98] sm:$0xff]   ;;  %v9191_v53 = vld [vmem:[%s9516_s30 + $0xa0] sm:$0xff]  }
 0x162   : > { %v1260_v57 = vpop.f32.mrf.mxu0 }
 0x163   : > { %v1423_v59 = vadd.f32 %v9580_v44, %v1353_v55  ;;  %v1351_v60 = vmul.f32 %v9573_v39, %v1260_v57  ;;  %8605 = vmatprep.mubr.msk.bf16.mxu1 %vm1542_vm2, %v1518_v54  ;;  %v1484_v2 = vmax.f32 %v1420_v58, 0.0 }
 0x164   : > { %v8547_v62 = vpop.f32.mrf.mxu0  ;;  %8606 = vmatmul.mubr.msk.bf16.gmra.mxu1 %vm1542_vm2, %v1519_v56 }
 0x165   : > { %v1421_v63 = vadd.f32 %v9580_v44, %v1351_v60  ;;  %v1487_v0 = vmax.f32 %v1423_v59, 0.0  ;;  %v1356_v6 = vmul.f32 %v8547_v62, %v9573_v39 }
 0x166   : > { %v1273_v1 = vpop.f32.mrf.mxu0 }
 0x167   : > { %v1485_v3 = vmax.f32 %v1421_v63, 0.0  ;;  %v1354_v4 = vmul.f32 %v9573_v39, %v1273_v1  ;;  %v1521_v10 = vpack.c.bf16 %v1487_v0, %v1486_v5  ;;  %v1426_v15 = vadd.f32 %v9580_v44, %v1356_v6  ;;  %v9193_v5 = vld [vmem:[%s9516_s30 + $0xa8] sm:$0xff]  }
 0x168   : > { %v8548_v7 = vpop.f32.mrf.mxu0 }
 0x169   : > { %v1520_v8 = vpack.c.bf16 %v1485_v3, %v1484_v2  ;;  %v1357_v9 = vmul.f32 %v8548_v7, %v9573_v39  ;;  %v1424_v12 = vadd.f32 %v9580_v44, %v1354_v4  ;;  %v1490_v21 = vmax.f32 %v1426_v15, 0.0 }
 0x16a   : > { %v1276_v11 = vpop.f32.mrf.mxu0 }
 0x16b   : > { %v1427_v13 = vadd.f32 %v9580_v44, %v1357_v9  ;;  %v1355_v14 = vmul.f32 %v9573_v39, %v1276_v11  ;;  %8609 = vmatprep.mubr.msk.bf16.mxu1 %vm1542_vm2, %v1520_v8  ;;  %v1488_v19 = vmax.f32 %v1424_v12, 0.0  ;;  %v9194_v8 = vld [vmem:[%s9516_s30 + $0xb0] sm:$0xff]   ;;  %v9209_v11 = vld [vmem:[%s12410_s14] sm:$0xff]  }
 0x16c   : > { %8610 = vmatmul.mubr.msk.bf16.gmra.mxu1 %vm1542_vm2, %v1521_v10 }
 0x16d   : > { %v1425_v16 = vadd.f32 %v9580_v44, %v1355_v14  ;;  %v1491_v18 = vmax.f32 %v1427_v13, 0.0  ;;  %v9171_v44 = vld [vmem:[%s9516_s30 + $0x10] sm:$0xff]  }
 0x16f   : > { %v1489_v20 = vmax.f32 %v1425_v16, 0.0  ;;  %v1523_v39 = vpack.c.bf16 %v1491_v18, %v1490_v21 }
 0x171   : > { %v1522_v22 = vpack.c.bf16 %v1489_v20, %v1488_v19 }
 0x173   : > { %8613 = vmatprep.mubr.msk.bf16.mxu1 %vm1542_vm2, %v1522_v22 }
 0x174   : > { %8614 = vmatmul.mubr.msk.bf16.gmra.mxu1 %vm1542_vm2, %v1523_v39 }
 0x175   : > { %8689 = vmatprep.mubr.msk.bf16.mxu1 %vm898_vm1, %v9169_v23 }
 0x17c   : > { %8690 = vmatmul.mubr.msk.bf16.vlgmr.msra.gmra.mxu1 %vm898_vm1, %v9170_v24 }
 0x17d   : > { %8693 = vmatprep.mubr.msk.bf16.mxu1 %vm898_vm1, %v9171_v44  ;;  %8950 = vmatpush3.bf16.msra.mxu1 %v9214_v34 }
 0x184   : > { %8694 = vmatmul.mubr.msk.bf16.gmra.mxu1 %vm898_vm1, %v9172_v25  ;;  %v9195_v25 = vld [vmem:[%s9516_s30 + $0xb8] sm:$0xff]  }
 0x185   : > { %8697 = vmatprep.mubr.msk.bf16.mxu1 %vm898_vm1, %v9174_v26 }
 0x18c   : > { %8698 = vmatmul.mubr.msk.bf16.gmra.mxu1 %vm898_vm1, %v9175_v27 }
 0x18d   : > { %8701 = vmatprep.mubr.msk.bf16.mxu1 %vm898_vm1, %v9176_v28  ;;  %v9196_v28 = vld [vmem:[%s9516_s30 + $0xc0] sm:$0xff]  }
 0x194   : > { %8702 = vmatmul.mubr.msk.bf16.gmra.mxu1 %vm898_vm1, %v9177_v29 }
 0x195   : > { %8705 = vmatprep.mubr.msk.bf16.mxu1 %vm898_vm1, %v9178_v30 }
 0x19c   : > { %8706 = vmatmul.mubr.msk.bf16.gmra.mxu1 %vm898_vm1, %v9179_v31 }
 0x19d   : > { %8709 = vmatprep.mubr.msk.bf16.mxu1 %vm898_vm1, %v9180_v32 }
 0x1a4   : > { %8710 = vmatmul.mubr.msk.bf16.gmra.mxu1 %vm898_vm1, %v9181_v37 }
 0x1a5   : > { %8713 = vmatprep.mubr.msk.bf16.mxu1 %vm898_vm1, %v9183_v33 }
 0x1ac   : > { %8714 = vmatmul.mubr.msk.bf16.gmra.mxu1 %vm898_vm1, %v9184_v35 }
 0x1ad   : > { %8717 = vmatprep.mubr.msk.bf16.mxu1 %vm898_vm1, %v9185_v36 }
 0x1b4   : > { %8718 = vmatmul.mubr.msk.bf16.gmra.mxu1 %vm898_vm1, %v9186_v38 }
 0x1b5   : > { %8721 = vmatprep.mubr.msk.bf16.mxu1 %vm898_vm1, %v9187_v40 }
 0x1bc   : > { %v8555_v43 = vpop.f32.mrf.mxu0  ;;  %8722 = vmatmul.mubr.msk.bf16.gmra.mxu1 %vm898_vm1, %v9188_v41 }
 0x1bd   : > { %8725 = vmatprep.mubr.msk.bf16.mxu1 %vm898_vm1, %v9189_v42  ;;  %v1936_v48 = vmul.f32 %v8555_v43, %v9800_v45 }
 0x1be   : > { %v1673_v46 = vpop.f32.mrf.mxu0 }
 0x1bf   : > { %v1934_v47 = vmul.f32 %v9800_v45, %v1673_v46  ;;  %v2006_v58 = vadd.f32 %v9809_v51, %v1936_v48 }
 0x1c0   : > { %v8556_v49 = vpop.f32.mrf.mxu0 }
 0x1c1   : > { %v1937_v52 = vmul.f32 %v8556_v49, %v9800_v45  ;;  %v2004_v55 = vadd.f32 %v9809_v51, %v1934_v47  ;;  %v2070_v2 = vmax.f32 %v2006_v58, 0.0  ;;  %v9197_v47 = vld [vmem:[%s9516_s30 + $0xc8] sm:$0xff]  }
 0x1c2   : > { %v1676_v54 = vpop.f32.mrf.mxu0 }
 0x1c3   : > { %v2007_v56 = vadd.f32 %v9809_v51, %v1937_v52  ;;  %v1935_v57 = vmul.f32 %v9800_v45, %v1676_v54  ;;  %v2068_v63 = vmax.f32 %v2004_v55, 0.0 }
 0x1c4   : > { %v8559_v59 = vpop.f32.mrf.mxu0  ;;  %8726 = vmatmul.mubr.msk.bf16.gmra.mxu1 %vm898_vm1, %v9190_v50  ;;  %v9198_v50 = vld [vmem:[%s9516_s30 + $0xd0] sm:$0xff]  }
 0x1c5   : > { %v2005_v60 = vadd.f32 %v9809_v51, %v1935_v57  ;;  %8729 = vmatprep.mubr.msk.bf16.mxu1 %vm898_vm1, %v9191_v53  ;;  %v2071_v61 = vmax.f32 %v2007_v56, 0.0  ;;  %v1940_v3 = vmul.f32 %v8559_v59, %v9800_v45 }
 0x1c6   : > { %v1689_v62 = vpop.f32.mrf.mxu0 }
 0x1c7   : > { %v2069_v0 = vmax.f32 %v2005_v60, 0.0  ;;  %v1938_v1 = vmul.f32 %v9800_v45, %v1689_v62  ;;  %v2133_v9 = vpack.c.bf16 %v2071_v61, %v2070_v2  ;;  %v2010_v15 = vadd.f32 %v9809_v51, %v1940_v3 }
 0x1c8   : > { %v8560_v4 = vpop.f32.mrf.mxu0 }
 0x1c9   : > { %v2132_v6 = vpack.c.bf16 %v2069_v0, %v2068_v63  ;;  %v1941_v7 = vmul.f32 %v8560_v4, %v9800_v45  ;;  %v2008_v12 = vadd.f32 %v9809_v51, %v1938_v1  ;;  %v2074_v39 = vmax.f32 %v2010_v15, 0.0  ;;  %v9199_v4 = vld [vmem:[%s9516_s30 + $0xd8] sm:$0xff]  }
 0x1ca   : > { %v1692_v10 = vpop.f32.mrf.mxu0 }
 0x1cb   : > { %v2011_v13 = vadd.f32 %v9809_v51, %v1941_v7  ;;  %v1939_v14 = vmul.f32 %v9800_v45, %v1692_v10  ;;  %8621 = vmatprep.mubr.msk.bf16.mxu0 %vm1542_vm2, %v2132_v6  ;;  %v2072_v21 = vmax.f32 %v2008_v12, 0.0  ;;  %v9200_v7 = vld [vmem:[%s9516_s30 + $0xe0] sm:$0xff]  }
 0x1cc   : > { %v8563_v16 = vpop.f32.mrf.mxu0  ;;  %8622 = vmatmul.mubr.msk.bf16.vlgmr.msra.gmra.mxu0 %vm1542_vm2, %v2133_v9  ;;  %8730 = vmatmul.mubr.msk.bf16.gmra.mxu1 %vm898_vm1, %v9193_v5 }
 0x1cd   : > { %v2009_v18 = vadd.f32 %v9809_v51, %v1939_v14  ;;  %8818 = vmatpush3.bf16.msra.mxu0 %v9715_v17  ;;  %8733 = vmatprep.mubr.msk.bf16.mxu1 %vm898_vm1, %v9194_v8  ;;  %v2075_v19 = vmax.f32 %v2011_v13, 0.0  ;;  %v1944_v24 = vmul.f32 %v8563_v16, %v9800_v45 }
 0x1ce   : > { %v1705_v20 = vpop.f32.mrf.mxu0  ;;  %8819 = vmatprep.subr.bf16.mxu0 %v9209_v11 }
 0x1cf   : > { %v2073_v22 = vmax.f32 %v2009_v18, 0.0  ;;  %v1942_v23 = vmul.f32 %v9800_v45, %v1705_v20  ;;  %v2135_v17 = vpack.c.bf16 %v2075_v19, %v2074_v39  ;;  %v2014_v37 = vadd.f32 %v9809_v51, %v1944_v24  ;;  %v9201_v24 = vld [vmem:[%s9516_s30 + $0xe8] sm:$0xff]  }
 0x1d0   : > { %v8564_v44 = vpop.f32.mrf.mxu0 }
 0x1d1   : > { %v2134_v26 = vpack.c.bf16 %v2073_v22, %v2072_v21  ;;  %v1945_v27 = vmul.f32 %v8564_v44, %v9800_v45  ;;  %8820 = vmatpush3.bf16.msra.mxu0 %v9209_v11  ;;  %v2012_v30 = vadd.f32 %v9809_v51, %v1942_v23  ;;  %v2078_v42 = vmax.f32 %v2014_v37, 0.0 }
 0x1d2   : > { %v1708_v29 = vpop.f32.mrf.mxu0 }
 0x1d3   : > { %v2015_v31 = vadd.f32 %v9809_v51, %v1945_v27  ;;  %v1943_v32 = vmul.f32 %v9800_v45, %v1708_v29  ;;  %8625 = vmatprep.mubr.msk.bf16.mxu0 %vm1542_vm2, %v2134_v26  ;;  %v2076_v38 = vmax.f32 %v2012_v30, 0.0  ;;  %v9202_v26 = vld [vmem:[%s9516_s30 + $0xf0] sm:$0xff]  }
 0x1d4   : > { %v8567_v33 = vpop.f32.mrf.mxu0  ;;  %8626 = vmatmul.mubr.msk.bf16.gmra.mxu0 %vm1542_vm2, %v2135_v17  ;;  %8734 = vmatmul.mubr.msk.bf16.gmra.mxu1 %vm898_vm1, %v9195_v25 }
 0x1d5   : > { %v2013_v34 = vadd.f32 %v9809_v51, %v1943_v32  ;;  %8737 = vmatprep.mubr.msk.bf16.mxu1 %vm898_vm1, %v9196_v28  ;;  %v2079_v35 = vmax.f32 %v2015_v31, 0.0  ;;  %v1948_v43 = vmul.f32 %v8567_v33, %v9800_v45 }
 0x1d6   : > { %v1721_v36 = vpop.f32.mrf.mxu0 }
 0x1d7   : > { %v2077_v40 = vmax.f32 %v2013_v34, 0.0  ;;  %v1946_v41 = vmul.f32 %v9800_v45, %v1721_v36  ;;  %v2137_v52 = vpack.c.bf16 %v2079_v35, %v2078_v42  ;;  %v2018_v57 = vadd.f32 %v9809_v51, %v1948_v43  ;;  %v9203_v43 = vld [vmem:[%s9516_s30 + $0xf8] sm:$0xff]  }
 0x1d8   : > { %v8568_v46 = vpop.f32.mrf.mxu0 }
 0x1d9   : > { %v2136_v48 = vpack.c.bf16 %v2077_v40, %v2076_v38  ;;  %v1949_v49 = vmul.f32 %v8568_v46, %v9800_v45  ;;  %v2016_v54 = vadd.f32 %v9809_v51, %v1946_v41  ;;  %v2082_v1 = vmax.f32 %v2018_v57, 0.0 }
 0x1da   : > { %v1724_v53 = vpop.f32.mrf.mxu0 }
 0x1db   : > { %v2019_v55 = vadd.f32 %v9809_v51, %v1949_v49  ;;  %v1947_v56 = vmul.f32 %v9800_v45, %v1724_v53  ;;  %8629 = vmatprep.mubr.msk.bf16.mxu0 %vm1542_vm2, %v2136_v48  ;;  %v2080_v62 = vmax.f32 %v2016_v54, 0.0  ;;  %v9204_v48 = vld [vmem:[%s9516_s30 + $0x100] sm:$0xff]  }
 0x1dc   : > { %v8571_v58 = vpop.f32.mrf.mxu0  ;;  %8630 = vmatmul.mubr.msk.bf16.gmra.mxu0 %vm1542_vm2, %v2137_v52  ;;  %8738 = vmatmul.mubr.msk.bf16.gmra.mxu1 %vm898_vm1, %v9197_v47 }
 0x1dd   : > { %v2017_v59 = vadd.f32 %v9809_v51, %v1947_v56  ;;  %8741 = vmatprep.mubr.msk.bf16.mxu1 %vm898_vm1, %v9198_v50  ;;  %v2083_v60 = vmax.f32 %v2019_v55, 0.0  ;;  %v1952_v2 = vmul.f32 %v8571_v58, %v9800_v45 }
 0x1de   : > { %v1737_v61 = vpop.f32.mrf.mxu0 }
 0x1df   : > { %v2081_v63 = vmax.f32 %v2017_v59, 0.0  ;;  %v1950_v0 = vmul.f32 %v9800_v45, %v1737_v61  ;;  %v2139_v8 = vpack.c.bf16 %v2083_v60, %v2082_v1  ;;  %v2022_v13 = vadd.f32 %v9809_v51, %v1952_v2 }
 0x1e0   : > { %v8572_v3 = vpop.f32.mrf.mxu0 }
 0x1e1   : > { %v2138_v5 = vpack.c.bf16 %v2081_v63, %v2080_v62  ;;  %v1953_v6 = vmul.f32 %v8572_v3, %v9800_v45  ;;  %v2020_v10 = vadd.f32 %v9809_v51, %v1950_v0  ;;  %v2086_v22 = vmax.f32 %v2022_v13, 0.0  ;;  %v9236_v63 = vld [vmem:[%s12413_s17 + $0x8] sm:$0xff]  }
 0x1e2   : > { %v1740_v9 = vpop.f32.mrf.mxu0  ;;  %v9205_v3 = vld [vmem:[%s9516_s30 + $0x108] sm:$0xff]   ;;  %8951 = vmatprep.subr.bf16.mxu1 %v9236_v63 }
 0x1e3   : > { %v2023_v11 = vadd.f32 %v9809_v51, %v1953_v6  ;;  %v1951_v12 = vmul.f32 %v9800_v45, %v1740_v9  ;;  %8633 = vmatprep.mubr.msk.bf16.mxu0 %vm1542_vm2, %v2138_v5  ;;  %v2084_v19 = vmax.f32 %v2020_v10, 0.0  ;;  %v9206_v6 = vld [vmem:[%s9516_s30 + $0x110] sm:$0xff]   ;;  %8952 = vmatpush3.bf16.msra.mxu1 %v9236_v63 }
 0x1e4   : > { %v8575_v14 = vpop.f32.mrf.mxu0  ;;  %8634 = vmatmul.mubr.msk.bf16.gmra.mxu0 %vm1542_vm2, %v2139_v8  ;;  %8742 = vmatmul.mubr.msk.bf16.gmra.mxu1 %vm898_vm1, %v9199_v4 }
 0x1e5   : > { %v2021_v15 = vadd.f32 %v9809_v51, %v1951_v12  ;;  %8745 = vmatprep.mubr.msk.bf16.mxu1 %vm898_vm1, %v9200_v7  ;;  %v2087_v16 = vmax.f32 %v2023_v11, 0.0  ;;  %v1956_v23 = vmul.f32 %v8575_v14, %v9800_v45 }
 0x1e6   : > { %v1753_v18 = vpop.f32.mrf.mxu0 }
 0x1e7   : > { %v2085_v20 = vmax.f32 %v2021_v15, 0.0  ;;  %v1954_v21 = vmul.f32 %v9800_v45, %v1753_v18  ;;  %v2141_v27 = vpack.c.bf16 %v2087_v16, %v2086_v22  ;;  %v2026_v31 = vadd.f32 %v9809_v51, %v1956_v23 }
 0x1e8   : > { %v8576_v39 = vpop.f32.mrf.mxu0 }
 0x1e9   : > { %v2140_v44 = vpack.c.bf16 %v2085_v20, %v2084_v19  ;;  %v1957_v25 = vmul.f32 %v8576_v39, %v9800_v45  ;;  %v2024_v17 = vadd.f32 %v9809_v51, %v1954_v21  ;;  %v2090_v40 = vmax.f32 %v2026_v31, 0.0  ;;  %v9207_v39 = vld [vmem:[%s9516_s30 + $0x118] sm:$0xff]  }
 0x1ea   : > { %v1756_v28 = vpop.f32.mrf.mxu0 }
 0x1eb   : > { %v2027_v29 = vadd.f32 %v9809_v51, %v1957_v25  ;;  %v1955_v30 = vmul.f32 %v9800_v45, %v1756_v28  ;;  %8637 = vmatprep.mubr.msk.bf16.mxu0 %vm1542_vm2, %v2140_v44  ;;  %v2088_v35 = vmax.f32 %v2024_v17, 0.0  ;;  %v9208_v25 = vld [vmem:[%s9516_s30 + $0x120] sm:$0xff]  }
 0x1ec   : > { %v8579_v32 = vpop.f32.mrf.mxu0  ;;  %8638 = vmatmul.mubr.msk.bf16.gmra.mxu0 %vm1542_vm2, %v2141_v27  ;;  %8746 = vmatmul.mubr.msk.bf16.gmra.mxu1 %vm898_vm1, %v9201_v24 }
 0x1ed   : > { %v2025_v37 = vadd.f32 %v9809_v51, %v1955_v30  ;;  %8749 = vmatprep.mubr.msk.bf16.mxu1 %vm898_vm1, %v9202_v26  ;;  %v2091_v33 = vmax.f32 %v2027_v29, 0.0  ;;  %v1960_v41 = vmul.f32 %v8579_v32, %v9800_v45 }
 0x1ee   : > { %v1769_v34 = vpop.f32.mrf.mxu0 }
 0x1ef   : > { %v2089_v36 = vmax.f32 %v2025_v37, 0.0  ;;  %v1958_v38 = vmul.f32 %v9800_v45, %v1769_v34  ;;  %v2143_v49 = vpack.c.bf16 %v2091_v33, %v2090_v40  ;;  %v2030_v55 = vadd.f32 %v9809_v51, %v1960_v41 }
 0x1f0   : > { %v8580_v42 = vpop.f32.mrf.mxu0 }
 0x1f1   : > { %v2142_v46 = vpack.c.bf16 %v2089_v36, %v2088_v35  ;;  %v1961_v47 = vmul.f32 %v8580_v42, %v9800_v45  ;;  %v2028_v52 = vadd.f32 %v9809_v51, %v1958_v38  ;;  %v2094_v0 = vmax.f32 %v2030_v55, 0.0  ;;  %v9210_v42 = vld [vmem:[%s9516_s30 + $0x128] sm:$0xff]  }
 0x1f2   : > { %v1772_v50 = vpop.f32.mrf.mxu0 }
 0x1f3   : > { %v2031_v53 = vadd.f32 %v9809_v51, %v1961_v47  ;;  %v1959_v54 = vmul.f32 %v9800_v45, %v1772_v50  ;;  %8641 = vmatprep.mubr.msk.bf16.mxu0 %vm1542_vm2, %v2142_v46  ;;  %v2092_v60 = vmax.f32 %v2028_v52, 0.0  ;;  %v9211_v47 = vld [vmem:[%s9516_s30 + $0x130] sm:$0xff]  }
 0x1f4   : > { %v8583_v56 = vpop.f32.mrf.mxu0  ;;  %8642 = vmatmul.mubr.msk.bf16.gmra.mxu0 %vm1542_vm2, %v2143_v49  ;;  %8750 = vmatmul.mubr.msk.bf16.gmra.mxu1 %vm898_vm1, %v9203_v43 }
 0x1f5   : > { %v2029_v57 = vadd.f32 %v9809_v51, %v1959_v54  ;;  %8753 = vmatprep.mubr.msk.bf16.mxu1 %vm898_vm1, %v9204_v48  ;;  %v2095_v58 = vmax.f32 %v2031_v53, 0.0  ;;  %v1964_v1 = vmul.f32 %v8583_v56, %v9800_v45 }
 0x1f6   : > { %v1785_v59 = vpop.f32.mrf.mxu0 }
 0x1f7   : > { %v2093_v61 = vmax.f32 %v2029_v57, 0.0  ;;  %v1962_v62 = vmul.f32 %v9800_v45, %v1785_v59  ;;  %v2145_v7 = vpack.c.bf16 %v2095_v58, %v2094_v0  ;;  %v2034_v12 = vadd.f32 %v9809_v51, %v1964_v1  ;;  %v9212_v1 = vld [vmem:[%s9516_s30 + $0x138] sm:$0xff]  }
 0x1f8   : > { %v8584_v2 = vpop.f32.mrf.mxu0 }
 0x1f9   : > { %v2144_v4 = vpack.c.bf16 %v2093_v61, %v2092_v60  ;;  %v1965_v5 = vmul.f32 %v8584_v2, %v9800_v45  ;;  %v2032_v9 = vadd.f32 %v9809_v51, %v1962_v62  ;;  %v2098_v21 = vmax.f32 %v2034_v12, 0.0 }
 0x1fa   : > { %v1788_v8 = vpop.f32.mrf.mxu0 }
 0x1fb   : > { %v2035_v10 = vadd.f32 %v9809_v51, %v1965_v5  ;;  %v1963_v11 = vmul.f32 %v9800_v45, %v1788_v8  ;;  %8645 = vmatprep.mubr.msk.bf16.mxu0 %vm1542_vm2, %v2144_v4  ;;  %v2096_v18 = vmax.f32 %v2032_v9, 0.0  ;;  %v9213_v4 = vld [vmem:[%s9516_s30 + $0x140] sm:$0xff]  }
 0x1fc   : > { %v8587_v13 = vpop.f32.mrf.mxu1  ;;  %8646 = vmatmul.mubr.msk.bf16.gmra.mxu0 %vm1542_vm2, %v2145_v7  ;;  %8754 = vmatmul.mubr.msk.bf16.gmra.mxu1 %vm898_vm1, %v9205_v3 }
 0x1fd   : > { %v2033_v14 = vadd.f32 %v9809_v51, %v1963_v11  ;;  %8757 = vmatprep.mubr.msk.bf16.mxu1 %vm898_vm1, %v9206_v6  ;;  %v2099_v15 = vmax.f32 %v2035_v10, 0.0  ;;  %v1968_v22 = vmul.f32 %v8587_v13, %v9800_v45 }
 0x1fe   : > { %v1801_v16 = vpop.f32.mrf.mxu1 }
 0x1ff   : > { %v2097_v19 = vmax.f32 %v2033_v14, 0.0  ;;  %v1966_v20 = vmul.f32 %v9800_v45, %v1801_v16  ;;  %v2147_v26 = vpack.c.bf16 %v2099_v15, %v2098_v21  ;;  %v2038_v30 = vadd.f32 %v9809_v51, %v1968_v22  ;;  %v9215_v22 = vld [vmem:[%s9516_s30 + $0x148] sm:$0xff]  }
 0x200   : > { %v8588_v23 = vpop.f32.mrf.mxu1 }
 0x201   : > { %v2146_v24 = vpack.c.bf16 %v2097_v19, %v2096_v18  ;;  %v1969_v44 = vmul.f32 %v8588_v23, %v9800_v45  ;;  %v2036_v28 = vadd.f32 %v9809_v51, %v1966_v20  ;;  %v2102_v38 = vmax.f32 %v2038_v30, 0.0 }
 0x202   : > { %v1804_v27 = vpop.f32.mrf.mxu1 }
 0x203   : > { %v2039_v17 = vadd.f32 %v9809_v51, %v1969_v44  ;;  %v1967_v29 = vmul.f32 %v9800_v45, %v1804_v27  ;;  %8649 = vmatprep.mubr.msk.bf16.mxu0 %vm1542_vm2, %v2146_v24  ;;  %v2100_v34 = vmax.f32 %v2036_v28, 0.0  ;;  %v9216_v24 = vld [vmem:[%s9516_s30 + $0x150] sm:$0xff]  }
 0x204   : > { %v8591_v31 = vpop.f32.mrf.mxu1  ;;  %8650 = vmatmul.mubr.msk.bf16.gmra.mxu0 %vm1542_vm2, %v2147_v26  ;;  %8758 = vmatmul.mubr.msk.bf16.gmra.mxu1 %vm898_vm1, %v9207_v39 }
 0x205   : > { %v2037_v32 = vadd.f32 %v9809_v51, %v1967_v29  ;;  %8761 = vmatprep.mubr.msk.bf16.mxu1 %vm898_vm1, %v9208_v25  ;;  %v2103_v37 = vmax.f32 %v2039_v17, 0.0  ;;  %v1972_v40 = vmul.f32 %v8591_v31, %v9800_v45 }
 0x206   : > { %v1817_v33 = vpop.f32.mrf.mxu1 }
 0x207   : > { %v2101_v35 = vmax.f32 %v2037_v32, 0.0  ;;  %v1970_v36 = vmul.f32 %v9800_v45, %v1817_v33  ;;  %v2149_v48 = vpack.c.bf16 %v2103_v37, %v2102_v38  ;;  %v2042_v54 = vadd.f32 %v9809_v51, %v1972_v40  ;;  %v9217_v40 = vld [vmem:[%s9516_s30 + $0x158] sm:$0xff]  }
 0x208   : > { %v8592_v41 = vpop.f32.mrf.mxu1 }
 0x209   : > { %v2148_v43 = vpack.c.bf16 %v2101_v35, %v2100_v34  ;;  %v1973_v46 = vmul.f32 %v8592_v41, %v9800_v45  ;;  %v2040_v50 = vadd.f32 %v9809_v51, %v1970_v36  ;;  %v2106_v62 = vmax.f32 %v2042_v54, 0.0 }
 0x20a   : > { %v1820_v49 = vpop.f32.mrf.mxu1 }
 0x20b   : > { %v2043_v52 = vadd.f32 %v9809_v51, %v1973_v46  ;;  %v1971_v53 = vmul.f32 %v9800_v45, %v1820_v49  ;;  %8653 = vmatprep.mubr.msk.bf16.mxu0 %vm1542_vm2, %v2148_v43  ;;  %v2104_v59 = vmax.f32 %v2040_v50, 0.0  ;;  %v9218_v43 = vld [vmem:[%s9516_s30 + $0x160] sm:$0xff]  }
 0x20c   : > { %v8595_v55 = vpop.f32.mrf.mxu1  ;;  %8654 = vmatmul.mubr.msk.bf16.gmra.mxu0 %vm1542_vm2, %v2149_v48  ;;  %8762 = vmatmul.mubr.msk.bf16.gmra.mxu1 %vm898_vm1, %v9210_v42 }
 0x20d   : > { %v2041_v56 = vadd.f32 %v9809_v51, %v1971_v53  ;;  %8765 = vmatprep.mubr.msk.bf16.mxu1 %vm898_vm1, %v9211_v47  ;;  %v2107_v57 = vmax.f32 %v2043_v52, 0.0  ;;  %v1976_v63 = vmul.f32 %v8595_v55, %v9800_v45 }
 0x20e   : > { %v1833_v58 = vpop.f32.mrf.mxu1 }
 0x20f   : > { %v2105_v60 = vmax.f32 %v2041_v56, 0.0  ;;  %v1974_v61 = vmul.f32 %v9800_v45, %v1833_v58  ;;  %v2151_v5 = vpack.c.bf16 %v2107_v57, %v2106_v62  ;;  %v2046_v10 = vadd.f32 %v9809_v51, %v1976_v63  ;;  %v9219_v63 = vld [vmem:[%s9516_s30 + $0x168] sm:$0xff]  }
 0x210   : > { %v8596_v0 = vpop.f32.mrf.mxu1 }
 0x211   : > { %v2150_v2 = vpack.c.bf16 %v2105_v60, %v2104_v59  ;;  %v1977_v3 = vmul.f32 %v8596_v0, %v9800_v45  ;;  %v2044_v7 = vadd.f32 %v9809_v51, %v1974_v61  ;;  %v2110_v19 = vmax.f32 %v2046_v10, 0.0 }
 0x212   : > { %v1836_v6 = vpop.f32.mrf.mxu1 }
 0x213   : > { %v2047_v8 = vadd.f32 %v9809_v51, %v1977_v3  ;;  %v1975_v9 = vmul.f32 %v9800_v45, %v1836_v6  ;;  %8657 = vmatprep.mubr.msk.bf16.mxu0 %vm1542_vm2, %v2150_v2  ;;  %v2108_v15 = vmax.f32 %v2044_v7, 0.0  ;;  %v9220_v2 = vld [vmem:[%s9516_s30 + $0x170] sm:$0xff]  }
 0x214   : > { %v8599_v11 = vpop.f32.mrf.mxu1  ;;  %8658 = vmatmul.mubr.msk.bf16.gmra.mxu0 %vm1542_vm2, %v2151_v5  ;;  %8766 = vmatmul.mubr.msk.bf16.gmra.mxu1 %vm898_vm1, %v9212_v1 }
 0x215   : > { %v2045_v12 = vadd.f32 %v9809_v51, %v1975_v9  ;;  %8769 = vmatprep.mubr.msk.bf16.mxu1 %vm898_vm1, %v9213_v4  ;;  %v2111_v13 = vmax.f32 %v2047_v8, 0.0  ;;  %v1980_v20 = vmul.f32 %v8599_v11, %v9800_v45 }
 0x216   : > { %v1849_v14 = vpop.f32.mrf.mxu1 }
 0x217   : > { %v2109_v16 = vmax.f32 %v2045_v12, 0.0  ;;  %v1978_v18 = vmul.f32 %v9800_v45, %v1849_v14  ;;  %v2153_v44 = vpack.c.bf16 %v2111_v13, %v2110_v19  ;;  %v2050_v17 = vadd.f32 %v9809_v51, %v1980_v20  ;;  %v9221_v20 = vld [vmem:[%s9516_s30 + $0x178] sm:$0xff]  }
 0x218   : > { %v8600_v21 = vpop.f32.mrf.mxu1 }
 0x219   : > { %v2152_v23 = vpack.c.bf16 %v2109_v16, %v2108_v15  ;;  %v1981_v39 = vmul.f32 %v8600_v21, %v9800_v45  ;;  %v2048_v26 = vadd.f32 %v9809_v51, %v1978_v18  ;;  %v2114_v35 = vmax.f32 %v2050_v17, 0.0 }
 0x21a   : > { %v1852_v25 = vpop.f32.mrf.mxu1 }
 0x21b   : > { %v2051_v27 = vadd.f32 %v9809_v51, %v1981_v39  ;;  %v1979_v28 = vmul.f32 %v9800_v45, %v1852_v25  ;;  %8661 = vmatprep.mubr.msk.bf16.mxu0 %vm1542_vm2, %v2152_v23  ;;  %v2112_v37 = vmax.f32 %v2048_v26, 0.0  ;;  %v9222_v23 = vld [vmem:[%s9516_s30 + $0x180] sm:$0xff]  }
 0x21c   : > { %v8603_v29 = vpop.f32.mrf.mxu1  ;;  %8662 = vmatmul.mubr.msk.bf16.gmra.mxu0 %vm1542_vm2, %v2153_v44  ;;  %8770 = vmatmul.mubr.msk.bf16.gmra.mxu1 %vm898_vm1, %v9215_v22 }
 0x21d   : > { %v2049_v30 = vadd.f32 %v9809_v51, %v1979_v28  ;;  %8773 = vmatprep.mubr.msk.bf16.mxu1 %vm898_vm1, %v9216_v24  ;;  %v2115_v31 = vmax.f32 %v2051_v27, 0.0  ;;  %v1984_v36 = vmul.f32 %v8603_v29, %v9800_v45 }
 0x21e   : > { %v1865_v32 = vpop.f32.mrf.mxu1 }
 0x21f   : > { %v2113_v33 = vmax.f32 %v2049_v30, 0.0  ;;  %v1982_v34 = vmul.f32 %v9800_v45, %v1865_v32  ;;  %v2155_v46 = vpack.c.bf16 %v2115_v31, %v2114_v35  ;;  %v2054_v52 = vadd.f32 %v9809_v51, %v1984_v36  ;;  %v9223_v36 = vld [vmem:[%s9516_s30 + $0x188] sm:$0xff]  }
 0x220   : > { %v8604_v38 = vpop.f32.mrf.mxu1 }
 0x221   : > { %v2154_v41 = vpack.c.bf16 %v2113_v33, %v2112_v37  ;;  %v1985_v42 = vmul.f32 %v8604_v38, %v9800_v45  ;;  %v2052_v48 = vadd.f32 %v9809_v51, %v1982_v34  ;;  %v2118_v60 = vmax.f32 %v2054_v52, 0.0 }
 0x222   : > { %v1868_v47 = vpop.f32.mrf.mxu1 }
 0x223   : > { %v2055_v49 = vadd.f32 %v9809_v51, %v1985_v42  ;;  %v1983_v50 = vmul.f32 %v9800_v45, %v1868_v47  ;;  %8665 = vmatprep.mubr.msk.bf16.mxu0 %vm1542_vm2, %v2154_v41  ;;  %v2116_v57 = vmax.f32 %v2052_v48, 0.0  ;;  %v9224_v41 = vld [vmem:[%s9516_s30 + $0x190] sm:$0xff]  }
 0x224   : > { %v8607_v53 = vpop.f32.mrf.mxu1  ;;  %8666 = vmatmul.mubr.msk.bf16.gmra.mxu0 %vm1542_vm2, %v2155_v46  ;;  %8774 = vmatmul.mubr.msk.bf16.gmra.mxu1 %vm898_vm1, %v9217_v40 }
 0x225   : > { %v2053_v54 = vadd.f32 %v9809_v51, %v1983_v50  ;;  %8777 = vmatprep.mubr.msk.bf16.mxu1 %vm898_vm1, %v9218_v43  ;;  %v2119_v55 = vmax.f32 %v2055_v49, 0.0  ;;  %v1988_v61 = vmul.f32 %v8607_v53, %v9800_v45  ;;  %v10039_v53 = vld [vmem:[%s12408_s12] ss:$0 sm:$0xff] }
 0x226   : > { %v1881_v56 = vpop.f32.mrf.mxu1 }
 0x227   : > { %v2117_v58 = vmax.f32 %v2053_v54, 0.0  ;;  %v1986_v59 = vmul.f32 %v9800_v45, %v1881_v56  ;;  %v2157_v3 = vpack.c.bf16 %v2119_v55, %v2118_v60  ;;  %v2058_v8 = vadd.f32 %v9809_v51, %v1988_v61  ;;  %v9225_v61 = vld [vmem:[%s9516_s30 + $0x198] sm:$0xff]  }
 0x228   : > { %v8608_v62 = vpop.f32.mrf.mxu1 }
 0x229   : > { %v2156_v0 = vpack.c.bf16 %v2117_v58, %v2116_v57  ;;  %v1989_v1 = vmul.f32 %v8608_v62, %v9800_v45  ;;  %v2056_v5 = vadd.f32 %v9809_v51, %v1986_v59  ;;  %v2122_v16 = vmax.f32 %v2058_v8, 0.0 }
 0x22a   : > { %v1884_v4 = vpop.f32.mrf.mxu1 }
 0x22b   : > { %v2059_v6 = vadd.f32 %v9809_v51, %v1989_v1  ;;  %v1987_v7 = vmul.f32 %v9800_v45, %v1884_v4  ;;  %8669 = vmatprep.mubr.msk.bf16.mxu0 %vm1542_vm2, %v2156_v0  ;;  %v2120_v13 = vmax.f32 %v2056_v5, 0.0  ;;  %v9226_v0 = vld [vmem:[%s9516_s30 + $0x1a0] sm:$0xff]  }
 0x22c   : > { %v8611_v9 = vpop.f32.mrf.mxu1  ;;  %8670 = vmatmul.mubr.msk.bf16.gmra.mxu0 %vm1542_vm2, %v2157_v3  ;;  %8778 = vmatmul.mubr.msk.bf16.gmra.mxu1 %vm898_vm1, %v9219_v63 }
 0x22d   : > { %v2057_v10 = vadd.f32 %v9809_v51, %v1987_v7  ;;  %8781 = vmatprep.mubr.msk.bf16.mxu1 %vm898_vm1, %v9220_v2  ;;  %v2123_v11 = vmax.f32 %v2059_v6, 0.0  ;;  %v1992_v18 = vmul.f32 %v8611_v9, %v9800_v45 }
 0x22e   : > { %v1897_v12 = vpop.f32.mrf.mxu1 }
 0x22f   : > { %v2121_v14 = vmax.f32 %v2057_v10, 0.0  ;;  %v1990_v15 = vmul.f32 %v9800_v45, %v1897_v12  ;;  %v2159_v39 = vpack.c.bf16 %v2123_v11, %v2122_v16  ;;  %v2062_v27 = vadd.f32 %v9809_v51, %v1992_v18  ;;  %v9227_v18 = vld [vmem:[%s9516_s30 + $0x1a8] sm:$0xff]  }
 0x230   : > { %v8612_v19 = vpop.f32.mrf.mxu1 }
 0x231   : > { %v2158_v21 = vpack.c.bf16 %v2121_v14, %v2120_v13  ;;  %v1993_v22 = vmul.f32 %v8612_v19, %v9800_v45  ;;  %v2060_v44 = vadd.f32 %v9809_v51, %v1990_v15  ;;  %v2126_v33 = vmax.f32 %v2062_v27, 0.0 }
 0x232   : > { %v1900_v24 = vpop.f32.mrf.mxu1 }
 0x233   : > { %v2063_v25 = vadd.f32 %v9809_v51, %v1993_v22  ;;  %v1991_v26 = vmul.f32 %v9800_v45, %v1900_v24  ;;  %8673 = vmatprep.mubr.msk.bf16.mxu0 %vm1542_vm2, %v2158_v21  ;;  %v2124_v31 = vmax.f32 %v2060_v44, 0.0  ;;  %v9228_v21 = vld [vmem:[%s9516_s30 + $0x1b0] sm:$0xff]  }
 0x234   : > { %v8615_v28 = vpop.f32.mrf.mxu1  ;;  %8674 = vmatmul.mubr.msk.bf16.gmra.mxu0 %vm1542_vm2, %v2159_v39  ;;  %8782 = vmatmul.mubr.msk.bf16.gmra.mxu1 %vm898_vm1, %v9221_v20 }
 0x235   : > { %v2061_v17 = vadd.f32 %v9809_v51, %v1991_v26  ;;  %8785 = vmatprep.mubr.msk.bf16.mxu1 %vm898_vm1, %v9222_v23  ;;  %v2127_v29 = vmax.f32 %v2063_v25, 0.0  ;;  %v1996_v34 = vmul.f32 %v8615_v28, %v9800_v45 }
 0x236   : > { %v1913_v30 = vpop.f32.mrf.mxu1 }
 0x237   : > { %v2125_v32 = vmax.f32 %v2061_v17, 0.0  ;;  %v1994_v37 = vmul.f32 %v9800_v45, %v1913_v30  ;;  %v2161_v42 = vpack.c.bf16 %v2127_v29, %v2126_v33  ;;  %v2066_v49 = vadd.f32 %v9809_v51, %v1996_v34  ;;  %v9229_v34 = vld [vmem:[%s9516_s30 + $0x1b8] sm:$0xff]  }
 0x238   : > { %v8616_v35 = vpop.f32.mrf.mxu1 }
 0x239   : > { %v2160_v38 = vpack.c.bf16 %v2125_v32, %v2124_v31  ;;  %v1997_v40 = vmul.f32 %v8616_v35, %v9800_v45  ;;  %v2064_v46 = vadd.f32 %v9809_v51, %v1994_v37  ;;  %v2130_v58 = vmax.f32 %v2066_v49, 0.0 }
 0x23a   : > { %v1916_v43 = vpop.f32.mrf.mxu1 }
 0x23b   : > { %v2067_v47 = vadd.f32 %v9809_v51, %v1997_v40  ;;  %v1995_v48 = vmul.f32 %v9800_v45, %v1916_v43  ;;  %8677 = vmatprep.mubr.msk.bf16.mxu0 %vm1542_vm2, %v2160_v38  ;;  %v2128_v55 = vmax.f32 %v2064_v46, 0.0  ;;  %v9230_v38 = vld [vmem:[%s9516_s30 + $0x1c0] sm:$0xff]  }
 0x23c   : > { %8678 = vmatmul.mubr.msk.bf16.gmra.mxu0 %vm1542_vm2, %v2161_v42  ;;  %v8691_v50 = vpop.f32.mrf.mxu1  ;;  %8786 = vmatmul.mubr.msk.bf16.gmra.mxu1 %vm898_vm1, %v9223_v36 }
 0x23d   : > { %v2065_v52 = vadd.f32 %v9809_v51, %v1995_v48  ;;  %8789 = vmatprep.mubr.msk.bf16.mxu1 %vm898_vm1, %v9224_v41  ;;  %v2131_v45 = vmax.f32 %v2067_v47, 0.0  ;;  %v4270_v59 = vmul.f32 %v8691_v50, %v10039_v53  ;;  %v10048_v51 = vld [vmem:[%s12409_s13] ss:$0 sm:$0xff] }
 0x23e   : > { %v3751_v54 = vpop.f32.mrf.mxu1 }
 0x23f   : > { %v2129_v56 = vmax.f32 %v2065_v52, 0.0  ;;  %v4268_v57 = vmul.f32 %v10039_v53, %v3751_v54  ;;  %v2163_v1 = vpack.c.bf16 %v2131_v45, %v2130_v58  ;;  %v4404_v6 = vadd.f32 %v10048_v51, %v4270_v59  ;;  %v9231_v59 = vld [vmem:[%s9516_s30 + $0x1c8] sm:$0xff]  }
 0x240   : > { %v8692_v60 = vpop.f32.mrf.mxu1 }
 0x241   : > { %v2162_v62 = vpack.c.bf16 %v2129_v56, %v2128_v55  ;;  %v4271_v63 = vmul.f32 %v8692_v60, %v10039_v53  ;;  %v4402_v3 = vadd.f32 %v10048_v51, %v4268_v57  ;;  %v4532_v14 = vmax.f32 %v4404_v6, 0.0 }
 0x242   : > { %v3754_v2 = vpop.f32.mrf.mxu1 }
 0x243   : > { %v4405_v4 = vadd.f32 %v10048_v51, %v4271_v63  ;;  %v4269_v5 = vmul.f32 %v10039_v53, %v3754_v2  ;;  %8681 = vmatprep.mubr.msk.bf16.mxu0 %vm1542_vm2, %v2162_v62  ;;  %v4530_v11 = vmax.f32 %v4402_v3, 0.0  ;;  %v9232_v62 = vld [vmem:[%s9516_s30 + $0x1d0] sm:$0xff]  }
 0x244   : > { %8682 = vmatmul.mubr.msk.bf16.gmra.mxu0 %vm1542_vm2, %v2163_v1  ;;  %v8695_v7 = vpop.f32.mrf.mxu1  ;;  %8790 = vmatmul.mubr.msk.bf16.gmra.mxu1 %vm898_vm1, %v9225_v61 }
 0x245   : > { %v4403_v8 = vadd.f32 %v10048_v51, %v4269_v5  ;;  %8793 = vmatprep.mubr.msk.bf16.mxu1 %vm898_vm1, %v9226_v0  ;;  %v4533_v9 = vmax.f32 %v4405_v4, 0.0  ;;  %v4274_v15 = vmul.f32 %v8695_v7, %v10039_v53 }
 0x246   : > { %v3767_v10 = vpop.f32.mrf.mxu1 }
 0x247   : > { %v4531_v12 = vmax.f32 %v4403_v8, 0.0  ;;  %v4272_v13 = vmul.f32 %v10039_v53, %v3767_v10  ;;  %v4659_v22 = vpack.c.bf16 %v4533_v9, %v4532_v14  ;;  %v4408_v25 = vadd.f32 %v10048_v51, %v4274_v15  ;;  %v9233_v15 = vld [vmem:[%s9516_s30 + $0x1d8] sm:$0xff]  }
 0x248   : > { %v8696_v16 = vpop.f32.mrf.mxu1 }
 0x249   : > { %v4658_v19 = vpack.c.bf16 %v4531_v12, %v4530_v11  ;;  %v4275_v20 = vmul.f32 %v8696_v16, %v10039_v53  ;;  %v4406_v39 = vadd.f32 %v10048_v51, %v4272_v13  ;;  %v4536_v32 = vmax.f32 %v4408_v25, 0.0 }
 0x24a   : > { %v3770_v23 = vpop.f32.mrf.mxu1 }
 0x24b   : > { %v4409_v24 = vadd.f32 %v10048_v51, %v4275_v20  ;;  %v4273_v44 = vmul.f32 %v10039_v53, %v3770_v23  ;;  %8821 = vmatprep.mubr.msk.bf16.mxu0 %vm1542_vm2, %v4658_v19  ;;  %v4534_v29 = vmax.f32 %v4406_v39, 0.0  ;;  %v9234_v19 = vld [vmem:[%s9516_s30 + $0x1e0] sm:$0xff]  }
 0x24c   : > { %v8699_v26 = vpop.f32.mrf.mxu1  ;;  %8794 = vmatmul.mubr.msk.bf16.gmra.mxu1 %vm898_vm1, %v9227_v18  ;;  %8822 = vmatmul.mubr.msk.bf16.vlgmr.msra.gmra.mxu0 %vm1542_vm2, %v4659_v22 }
 0x24d   : > { %v4407_v27 = vadd.f32 %v10048_v51, %v4273_v44  ;;  %8797 = vmatprep.mubr.msk.bf16.mxu1 %vm898_vm1, %v9228_v21  ;;  %v4537_v28 = vmax.f32 %v4409_v24, 0.0  ;;  %v4278_v37 = vmul.f32 %v8699_v26, %v10039_v53  ;;  %v9239_v26 = vld [vmem:[%s12413_s17] sm:$0xff]  }
 0x24e   : > { %v3783_v17 = vpop.f32.mrf.mxu1  ;;  %8953 = vmatprep.subr.bf16.mxu1 %v9239_v26 }
 0x24f   : > { %v4535_v30 = vmax.f32 %v4407_v27, 0.0  ;;  %v4276_v31 = vmul.f32 %v10039_v53, %v3783_v17  ;;  %v4661_v40 = vpack.c.bf16 %v4537_v28, %v4536_v32  ;;  %v4412_v47 = vadd.f32 %v10048_v51, %v4278_v37  ;;  %8954 = vmatpush3.bf16.msra.mxu1 %v9239_v26 }
 0x250   : > { %v8700_v33 = vpop.f32.mrf.mxu1 }
 0x251   : > { %v4660_v35 = vpack.c.bf16 %v4535_v30, %v4534_v29  ;;  %v4279_v36 = vmul.f32 %v8700_v33, %v10039_v53  ;;  %v4410_v42 = vadd.f32 %v10048_v51, %v4276_v31  ;;  %v4540_v56 = vmax.f32 %v4412_v47, 0.0  ;;  %v9235_v33 = vld [vmem:[%s9516_s30 + $0x1e8] sm:$0xff]  }
 0x252   : > { %v3786_v41 = vpop.f32.mrf.mxu1 }
 0x253   : > { %v4413_v43 = vadd.f32 %v10048_v51, %v4279_v36  ;;  %v4277_v46 = vmul.f32 %v10039_v53, %v3786_v41  ;;  %8825 = vmatprep.mubr.msk.bf16.mxu0 %vm1542_vm2, %v4660_v35  ;;  %v4538_v45 = vmax.f32 %v4410_v42, 0.0  ;;  %v9237_v36 = vld [vmem:[%s9516_s30 + $0x1f0] sm:$0xff]  }
 0x254   : > { %v8703_v48 = vpop.f32.mrf.mxu1  ;;  %8798 = vmatmul.mubr.msk.bf16.gmra.mxu1 %vm898_vm1, %v9229_v34  ;;  %8826 = vmatmul.mubr.msk.bf16.gmra.mxu0 %vm1542_vm2, %v4661_v40 }
 0x255   : > { %v4411_v49 = vadd.f32 %v10048_v51, %v4277_v46  ;;  %8801 = vmatprep.mubr.msk.bf16.mxu1 %vm898_vm1, %v9230_v38  ;;  %v4541_v50 = vmax.f32 %v4413_v43, 0.0  ;;  %v4282_v57 = vmul.f32 %v8703_v48, %v10039_v53 }
 0x256   : > { %v3799_v52 = vpop.f32.mrf.mxu1 }
 0x257   : > { %v4539_v54 = vmax.f32 %v4411_v49, 0.0  ;;  %v4280_v55 = vmul.f32 %v10039_v53, %v3799_v52  ;;  %v4663_v63 = vpack.c.bf16 %v4541_v50, %v4540_v56  ;;  %v4416_v4 = vadd.f32 %v10048_v51, %v4282_v57 }
 0x258   : > { %v8704_v58 = vpop.f32.mrf.mxu1 }
 0x259   : > { %v4662_v60 = vpack.c.bf16 %v4539_v54, %v4538_v45  ;;  %v4283_v61 = vmul.f32 %v8704_v58, %v10039_v53  ;;  %v4414_v1 = vadd.f32 %v10048_v51, %v4280_v55  ;;  %v4544_v12 = vmax.f32 %v4416_v4, 0.0  ;;  %v9238_v58 = vld [vmem:[%s9516_s30 + $0x1f8] sm:$0xff]   ;;  %s9313_s30 = smov 64  }
 0x25a   : > { %v3802_v0 = vpop.f32.mrf.mxu1 }
 0x25b   : > { %v4417_v2 = vadd.f32 %v10048_v51, %v4283_v61  ;;  %v4281_v3 = vmul.f32 %v10039_v53, %v3802_v0  ;;  %8829 = vmatprep.mubr.msk.bf16.mxu0 %vm1542_vm2, %v4662_v60  ;;  %v4542_v9 = vmax.f32 %v4414_v1, 0.0 }
 0x25c   : > { %v8707_v5 = vpop.f32.mrf.mxu1  ;;  %8802 = vmatmul.mubr.msk.bf16.gmra.mxu1 %vm898_vm1, %v9231_v59  ;;  %8830 = vmatmul.mubr.msk.bf16.gmra.mxu0 %vm1542_vm2, %v4663_v63 }
 0x25d   : > { %v4415_v6 = vadd.f32 %v10048_v51, %v4281_v3  ;;  %8805 = vmatprep.mubr.msk.bf16.mxu1 %vm898_vm1, %v9232_v62  ;;  %v4545_v7 = vmax.f32 %v4417_v2, 0.0  ;;  %v4286_v13 = vmul.f32 %v8707_v5, %v10039_v53 }
 0x25e   : > { %v3815_v8 = vpop.f32.mrf.mxu1 }
 0x25f   : > { %v4543_v10 = vmax.f32 %v4415_v6, 0.0  ;;  %v4284_v11 = vmul.f32 %v10039_v53, %v3815_v8  ;;  %v4665_v20 = vpack.c.bf16 %v4545_v7, %v4544_v12  ;;  %v4420_v24 = vadd.f32 %v10048_v51, %v4286_v13 }
 0x260   : > { %v8708_v14 = vpop.f32.mrf.mxu1 }
 0x261   : > { %v4664_v16 = vpack.c.bf16 %v4543_v10, %v4542_v9  ;;  %v4287_v18 = vmul.f32 %v8708_v14, %v10039_v53  ;;  %v4418_v22 = vadd.f32 %v10048_v51, %v4284_v11  ;;  %v4548_v31 = vmax.f32 %v4420_v24, 0.0 }
 0x262   : > { %v3818_v21 = vpop.f32.mrf.mxu1 }
 0x263   : > { %v4421_v23 = vadd.f32 %v10048_v51, %v4287_v18  ;;  %v4285_v39 = vmul.f32 %v10039_v53, %v3818_v21  ;;  %8833 = vmatprep.mubr.msk.bf16.mxu0 %vm1542_vm2, %v4664_v16  ;;  %v4546_v17 = vmax.f32 %v4418_v22, 0.0 }
 0x264   : > { %v8711_v44 = vpop.f32.mrf.mxu1  ;;  %8806 = vmatmul.mubr.msk.bf16.gmra.mxu1 %vm898_vm1, %v9233_v15  ;;  %8834 = vmatmul.mubr.msk.bf16.gmra.mxu0 %vm1542_vm2, %v4665_v20 }
 0x265   : > { %v4419_v25 = vadd.f32 %v10048_v51, %v4285_v39  ;;  %8809 = vmatprep.mubr.msk.bf16.mxu1 %vm898_vm1, %v9234_v19  ;;  %v4549_v27 = vmax.f32 %v4421_v23, 0.0  ;;  %v4290_v32 = vmul.f32 %v8711_v44, %v10039_v53 }
 0x266   : > { %v3831_v28 = vpop.f32.mrf.mxu1 }
 0x267   : > { %v4547_v29 = vmax.f32 %v4419_v25, 0.0  ;;  %v4288_v30 = vmul.f32 %v10039_v53, %v3831_v28  ;;  %v4667_v38 = vpack.c.bf16 %v4549_v27, %v4548_v31  ;;  %v4424_v46 = vadd.f32 %v10048_v51, %v4290_v32 }
 0x268   : > { %v8712_v37 = vpop.f32.mrf.mxu1 }
 0x269   : > { %v4666_v34 = vpack.c.bf16 %v4547_v29, %v4546_v17  ;;  %v4291_v35 = vmul.f32 %v8712_v37, %v10039_v53  ;;  %v4422_v41 = vadd.f32 %v10048_v51, %v4288_v30  ;;  %v4552_v55 = vmax.f32 %v4424_v46, 0.0 }
 0x26a   : > { %v3834_v40 = vpop.f32.mrf.mxu1 }
 0x26b   : > { %v4425_v42 = vadd.f32 %v10048_v51, %v4291_v35  ;;  %v4289_v43 = vmul.f32 %v10039_v53, %v3834_v40  ;;  %8837 = vmatprep.mubr.msk.bf16.mxu0 %vm1542_vm2, %v4666_v34  ;;  %v4550_v52 = vmax.f32 %v4422_v41, 0.0 }
 0x26c   : > { %v8715_v47 = vpop.f32.mrf.mxu1  ;;  %8810 = vmatmul.mubr.msk.bf16.gmra.mxu1 %vm898_vm1, %v9235_v33  ;;  %8838 = vmatmul.mubr.msk.bf16.gmra.mxu0 %vm1542_vm2, %v4667_v38 }
 0x26d   : > { %v4423_v48 = vadd.f32 %v10048_v51, %v4289_v43  ;;  %8813 = vmatprep.mubr.msk.bf16.mxu1 %vm898_vm1, %v9237_v36  ;;  %v4553_v49 = vmax.f32 %v4425_v42, 0.0  ;;  %v4294_v56 = vmul.f32 %v8715_v47, %v10039_v53 }
 0x26e   : > { %v3847_v50 = vpop.f32.mrf.mxu1 }
 0x26f   : > { %v4551_v45 = vmax.f32 %v4423_v48, 0.0  ;;  %v4292_v54 = vmul.f32 %v10039_v53, %v3847_v50  ;;  %v4669_v61 = vpack.c.bf16 %v4553_v49, %v4552_v55  ;;  %v4428_v2 = vadd.f32 %v10048_v51, %v4294_v56  ;;  %v10172_v55 = vld [vmem:[%s12405_s9] ss:$0 sm:$0xff] }
 0x270   : > { %v8716_v57 = vpop.f32.mrf.mxu1 }
 0x271   : > { %v4668_v59 = vpack.c.bf16 %v4551_v45, %v4550_v52  ;;  %v4295_v60 = vmul.f32 %v8716_v57, %v10039_v53  ;;  %v4426_v63 = vadd.f32 %v10048_v51, %v4292_v54  ;;  %v4556_v10 = vmax.f32 %v4428_v2, 0.0 }
 0x272   : > { %v3850_v62 = vpop.f32.mrf.mxu1 }
 0x273   : > { %v4429_v0 = vadd.f32 %v10048_v51, %v4295_v60  ;;  %v4293_v1 = vmul.f32 %v10039_v53, %v3850_v62  ;;  %8841 = vmatprep.mubr.msk.bf16.mxu0 %vm1542_vm2, %v4668_v59  ;;  %v4554_v7 = vmax.f32 %v4426_v63, 0.0  ;;  %v10182_v60 = vld [vmem:[%s12406_s10] ss:$0 sm:$0xff] }
 0x274   : > { %v8719_v3 = vpop.f32.mrf.mxu1  ;;  %8814 = vmatmul.mubr.msk.bf16.gmra.mxu1 %vm898_vm1, %v9238_v58  ;;  %8842 = vmatmul.mubr.msk.bf16.gmra.mxu0 %vm1542_vm2, %v4669_v61 }
 0x275   : > { %v4427_v4 = vadd.f32 %v10048_v51, %v4293_v1  ;;  %v4557_v5 = vmax.f32 %v4429_v0, 0.0  ;;  %v4298_v11 = vmul.f32 %v8719_v3, %v10039_v53 }
 0x276   : > { %v3863_v6 = vpop.f32.mrf.mxu1 }
 0x277   : > { %v4555_v8 = vmax.f32 %v4427_v4, 0.0  ;;  %v4296_v9 = vmul.f32 %v10039_v53, %v3863_v6  ;;  %v4671_v15 = vpack.c.bf16 %v4557_v5, %v4556_v10  ;;  %v4432_v21 = vadd.f32 %v10048_v51, %v4298_v11 }
 0x278   : > { %v8720_v12 = vpop.f32.mrf.mxu1 }
 0x279   : > { %v4670_v13 = vpack.c.bf16 %v4555_v8, %v4554_v7  ;;  %v4299_v14 = vmul.f32 %v8720_v12, %v10039_v53  ;;  %v4430_v18 = vadd.f32 %v10048_v51, %v4296_v9  ;;  %v4560_v27 = vmax.f32 %v4432_v21, 0.0 }
 0x27a   : > { %v3866_v16 = vpop.f32.mrf.mxu1 }
 0x27b   : > { %v4433_v19 = vadd.f32 %v10048_v51, %v4299_v14  ;;  %v4297_v20 = vmul.f32 %v10039_v53, %v3866_v16  ;;  %8845 = vmatprep.mubr.msk.bf16.mxu0 %vm1542_vm2, %v4670_v13  ;;  %v4558_v44 = vmax.f32 %v4430_v18, 0.0 }
 0x27c   : > { %v8723_v22 = vpop.f32.mrf.mxu1  ;;  %8846 = vmatmul.mubr.msk.bf16.gmra.mxu0 %vm1542_vm2, %v4671_v15 }
 0x27d   : > { %v4431_v23 = vadd.f32 %v10048_v51, %v4297_v20  ;;  %v4561_v39 = vmax.f32 %v4433_v19, 0.0  ;;  %v4302_v28 = vmul.f32 %v8723_v22, %v10039_v53 }
 0x27e   : > { %v3879_v24 = vpop.f32.mrf.mxu1 }
 0x27f   : > { %v4559_v25 = vmax.f32 %v4431_v23, 0.0  ;;  %v4300_v26 = vmul.f32 %v10039_v53, %v3879_v24  ;;  %v4673_v31 = vpack.c.bf16 %v4561_v39, %v4560_v27  ;;  %v4436_v35 = vadd.f32 %v10048_v51, %v4302_v28 }
 0x280   : > { %v8724_v17 = vpop.f32.mrf.mxu1 }
 0x281   : > { %v4672_v29 = vpack.c.bf16 %v4559_v25, %v4558_v44  ;;  %v4303_v30 = vmul.f32 %v8724_v17, %v10039_v53  ;;  %v4434_v37 = vadd.f32 %v10048_v51, %v4300_v26  ;;  %v4564_v47 = vmax.f32 %v4436_v35, 0.0 }
 0x282   : > { %v3882_v32 = vpop.f32.mrf.mxu1 }
 0x283   : > { %v4437_v33 = vadd.f32 %v10048_v51, %v4303_v30  ;;  %v4301_v34 = vmul.f32 %v10039_v53, %v3882_v32  ;;  %8849 = vmatprep.mubr.msk.bf16.mxu0 %vm1542_vm2, %v4672_v29  ;;  %v4562_v42 = vmax.f32 %v4434_v37, 0.0 }
 0x284   : > { %v8727_v36 = vpop.f32.mrf.mxu1  ;;  %8850 = vmatmul.mubr.msk.bf16.gmra.mxu0 %vm1542_vm2, %v4673_v31 }
 0x285   : > { %v4435_v38 = vadd.f32 %v10048_v51, %v4301_v34  ;;  %v4565_v40 = vmax.f32 %v4437_v33, 0.0  ;;  %v4306_v48 = vmul.f32 %v8727_v36, %v10039_v53 }
 0x286   : > { %v3895_v41 = vpop.f32.mrf.mxu1 }
 0x287   : > { %v4563_v43 = vmax.f32 %v4435_v38, 0.0  ;;  %v4304_v46 = vmul.f32 %v10039_v53, %v3895_v41  ;;  %v4675_v45 = vpack.c.bf16 %v4565_v40, %v4564_v47  ;;  %v4440_v59 = vadd.f32 %v10048_v51, %v4306_v48 }
 0x288   : > { %v8728_v49 = vpop.f32.mrf.mxu1 }
 0x289   : > { %v4674_v50 = vpack.c.bf16 %v4563_v43, %v4562_v42  ;;  %v4307_v52 = vmul.f32 %v8728_v49, %v10039_v53  ;;  %v4438_v56 = vadd.f32 %v10048_v51, %v4304_v46  ;;  %v4568_v7 = vmax.f32 %v4440_v59, 0.0 }
 0x28a   : > { %v3898_v54 = vpop.f32.mrf.mxu1 }
 0x28b   : > { %v4441_v57 = vadd.f32 %v10048_v51, %v4307_v52  ;;  %v4305_v58 = vmul.f32 %v10039_v53, %v3898_v54  ;;  %8853 = vmatprep.mubr.msk.bf16.mxu0 %vm1542_vm2, %v4674_v50  ;;  %v4566_v4 = vmax.f32 %v4438_v56, 0.0 }
 0x28c   : > { %v8623_v61 = vpop.f32.mrf.mxu0  ;;  %v8731_v62 = vpop.f32.mrf.mxu1  ;;  %8854 = vmatmul.mubr.msk.bf16.gmra.mxu0 %vm1542_vm2, %v4675_v45 }
 0x28d   : > { %v4439_v63 = vadd.f32 %v10048_v51, %v4305_v58  ;;  %v2575_v0 = vmul.f32 %v8623_v61, %v10172_v55  ;;  %v4569_v1 = vmax.f32 %v4441_v57, 0.0  ;;  %v4310_v8 = vmul.f32 %v8731_v62, %v10039_v53 }
 0x28e   : > { %v2312_v2 = vpop.f32.mrf.mxu0  ;;  %v3911_v3 = vpop.f32.mrf.mxu1 }
 0x28f   : > { %v4567_v5 = vmax.f32 %v4439_v63, 0.0  ;;  %v2645_v6 = vadd.f32 %v10182_v60, %v2575_v0  ;;  %v2573_v9 = vmul.f32 %v10172_v55, %v2312_v2  ;;  %v4308_v10 = vmul.f32 %v10039_v53, %v3911_v3 }
 0x290   : > { %v8624_v11 = vpop.f32.mrf.mxu0  ;;  %v8732_v12 = vpop.f32.mrf.mxu1  ;;  %v4677_v15 = vpack.c.bf16 %v4569_v1, %v4568_v7  ;;  %v4444_v44 = vadd.f32 %v10048_v51, %v4310_v8 }
 0x291   : > { %v4676_v13 = vpack.c.bf16 %v4567_v5, %v4566_v4  ;;  %v2576_v14 = vmul.f32 %v8624_v11, %v10172_v55  ;;  %v2709_v16 = vmax.f32 %v2645_v6, 0.0  ;;  %v2643_v18 = vadd.f32 %v10182_v60, %v2573_v9 }
 0x292   : > { %v4311_v19 = vmul.f32 %v8732_v12, %v10039_v53  ;;  %v2315_v20 = vpop.f32.mrf.mxu0  ;;  %v3914_v21 = vpop.f32.mrf.mxu1  ;;  %v4442_v22 = vadd.f32 %v10048_v51, %v4308_v10  ;;  %v4572_v41 = vmax.f32 %v4444_v44, 0.0 }
 0x293   : > { %v2646_v23 = vadd.f32 %v10182_v60, %v2576_v14  ;;  %v2574_v39 = vmul.f32 %v10172_v55, %v2315_v20  ;;  %v4309_v24 = vmul.f32 %v10039_v53, %v3914_v21  ;;  %8857 = vmatprep.mubr.msk.bf16.mxu0 %vm1542_vm2, %v4676_v13  ;;  %v2707_v25 = vmax.f32 %v2643_v18, 0.0 }
 0x294   : > { %v4445_v26 = vadd.f32 %v10048_v51, %v4311_v19  ;;  %v8627_v27 = vpop.f32.mrf.mxu0  ;;  %v8735_v28 = vpop.f32.mrf.mxu1  ;;  %8858 = vmatmul.mubr.msk.bf16.gmra.mxu0 %vm1542_vm2, %v4677_v15  ;;  %v2781_v32 = vsel %vm2771_vm3, %v2709_v16, -inf  ;;  %v4570_v35 = vmax.f32 %v4442_v22, 0.0 }
 0x295   : > { %v2710_v17 = vmax.f32 %v2646_v23, 0.0  ;;  %v2644_v29 = vadd.f32 %v10182_v60, %v2574_v39  ;;  %v4443_v30 = vadd.f32 %v10048_v51, %v4309_v24  ;;  %v2579_v31 = vmul.f32 %v8627_v27, %v10172_v55 }
 0x296   : > { %v4573_v37 = vmax.f32 %v4445_v26, 0.0  ;;  %v2328_v33 = vpop.f32.mrf.mxu0  ;;  %v3927_v34 = vpop.f32.mrf.mxu1  ;;  %v2772_v49 = vsel %vm2771_vm3, %v2707_v25, -inf  ;;  %v4314_v57 = vmul.f32 %v8735_v28, %v10039_v53 }
 0x297   : > { %v2782_v36 = vsel %vm2771_vm3, %v2710_v17, -inf  ;;  %v2708_v38 = vmax.f32 %v2644_v29, 0.0  ;;  %v4571_v40 = vmax.f32 %v4443_v30, 0.0  ;;  %v2649_v43 = vadd.f32 %v10182_v60, %v2579_v31 }
 0x298   : > { %v10207_v42 = vmax.f32 %v2781_v32, %v2782_v36  ;;  %v2577_v46 = vmul.f32 %v10172_v55, %v2328_v33  ;;  %v8628_v47 = vpop.f32.mrf.mxu0  ;;  %v8736_v48 = vpop.f32.mrf.mxu1  ;;  %v4312_v45 = vmul.f32 %v10039_v53, %v3927_v34  ;;  %v4679_v54 = vpack.c.bf16 %v4573_v37, %v4572_v41 }
 0x299   : > { %v2773_v50 = vsel %vm2771_vm3, %v2708_v38, -inf  ;;  %v4678_v52 = vpack.c.bf16 %v4571_v40, %v4570_v35  ;;  %v2580_v62 = vmul.f32 %v8628_v47, %v10172_v55  ;;  %v4315_v63 = vmul.f32 %v8736_v48, %v10039_v53 }
 0x29a   : > { %v10214_v56 = vmax.f32 %v2772_v49, %v2773_v50  ;;  %v2647_v58 = vadd.f32 %v10182_v60, %v2577_v46  ;;  %v2331_v59 = vpop.f32.mrf.mxu0  ;;  %v3930_v61 = vpop.f32.mrf.mxu1  ;;  %v2713_v0 = vmax.f32 %v2649_v43, 0.0  ;;  %v4446_v4 = vadd.f32 %v10048_v51, %v4312_v45 }
 0x29b   : > { %8861 = vmatprep.mubr.msk.bf16.mxu0 %vm1542_vm2, %v4678_v52  ;;  %v2578_v1 = vmul.f32 %v10172_v55, %v2331_v59  ;;  %v2650_v5 = vadd.f32 %v10182_v60, %v2580_v62  ;;  %v4449_v6 = vadd.f32 %v10048_v51, %v4315_v63  ;;  %v4313_v7 = vmul.f32 %v10039_v53, %v3930_v61 }
 0x29c   : > { %v8631_v2 = vpop.f32.mrf.mxu0  ;;  %v8739_v3 = vpop.f32.mrf.mxu1  ;;  %8862 = vmatmul.mubr.msk.bf16.gmra.mxu0 %vm1542_vm2, %v4679_v54  ;;  %v4448_v8 = vadd.f32 %v10048_v51, %v4314_v57  ;;  %v2711_v9 = vmax.f32 %v2647_v58, 0.0  ;;  %v2799_v21 = vsel %vm2771_vm3, %v2713_v0, -inf  ;;  %v4574_v22 = vmax.f32 %v4446_v4, 0.0 }
 0x29d   : > { %v2648_v10 = vadd.f32 %v10182_v60, %v2578_v1  ;;  %v2714_v13 = vmax.f32 %v2650_v5, 0.0  ;;  %v4447_v14 = vadd.f32 %v10048_v51, %v4313_v7  ;;  %v4577_v15 = vmax.f32 %v4449_v6, 0.0 }
 0x29e   : > { %v2344_v11 = vpop.f32.mrf.mxu0  ;;  %v3943_v12 = vpop.f32.mrf.mxu1  ;;  %v2583_v18 = vmul.f32 %v8631_v2, %v10172_v55  ;;  %v4576_v24 = vmax.f32 %v4448_v8, 0.0  ;;  %v2790_v44 = vsel %vm2771_vm3, %v2711_v9, -inf  ;;  %v4318_v34 = vmul.f32 %v8739_v3, %v10039_v53 }
 0x29f   : > { %v2712_v16 = vmax.f32 %v2648_v10, 0.0  ;;  %v2800_v23 = vsel %vm2771_vm3, %v2714_v13, -inf  ;;  %v4575_v39 = vmax.f32 %v4447_v14, 0.0  ;;  %v2581_v32 = vmul.f32 %v10172_v55, %v2344_v11 }
 0x2a0   : > { %v8632_v19 = vpop.f32.mrf.mxu0  ;;  %v8740_v20 = vpop.f32.mrf.mxu1  ;;  %v10234_v25 = vmax.f32 %v2799_v21, %v2800_v23  ;;  %v4681_v30 = vpack.c.bf16 %v4577_v15, %v4576_v24  ;;  %v2653_v31 = vadd.f32 %v10182_v60, %v2583_v18  ;;  %v4316_v35 = vmul.f32 %v10039_v53, %v3943_v12 }
 0x2a1   : > { %v2791_v26 = vsel %vm2771_vm3, %v2712_v16, -inf  ;;  %v4680_v29 = vpack.c.bf16 %v4575_v39, %v4574_v22  ;;  %v2651_v36 = vadd.f32 %v10182_v60, %v2581_v32  ;;  %v2584_v38 = vmul.f32 %v8632_v19, %v10172_v55 }
 0x2a2   : > { %v2347_v27 = vpop.f32.mrf.mxu0  ;;  %v3946_v28 = vpop.f32.mrf.mxu1  ;;  %v10237_v17 = vmax.f32 %v2790_v44, %v2791_v26  ;;  %v4319_v43 = vmul.f32 %v8740_v20, %v10039_v53  ;;  %v2717_v47 = vmax.f32 %v2653_v31, 0.0  ;;  %v4450_v48 = vadd.f32 %v10048_v51, %v4316_v35 }
 0x2a3   : > { %8865 = vmatprep.mubr.msk.bf16.mxu0 %vm1542_vm2, %v4680_v29  ;;  %v2582_v46 = vmul.f32 %v10172_v55, %v2347_v27  ;;  %v2654_v49 = vadd.f32 %v10182_v60, %v2584_v38  ;;  %v4317_v50 = vmul.f32 %v10039_v53, %v3946_v28  ;;  %v4452_v54 = vadd.f32 %v10048_v51, %v4318_v34 }
 0x2a4   : > { %v8635_v37 = vpop.f32.mrf.mxu0  ;;  %v8743_v33 = vpop.f32.mrf.mxu1  ;;  %8866 = vmatmul.mubr.msk.bf16.gmra.mxu0 %vm1542_vm2, %v4681_v30  ;;  %v2715_v57 = vmax.f32 %v2651_v36, 0.0  ;;  %v4453_v58 = vadd.f32 %v10048_v51, %v4319_v43  ;;  %v2817_v4 = vsel %vm2771_vm3, %v2717_v47, -inf  ;;  %v4578_v5 = vmax.f32 %v4450_v48, 0.0 }
 0x2a5   : > { %v2652_v59 = vadd.f32 %v10182_v60, %v2582_v46  ;;  %v2718_v61 = vmax.f32 %v2654_v49, 0.0  ;;  %v4451_v62 = vadd.f32 %v10048_v51, %v4317_v50  ;;  %v2587_v3 = vmul.f32 %v8635_v37, %v10172_v55 }
 0x2a6   : > { %v2360_v40 = vpop.f32.mrf.mxu0  ;;  %v3959_v41 = vpop.f32.mrf.mxu1  ;;  %v4581_v1 = vmax.f32 %v4453_v58, 0.0  ;;  %v4580_v10 = vmax.f32 %v4452_v54, 0.0  ;;  %v2808_v11 = vsel %vm2771_vm3, %v2715_v57, -inf  ;;  %v4322_v44 = vmul.f32 %v8743_v33, %v10039_v53 }
 0x2a7   : > { %v2716_v2 = vmax.f32 %v2652_v59, 0.0  ;;  %v2818_v6 = vsel %vm2771_vm3, %v2718_v61, -inf  ;;  %v4579_v7 = vmax.f32 %v4451_v62, 0.0  ;;  %v2657_v16 = vadd.f32 %v10182_v60, %v2587_v3 }
 0x2a8   : > { %v8636_v52 = vpop.f32.mrf.mxu0  ;;  %v8744_v45 = vpop.f32.mrf.mxu1  ;;  %v10260_v12 = vmax.f32 %v2817_v4, %v2818_v6  ;;  %v4683_v20 = vpack.c.bf16 %v4581_v1, %v4580_v10  ;;  %v2585_v21 = vmul.f32 %v10172_v55, %v2360_v40  ;;  %v4320_v22 = vmul.f32 %v10039_v53, %v3959_v41 }
 0x2a9   : > { %v2809_v13 = vsel %vm2771_vm3, %v2716_v2, -inf  ;;  %v4682_v15 = vpack.c.bf16 %v4579_v7, %v4578_v5  ;;  %v2588_v23 = vmul.f32 %v8636_v52, %v10172_v55  ;;  %v4323_v27 = vmul.f32 %v8744_v45, %v10039_v53 }
 0x2aa   : > { %v2363_v63 = vpop.f32.mrf.mxu0  ;;  %v3962_v0 = vpop.f32.mrf.mxu1  ;;  %v10263_v14 = vmax.f32 %v2808_v11, %v2809_v13  ;;  %v2655_v26 = vadd.f32 %v10182_v60, %v2585_v21  ;;  %v2721_v28 = vmax.f32 %v2657_v16, 0.0  ;;  %v4454_v34 = vadd.f32 %v10048_v51, %v4320_v22 }
 0x2ab   : > { %8869 = vmatprep.mubr.msk.bf16.mxu0 %vm1542_vm2, %v4682_v15  ;;  %v2658_v29 = vadd.f32 %v10182_v60, %v2588_v23  ;;  %v4457_v32 = vadd.f32 %v10048_v51, %v4323_v27  ;;  %v2586_v37 = vmul.f32 %v10172_v55, %v2363_v63  ;;  %v4321_v33 = vmul.f32 %v10039_v53, %v3962_v0 }
 0x2ac   : > { %v8639_v8 = vpop.f32.mrf.mxu0  ;;  %v8747_v9 = vpop.f32.mrf.mxu1  ;;  %8870 = vmatmul.mubr.msk.bf16.gmra.mxu0 %vm1542_vm2, %v4683_v20  ;;  %v4456_v40 = vadd.f32 %v10048_v51, %v4322_v44  ;;  %v2719_v41 = vmax.f32 %v2655_v26, 0.0  ;;  %v2835_v46 = vsel %vm2771_vm3, %v2721_v28, -inf  ;;  %v4582_v58 = vmax.f32 %v4454_v34, 0.0 }
 0x2ad   : > { %v2722_v35 = vmax.f32 %v2658_v29, 0.0  ;;  %v2656_v43 = vadd.f32 %v10182_v60, %v2586_v37  ;;  %v4455_v48 = vadd.f32 %v10048_v51, %v4321_v33  ;;  %v2591_v49 = vmul.f32 %v8639_v8, %v10172_v55 }
 0x2ae   : > { %v2376_v18 = vpop.f32.mrf.mxu0  ;;  %v3975_v19 = vpop.f32.mrf.mxu1  ;;  %v4585_v54 = vmax.f32 %v4457_v32, 0.0  ;;  %v4584_v63 = vmax.f32 %v4456_v40, 0.0  ;;  %v2826_v0 = vsel %vm2771_vm3, %v2719_v41, -inf  ;;  %v4326_v11 = vmul.f32 %v8747_v9, %v10039_v53 }
 0x2af   : > { %v2836_v47 = vsel %vm2771_vm3, %v2722_v35, -inf  ;;  %v2720_v57 = vmax.f32 %v2656_v43, 0.0  ;;  %v4583_v59 = vmax.f32 %v4455_v48, 0.0  ;;  %v2589_v2 = vmul.f32 %v10172_v55, %v2376_v18 }
 0x2b0   : > { %v8640_v39 = vpop.f32.mrf.mxu0  ;;  %v8748_v24 = vpop.f32.mrf.mxu1  ;;  %v10289_v45 = vmax.f32 %v2835_v46, %v2836_v47  ;;  %v2661_v5 = vadd.f32 %v10182_v60, %v2591_v49  ;;  %v4685_v8 = vpack.c.bf16 %v4585_v54, %v4584_v63  ;;  %v4324_v10 = vmul.f32 %v10039_v53, %v3975_v19 }
 0x2b1   : > { %v2827_v1 = vsel %vm2771_vm3, %v2720_v57, -inf  ;;  %v4684_v4 = vpack.c.bf16 %v4583_v59, %v4582_v58  ;;  %v2659_v13 = vadd.f32 %v10182_v60, %v2589_v2  ;;  %v2592_v15 = vmul.f32 %v8640_v39, %v10172_v55 }
 0x2b2   : > { %v2379_v30 = vpop.f32.mrf.mxu0  ;;  %v3978_v31 = vpop.f32.mrf.mxu1  ;;  %v10296_v3 = vmax.f32 %v2826_v0, %v2827_v1  ;;  %v4327_v16 = vmul.f32 %v8748_v24, %v10039_v53  ;;  %v2784_v21 = vrot.slane %v10207_v42, 4  ;;  %v2725_v22 = vmax.f32 %v2661_v5, 0.0 }
 0x2b3   : > { %8873 = vmatprep.mubr.msk.bf16.mxu0 %vm1542_vm2, %v4684_v4  ;;  %v2662_v19 = vadd.f32 %v10182_v60, %v2592_v15  ;;  %v2590_v23 = vmul.f32 %v10172_v55, %v2379_v30  ;;  %v4458_v44 = vadd.f32 %v10048_v51, %v4324_v10  ;;  %v4325_v26 = vmul.f32 %v10039_v53, %v3978_v31 }
 0x2b4   : > { %v8643_v36 = vpop.f32.mrf.mxu0  ;;  %v10279_v38 = vpop.f32.mrf.mxu1  ;;  %8874 = vmatmul.mubr.msk.bf16.gmra.mxu0 %vm1542_vm2, %v4685_v8  ;;  %v4461_v9 = vadd.f32 %v10048_v51, %v4327_v16  ;;  %v4460_v27 = vadd.f32 %v10048_v51, %v4326_v11  ;;  %v2723_v28 = vmax.f32 %v2659_v13, 0.0  ;;  %v2785_v30 = vmax.f32 %v10207_v42, %v2784_v21 }
 0x2b5   : > { %v2726_v29 = vmax.f32 %v2662_v19, 0.0  ;;  %v2660_v32 = vadd.f32 %v10182_v60, %v2590_v23  ;;  %v4459_v35 = vadd.f32 %v10048_v51, %v4325_v26  ;;  %v2595_v33 = vmul.f32 %v8643_v36, %v10172_v55 }
 0x2b6   : > { %v2392_v50 = vpop.f32.mrf.mxu0  ;;  %v10287_v52 = vpop.f32.mrf.mxu1  ;;  %v2853_v31 = vsel %vm2771_vm3, %v2725_v22, -inf  ;;  %v4589_v43 = vmax.f32 %v4461_v9, 0.0  ;;  %v4586_v49 = vmax.f32 %v4458_v44, 0.0  ;;  %v4588_v58 = vmax.f32 %v4460_v27, 0.0 }
 0x2b7   : > { %v2593_v40 = vmul.f32 %v10172_v55, %v2392_v50  ;;  %v2854_v41 = vsel %vm2771_vm3, %v2726_v29, -inf  ;;  %v2724_v46 = vmax.f32 %v2660_v32, 0.0  ;;  %v4587_v42 = vmax.f32 %v4459_v35, 0.0 }
 0x2b8   : > { %v8644_v61 = vpop.f32.mrf.mxu0  ;;  %v10291_v62 = vpop.f32.mrf.mxu1  ;;  %v10338_v54 = vmax.f32 %v2853_v31, %v2854_v41  ;;  %v2665_v57 = vadd.f32 %v10182_v60, %v2595_v33  ;;  %v2844_v36 = vsel %vm2771_vm3, %v2723_v28, -inf  ;;  %v2775_v1 = vrot.slane %v10214_v56, 4 }
 0x2b9   : > { %v2845_v50 = vsel %vm2771_vm3, %v2724_v46, -inf  ;;  %v2596_v59 = vmul.f32 %v8644_v61, %v10172_v55  ;;  %v4686_v4 = vpack.c.bf16 %v4587_v42, %v4586_v49  ;;  %v2663_v5 = vadd.f32 %v10182_v60, %v2593_v40 }
 0x2ba   : > { %v2395_v6 = vpop.f32.mrf.mxu0  ;;  %v10299_v7 = vpop.f32.mrf.mxu1  ;;  %v10349_v2 = vmax.f32 %v2844_v36, %v2845_v50  ;;  %v4687_v8 = vpack.c.bf16 %v4589_v43, %v4588_v58  ;;  %v2729_v10 = vmax.f32 %v2665_v57, 0.0  ;;  %v4328_v11 = vmul.f32 %v10039_v53, %v10287_v52 }
 0x2bb   : > { %v2666_v13 = vadd.f32 %v10182_v60, %v2596_v59  ;;  %v4330_v16 = vmul.f32 %v10279_v38, %v10039_v53  ;;  %v4331_v21 = vmul.f32 %v10291_v62, %v10039_v53  ;;  %8877 = vmatprep.mubr.msk.bf16.mxu0 %vm1542_vm2, %v4686_v4  ;;  %v2786_v22 = vrot.slane %v2785_v30, 2 }
 0x2bc   : > { %v10307_v18 = vpop.f32.mrf.mxu0  ;;  %v10309_v20 = vpop.f32.mrf.mxu1  ;;  %v2594_v9 = vmul.f32 %v10172_v55, %v2395_v6  ;;  %8878 = vmatmul.mubr.msk.bf16.gmra.mxu0 %vm1542_vm2, %v4687_v8  ;;  %v2776_v44 = vmax.f32 %v10214_v56, %v2775_v1  ;;  %v2727_v26 = vmax.f32 %v2663_v5, 0.0  ;;  %v4329_v62 = vmul.f32 %v10039_v53, %v10299_v7 }
 0x2bd   : > { %v2730_v19 = vmax.f32 %v2666_v13, 0.0  ;;  %v4465_v38 = vadd.f32 %v10048_v51, %v4331_v21  ;;  %v2871_v27 = vsel %vm2771_vm3, %v2729_v10, -inf  ;;  %v4462_v28 = vadd.f32 %v10048_v51, %v4328_v11 }
 0x2be   : > { %v10316_v39 = vpop.f32.mrf.mxu0  ;;  %v10318_v24 = vpop.f32.mrf.mxu1  ;;  %v2664_v29 = vadd.f32 %v10182_v60, %v2594_v9  ;;  %v4464_v56 = vadd.f32 %v10048_v51, %v4330_v16  ;;  %v2599_v40 = vmul.f32 %v10307_v18, %v10172_v55  ;;  %v4463_v7 = vadd.f32 %v10048_v51, %v4329_v62 }
 0x2bf   : > { %v2872_v6 = vsel %vm2771_vm3, %v2730_v19, -inf  ;;  %v10392_v43 = vmax.f32 %v2785_v30, %v2786_v22  ;;  %v2777_v46 = vrot.slane %v2776_v44, 2  ;;  %v4593_v49 = vmax.f32 %v4465_v38, 0.0  ;;  %v10406_v30 = vld [vmem:[%s12408_s12] ss:$0 sm:$0xff] }
 0x2c0   : > { %v10324_v37 = vpop.f32.mrf.mxu0  ;;  %v10326_v34 = vpop.f32.mrf.mxu1  ;;  %v10383_v33 = vmax.f32 %v2871_v27, %v2872_v6  ;;  %v2728_v53 = vmax.f32 %v2664_v29, 0.0  ;;  %v2862_v42 = vsel %vm2771_vm3, %v2727_v26, -inf  ;;  %v4590_v57 = vmax.f32 %v4462_v28, 0.0 }
 0x2c1   : > { %v4591_v36 = vmax.f32 %v4463_v7, 0.0  ;;  %v4592_v59 = vmax.f32 %v4464_v56, 0.0  ;;  %v2669_v1 = vadd.f32 %v10182_v60, %v2599_v40  ;;  %v4334_v5 = vmul.f32 %v10406_v30, %v10309_v20 }
 0x2c2   : > { %v10334_v47 = vpop.f32.mrf.mxu0  ;;  %v10336_v48 = vpop.f32.mrf.mxu1  ;;  %v2863_v58 = vsel %vm2771_vm3, %v2728_v53, -inf  ;;  %v2597_v8 = vmul.f32 %v10172_v55, %v10316_v39  ;;  %v4332_v10 = vmul.f32 %v10406_v30, %v10318_v24  ;;  %v2788_v16 = vrot.slane %v10392_v43, 1 }
 0x2c3   : > { %v10400_v51 = vmax.f32 %v2862_v42, %v2863_v58  ;;  %v4688_v4 = vpack.c.bf16 %v4591_v36, %v4590_v57  ;;  %v2778_v21 = vmax.f32 %v2776_v44, %v2777_v46  ;;  %v4689_v22 = vpack.c.bf16 %v4593_v49, %v4592_v59 }
 0x2c4   : > { %v10344_v63 = vpop.f32.mrf.mxu0  ;;  %v10346_v0 = vpop.f32.mrf.mxu1  ;;  %v2600_v19 = vmul.f32 %v10324_v37, %v10172_v55  ;;  %v2802_v9 = vrot.slane %v10234_v25, 4  ;;  %v2667_v20 = vadd.f32 %v10182_v60, %v2597_v8  ;;  %v4335_v39 = vmul.f32 %v10406_v30, %v10326_v34  ;;  %v10435_v37 = vld [vmem:[%s12409_s13] ss:$0 sm:$0xff] }
 0x2c5   : > { %v2598_v24 = vmul.f32 %v10172_v55, %v10334_v47  ;;  %8881 = vmatprep.mubr.msk.bf16.mxu0 %vm1542_vm2, %v4688_v4  ;;  %v2733_v44 = vmax.f32 %v2669_v1, 0.0  ;;  %v4466_v62 = vadd.f32 %v10435_v37, %v4332_v10  ;;  %v4333_v34 = vmul.f32 %v10406_v30, %v10336_v48 }
 0x2c6   : > { %v10355_v15 = vpop.f32.mrf.mxu0  ;;  %v10357_v61 = vpop.f32.mrf.mxu1  ;;  %v2670_v27 = vadd.f32 %v10182_v60, %v2600_v19  ;;  %8882 = vmatmul.mubr.msk.bf16.gmra.mxu0 %vm1542_vm2, %v4689_v22  ;;  %v4468_v47 = vadd.f32 %v10435_v37, %v4334_v5  ;;  %v2731_v28 = vmax.f32 %v2667_v20, 0.0  ;;  %v4469_v6 = vadd.f32 %v10435_v37, %v4335_v39 }
 0x2c7   : > { %v2668_v29 = vadd.f32 %v10182_v60, %v2598_v24  ;;  %v2779_v53 = vrot.slane %v2778_v21, 1  ;;  %v2793_v7 = vrot.slane %v10237_v17, 4  ;;  %v4467_v49 = vadd.f32 %v10435_v37, %v4333_v34 }
 0x2c8   : > { %v10366_v52 = vpop.f32.mrf.mxu0  ;;  %v10368_v23 = vpop.f32.mrf.mxu1  ;;  %v2734_v46 = vmax.f32 %v2670_v27, 0.0  ;;  %v2803_v48 = vmax.f32 %v10234_v25, %v2802_v9  ;;  %v4597_v42 = vmax.f32 %v4469_v6, 0.0  ;;  %v2603_v58 = vmul.f32 %v10344_v63, %v10172_v55 }
 0x2c9   : > { %v2732_v57 = vmax.f32 %v2668_v29, 0.0  ;;  %v2889_v1 = vsel %vm2771_vm3, %v2733_v44, -inf  ;;  %v4594_v4 = vmax.f32 %v4466_v62, 0.0  ;;  %v4595_v8 = vmax.f32 %v4467_v49, 0.0 }
 0x2ca   : > { %v10378_v32 = vpop.f32.mrf.mxu0  ;;  %v10380_v35 = vpop.f32.mrf.mxu1  ;;  %v2890_v5 = vsel %vm2771_vm3, %v2734_v46, -inf  ;;  %v4596_v10 = vmax.f32 %v4468_v47, 0.0  ;;  %v2880_v22 = vsel %vm2771_vm3, %v2731_v28, -inf  ;;  %v2794_v20 = vmax.f32 %v10237_v17, %v2793_v7 }
 0x2cb   : > { %v10461_v19 = vmax.f32 %v2889_v1, %v2890_v5  ;;  %v2881_v25 = vsel %vm2771_vm3, %v2732_v57, -inf  ;;  %v4690_v24 = vpack.c.bf16 %v4595_v8, %v4594_v4  ;;  %v2673_v44 = vadd.f32 %v10182_v60, %v2603_v58 }
 0x2cc   : > { %v10388_v31 = vpop.f32.mrf.mxu0  ;;  %v10390_v41 = vpop.f32.mrf.mxu1  ;;  %v10469_v39 = vmax.f32 %v2880_v22, %v2881_v25  ;;  %v2820_v62 = vrot.slane %v10260_v12, 4  ;;  %v4691_v27 = vpack.c.bf16 %v4597_v42, %v4596_v10  ;;  %v4338_v34 = vmul.f32 %v10406_v30, %v10346_v0 }
 0x2cd   : > { %v2601_v47 = vmul.f32 %v10172_v55, %v10355_v15  ;;  %v4336_v17 = vmul.f32 %v10406_v30, %v10357_v61  ;;  %v2604_v29 = vmul.f32 %v10366_v52, %v10172_v55  ;;  %8885 = vmatprep.mubr.msk.bf16.mxu0 %vm1542_vm2, %v4690_v24  ;;  %v10487_v7 = vmax.f32 %v10392_v43, %v2788_v16 }
 0x2ce   : > { %v10396_v50 = vpop.f32.mrf.mxu0  ;;  %v10398_v18 = vpop.f32.mrf.mxu1  ;;  %v10489_v46 = vmax.f32 %v2778_v21, %v2779_v53  ;;  %v2804_v0 = vrot.slane %v2803_v48, 2  ;;  %8886 = vmatmul.mubr.msk.bf16.gmra.mxu0 %vm1542_vm2, %v4691_v27  ;;  %v2795_v61 = vrot.slane %v2794_v20, 2  ;;  %v2737_v57 = vmax.f32 %v2673_v44, 0.0 }
 0x2cf   : > { %12454 = vst [vmem:[#allocation9_spill] sm:$0xff] %v10487_v7  ;;  %v2671_v15 = vadd.f32 %v10182_v60, %v2601_v47  ;;  %v2674_v52 = vadd.f32 %v10182_v60, %v2604_v29  ;;  %v4339_v58 = vmul.f32 %v10406_v30, %v10368_v23  ;;  %v2821_v43 = vmax.f32 %v10260_v12, %v2820_v62 }
 0x2d0   : > { %v10414_v11 = vpop.f32.mrf.mxu0  ;;  %v10416_v13 = vpop.f32.mrf.mxu1  ;;  %12455 = vst [vmem:[#allocation10_spill] sm:$0xff] %v10489_v46  ;;  %v2811_v16 = vrot.slane %v10263_v14, 4  ;;  %v4472_v21 = vadd.f32 %v10435_v37, %v4338_v34  ;;  %v2602_v53 = vmul.f32 %v10172_v55, %v10378_v32  ;;  %v4470_v5 = vadd.f32 %v10435_v37, %v4336_v17 }
 0x2d1   : > { %v2738_v8 = vmax.f32 %v2674_v52, 0.0  ;;  %v4473_v10 = vadd.f32 %v10435_v37, %v4339_v58  ;;  %v4337_v23 = vmul.f32 %v10406_v30, %v10380_v35  ;;  %v2805_v12 = vmax.f32 %v2803_v48, %v2804_v0 }
 0x2d2   : > { %v10428_v26 = vpop.f32.mrf.mxu0  ;;  %v10430_v38 = vpop.f32.mrf.mxu1  ;;  %v2735_v22 = vmax.f32 %v2671_v15, 0.0  ;;  %v2672_v25 = vadd.f32 %v10182_v60, %v2602_v53  ;;  %v2607_v24 = vmul.f32 %v10388_v31, %v10172_v55  ;;  %v10520_v62 = vmax.f32 %v2794_v20, %v2795_v61 }
 0x2d3   : > { %v2907_v27 = vsel %vm2771_vm3, %v2737_v57, -inf  ;;  %v2908_v34 = vsel %vm2771_vm3, %v2738_v8, -inf  ;;  %v4471_v47 = vadd.f32 %v10435_v37, %v4337_v23  ;;  %v2812_v35 = vmax.f32 %v10263_v14, %v2811_v16 }
 0x2d4   : > { %v10445_v56 = vpop.f32.mrf.mxu0  ;;  %v10447_v40 = vpop.f32.mrf.mxu1  ;;  %v10526_v48 = vmax.f32 %v2907_v27, %v2908_v34  ;;  %v4601_v17 = vmax.f32 %v4473_v10, 0.0  ;;  %v2736_v29 = vmax.f32 %v2672_v25, 0.0  ;;  %v2822_v15 = vrot.slane %v2821_v43, 2 }
 0x2d5   : > { %v4600_v52 = vmax.f32 %v4472_v21, 0.0  ;;  %v4598_v20 = vmax.f32 %v4470_v5, 0.0  ;;  %v4599_v61 = vmax.f32 %v4471_v47, 0.0  ;;  %v2898_v57 = vsel %vm2771_vm3, %v2735_v22, -inf }
 0x2d6   : > { %v10454_v36 = vpop.f32.mrf.mxu0  ;;  %v10456_v59 = vpop.f32.mrf.mxu1  ;;  %v2899_v58 = vsel %vm2771_vm3, %v2736_v29, -inf  ;;  %v2677_v53 = vadd.f32 %v10182_v60, %v2607_v24  ;;  %v4342_v14 = vmul.f32 %v10406_v30, %v10390_v41  ;;  %v2806_v10 = vrot.slane %v2805_v12, 1 }
 0x2d7   : > { %v2797_v23 = vrot.slane %v10520_v62, 1  ;;  %v10542_v25 = vmax.f32 %v2898_v57, %v2899_v58  ;;  %v4692_v21 = vpack.c.bf16 %v4599_v61, %v4598_v20  ;;  %v2813_v5 = vrot.slane %v2812_v35, 2 }
 0x2d8   : > { %v10464_v9 = vpop.f32.mrf.mxu0  ;;  %v10466_v63 = vpop.f32.mrf.mxu1  ;;  %v4693_v27 = vpack.c.bf16 %v4601_v17, %v4600_v52  ;;  %v2605_v22 = vmul.f32 %v10172_v55, %v10396_v50  ;;  %v4340_v24 = vmul.f32 %v10406_v30, %v10398_v18  ;;  %v2823_v47 = vmax.f32 %v2821_v43, %v2822_v15 }
 0x2d9   : > { %12456 = vst [vmem:[#allocation11_spill] sm:$0xff] %v10542_v25  ;;  %v2838_v29 = vrot.slane %v10289_v45, 4  ;;  %v2608_v57 = vmul.f32 %v10414_v11, %v10172_v55  ;;  %v4343_v20 = vmul.f32 %v10406_v30, %v10416_v13  ;;  %8889 = vmatprep.mubr.msk.bf16.mxu0 %vm1542_vm2, %v4692_v21  ;;  %v2741_v17 = vmax.f32 %v2677_v53, 0.0 }
 0x2da   : > { %v10477_v28 = vpop.f32.mrf.mxu0  ;;  %v10479_v6 = vpop.f32.mrf.mxu1  ;;  %v4476_v50 = vadd.f32 %v10435_v37, %v4342_v14  ;;  %v2675_v18 = vadd.f32 %v10182_v60, %v2605_v22  ;;  %v2606_v52 = vmul.f32 %v10172_v55, %v10428_v26  ;;  %8890 = vmatmul.mubr.msk.bf16.gmra.mxu0 %vm1542_vm2, %v4693_v27  ;;  %v4474_v11 = vadd.f32 %v10435_v37, %v4340_v24 }
 0x2db   : > { %v2678_v13 = vadd.f32 %v10182_v60, %v2608_v57  ;;  %v4477_v61 = vadd.f32 %v10435_v37, %v4343_v20  ;;  %v4341_v58 = vmul.f32 %v10406_v30, %v10430_v38  ;;  %v10572_v53 = vmax.f32 %v2805_v12, %v2806_v10 }
 0x2dc   : > { %v10493_v49 = vpop.f32.mrf.mxu0  ;;  %v10495_v42 = vpop.f32.mrf.mxu1  ;;  %v10574_v14 = vmax.f32 %v2812_v35, %v2813_v5  ;;  %v2739_v26 = vmax.f32 %v2675_v18, 0.0  ;;  %v2676_v21 = vadd.f32 %v10182_v60, %v2606_v52  ;;  %v2824_v7 = vrot.slane %v2823_v47, 1 }
 0x2dd   : > { %12457 = vst [vmem:[#allocation12_spill] sm:$0xff] %v10572_v53  ;;  %v10582_v24 = vmax.f32 %v10289_v45, %v2838_v29  ;;  %v2742_v57 = vmax.f32 %v2678_v13, 0.0  ;;  %v4475_v20 = vadd.f32 %v10435_v37, %v4341_v58  ;;  %v2925_v38 = vsel %vm2771_vm3, %v2741_v17, -inf }
 0x2de   : > { %v10505_v1 = vpop.f32.mrf.mxu0  ;;  %v10507_v4 = vpop.f32.mrf.mxu1  ;;  %v4605_v12 = vmax.f32 %v4477_v61, 0.0  ;;  %v2740_v10 = vmax.f32 %v2676_v21, 0.0  ;;  %v2611_v35 = vmul.f32 %v10445_v56, %v10172_v55  ;;  %v4604_v52 = vmax.f32 %v4476_v50, 0.0 }
 0x2df   : > { %v4602_v53 = vmax.f32 %v4474_v11, 0.0  ;;  %v2926_v46 = vsel %vm2771_vm3, %v2742_v57, -inf  ;;  %v4603_v45 = vmax.f32 %v4475_v20, 0.0  ;;  %v2916_v29 = vsel %vm2771_vm3, %v2739_v26, -inf }
 0x2e0   : > { %v10516_v32 = vpop.f32.mrf.mxu0  ;;  %v10518_v44 = vpop.f32.mrf.mxu1  ;;  %v10594_v13 = vmax.f32 %v2925_v38, %v2926_v46  ;;  %v2917_v17 = vsel %vm2771_vm3, %v2740_v10, -inf  ;;  %v2681_v61 = vadd.f32 %v10182_v60, %v2611_v35  ;;  %v2609_v50 = vmul.f32 %v10172_v55, %v10454_v36 }
 0x2e1   : > { %v10602_v21 = vmax.f32 %v2916_v29, %v2917_v17  ;;  %v4694_v25 = vpack.c.bf16 %v4603_v45, %v4602_v53  ;;  %v4344_v11 = vmul.f32 %v10406_v30, %v10456_v59  ;;  %v10609_v46 = vmax.f32 %v10520_v62, %v2797_v23 }
 0x2e2   : > { %v10528_v0 = vpop.f32.mrf.mxu0  ;;  %v10530_v31 = vpop.f32.mrf.mxu1  ;;  %v2815_v26 = vrot.slane %v10574_v14, 1  ;;  %v4695_v57 = vpack.c.bf16 %v4605_v12, %v4604_v52  ;;  %v2612_v20 = vmul.f32 %v10464_v9, %v10172_v55  ;;  %v2856_v53 = vrot.slane %v10338_v54, 4 }
 0x2e3   : > { %12458 = vst [vmem:[#allocation13_spill] sm:$0xff] %v10602_v21  ;;  %12459 = vst [vmem:[#allocation14_spill] sm:$0xff] %v10609_v46  ;;  %v4346_v36 = vmul.f32 %v10406_v30, %v10447_v40  ;;  %v2679_v59 = vadd.f32 %v10182_v60, %v2609_v50  ;;  %v4347_v62 = vmul.f32 %v10406_v30, %v10466_v63  ;;  %8893 = vmatprep.mubr.msk.bf16.mxu0 %vm1542_vm2, %v4694_v25 }
 0x2e4   : > { %v10537_v16 = vpop.f32.mrf.mxu0  ;;  %v10539_v8 = vpop.f32.mrf.mxu1  ;;  %v10625_v23 = vmax.f32 %v2823_v47, %v2824_v7  ;;  %v2745_v12 = vmax.f32 %v2681_v61, 0.0  ;;  %v2682_v9 = vadd.f32 %v10182_v60, %v2612_v20  ;;  %v2610_v35 = vmul.f32 %v10172_v55, %v10477_v28  ;;  %8894 = vmatmul.mubr.msk.bf16.gmra.mxu0 %vm1542_vm2, %v4695_v57 }
 0x2e5   : > { %v2840_v45 = vrot.slane %v10582_v24, 2  ;;  %v2829_v63 = vrot.slane %v10296_v3, 4  ;;  %v4478_v25 = vadd.f32 %v10435_v37, %v4344_v11  ;;  %v4481_v7 = vadd.f32 %v10435_v37, %v4347_v62 }
 0x2e6   : > { %v10548_v34 = vpop.f32.mrf.mxu0  ;;  %v10550_v41 = vpop.f32.mrf.mxu1  ;;  %12460 = vst [vmem:[#allocation15_spill] sm:$0xff] %v10625_v23  ;;  %v2743_v47 = vmax.f32 %v2679_v59, 0.0  ;;  %v2746_v29 = vmax.f32 %v2682_v9, 0.0  ;;  %v2680_v17 = vadd.f32 %v10182_v60, %v2610_v35  ;;  %v4345_v28 = vmul.f32 %v10406_v30, %v10479_v6 }
 0x2e7   : > { %v2857_v57 = vmax.f32 %v10338_v54, %v2856_v53  ;;  %v2847_v20 = vrot.slane %v10349_v2, 4  ;;  %v4480_v23 = vadd.f32 %v10435_v37, %v4346_v36  ;;  %v2615_v11 = vmul.f32 %v10493_v49, %v10172_v55 }
 0x2e8   : > { %v10563_v43 = vpop.f32.mrf.mxu0  ;;  %v10565_v15 = vpop.f32.mrf.mxu1  ;;  %v2943_v59 = vsel %vm2771_vm3, %v2745_v12, -inf  ;;  %v2944_v62 = vsel %vm2771_vm3, %v2746_v29, -inf  ;;  %v2744_v9 = vmax.f32 %v2680_v17, 0.0  ;;  %v4479_v6 = vadd.f32 %v10435_v37, %v4345_v28 }
 0x2e9   : > { %v10659_v54 = vmax.f32 %v10296_v3, %v2829_v63  ;;  %v2874_v53 = vrot.slane %v10383_v33, 4  ;;  %v10662_v36 = vmax.f32 %v2943_v59, %v2944_v62  ;;  %v2934_v55 = vsel %vm2771_vm3, %v2743_v47, -inf }
 0x2ea   : > { %v10577_v27 = vpop.f32.mrf.mxu0  ;;  %v10579_v22 = vpop.f32.mrf.mxu1  ;;  %v4606_v49 = vmax.f32 %v4478_v25, 0.0  ;;  %v2935_v12 = vsel %vm2771_vm3, %v2744_v9, -inf  ;;  %v4607_v29 = vmax.f32 %v4479_v6, 0.0  ;;  %v2685_v3 = vadd.f32 %v10182_v60, %v2615_v11  ;;  %v10680_v25 = vld [vmem:[%s12405_s9] ss:$0 sm:$0xff] }
 0x2eb   : > { %v10670_v21 = vmax.f32 %v2934_v55, %v2935_v12  ;;  %v10674_v63 = vmax.f32 %v10574_v14, %v2815_v26  ;;  %v2613_v59 = vmul.f32 %v10680_v25, %v10505_v1  ;;  %v10689_v60 = vmax.f32 %v10582_v24, %v2840_v45  ;;  %v10698_v11 = vld [vmem:[%s12406_s10] ss:$0 sm:$0xff] }
 0x2ec   : > { %v10588_v5 = vpop.f32.mrf.mxu0  ;;  %v10590_v18 = vpop.f32.mrf.mxu1  ;;  %v4696_v47 = vpack.c.bf16 %v4607_v29, %v4606_v49  ;;  %v4348_v9 = vmul.f32 %v10406_v30, %v10507_v4  ;;  %v2616_v24 = vmul.f32 %v10680_v25, %v10516_v32  ;;  %v2749_v45 = vmax.f32 %v2685_v3, 0.0 }
 0x2ed   : > { %12464 = vst [vmem:[#allocation19_spill] sm:$0xff] %v10674_v63  ;;  %12466 = vst [vmem:[#allocation21_spill] sm:$0xff] %v10689_v60  ;;  %v2683_v1 = vadd.f32 %v10698_v11, %v2613_v59  ;;  %v2614_v6 = vmul.f32 %v10680_v25, %v10528_v0  ;;  %v4349_v55 = vmul.f32 %v10406_v30, %v10530_v31 }
 0x2ee   : > { %v10598_v58 = vpop.f32.mrf.mxu0  ;;  %v10600_v56 = vpop.f32.mrf.mxu1  ;;  %8897 = vmatprep.mubr.msk.bf16.mxu0 %vm1542_vm2, %v4696_v47  ;;  %v4482_v32 = vadd.f32 %v10435_v37, %v4348_v9  ;;  %v2892_v9 = vrot.slane %v10461_v19, 4 }
 0x2ef   : > { %v2684_v12 = vadd.f32 %v10698_v11, %v2614_v6  ;;  %v2747_v3 = vmax.f32 %v2683_v1, 0.0  ;;  %v4483_v59 = vadd.f32 %v10435_v37, %v4349_v55  ;;  %v2619_v1 = vmul.f32 %v10680_v25, %v10537_v16 }
 0x2f0   : > { %v10614_v38 = vpop.f32.mrf.mxu0  ;;  %v10616_v10 = vpop.f32.mrf.mxu1 }
 0x2f1   : > { %v2748_v63 = vmax.f32 %v2684_v12, 0.0  ;;  %v4611_v60 = vmax.f32 %v4483_v59, 0.0  ;;  %v2689_v12 = vadd.f32 %v10698_v11, %v2619_v1  ;;  %v2883_v59 = vrot.slane %v10469_v39, 4 }
 0x2f2   : > { %v10631_v52 = vpop.f32.mrf.mxu0  ;;  %v10633_v40 = vpop.f32.mrf.mxu1 }
 0x2f4   : > { %v10642_v61 = vpop.f32.mrf.mxu0  ;;  %v10644_v50 = vpop.f32.mrf.mxu1 }
 0x2f5   : > { %12461 = vst [vmem:[#allocation16_spill] sm:$0xff] %v10644_v50  ;;  %v4609_v50 = vmax.f32 %v4481_v7, 0.0  ;;  %v2848_v7 = vmax.f32 %v10349_v2, %v2847_v20  ;;  %v4350_v2 = vmul.f32 %v10406_v30, %v10495_v42  ;;  %v2875_v20 = vmax.f32 %v10383_v33, %v2874_v53 }
 0x2f6   : > { %v10654_v35 = vpop.f32.mrf.mxu0  ;;  %v10656_v46 = vpop.f32.mrf.mxu1  ;;  %v2686_v53 = vadd.f32 %v10698_v11, %v2616_v24  ;;  %v2961_v24 = vsel %vm2771_vm3, %v2749_v45, -inf  ;;  %v2952_v45 = vsel %vm2771_vm3, %v2747_v3, -inf }
 0x2f7   : > { %12462 = vst [vmem:[#allocation17_spill] sm:$0xff] %v10654_v35  ;;  %12463 = vst [vmem:[#allocation18_spill] sm:$0xff] %v10656_v46  ;;  %v2858_v35 = vrot.slane %v2857_v57, 2  ;;  %v4608_v46 = vmax.f32 %v4480_v23, 0.0  ;;  %v2849_v4 = vrot.slane %v2848_v7, 2  ;;  %v2876_v29 = vrot.slane %v2875_v20, 2 }
 0x2f8   : > { %v10666_v17 = vpop.f32.mrf.mxu0  ;;  %v10668_v28 = vpop.f32.mrf.mxu1  ;;  %v2750_v47 = vmax.f32 %v2686_v53, 0.0 }
 0x2f9   : > { %v4697_v26 = vpack.c.bf16 %v4609_v50, %v4608_v46  ;;  %v10710_v33 = vmax.f32 %v2857_v57, %v2858_v35  ;;  %v4351_v50 = vmul.f32 %v10406_v30, %v10518_v44  ;;  %v2865_v35 = vrot.slane %v10400_v51, 4 }
 0x2fa   : > { %v10684_v62 = vpop.f32.mrf.mxu0  ;;  %v10686_v23 = vpop.f32.mrf.mxu1  ;;  %v4484_v44 = vadd.f32 %v10435_v37, %v4350_v2  ;;  %v4610_v2 = vmax.f32 %v4482_v32, 0.0  ;;  %v10743_v55 = vmax.f32 %v2848_v7, %v2849_v4  ;;  %v2953_v32 = vsel %vm2771_vm3, %v2748_v63, -inf }
 0x2fb   : > { %12465 = vst [vmem:[#allocation20_spill] sm:$0xff] %v10684_v62  ;;  %8898 = vmatmul.mubr.msk.bf16.gmra.mxu0 %vm1542_vm2, %v4697_v26  ;;  %v4485_v0 = vadd.f32 %v10435_v37, %v4351_v50  ;;  %v2962_v50 = vsel %vm2771_vm3, %v2750_v47, -inf  ;;  %v10756_v4 = vmax.f32 %v2952_v45, %v2953_v32  ;;  %v4352_v63 = vmul.f32 %v10406_v30, %v10550_v41 }
 0x2fc   : > { %v10706_v46 = vpop.f32.mrf.mxu0  ;;  %v10708_v42 = vpop.f32.mrf.mxu1  ;;  %v4612_v62 = vmax.f32 %v4484_v44, 0.0  ;;  %v2893_v44 = vmax.f32 %v10461_v19, %v2892_v9  ;;  %v4355_v19 = vmul.f32 %v10406_v30, %v10565_v15  ;;  %v2860_v41 = vrot.slane %v10710_v33, 1 }
 0x2fd   : > { %v4613_v14 = vmax.f32 %v4485_v0, 0.0  ;;  %v4698_v0 = vpack.c.bf16 %v4611_v60, %v4610_v2  ;;  %v2620_v60 = vmul.f32 %v10680_v25, %v10563_v43  ;;  %v2851_v43 = vrot.slane %v10743_v55, 1 }
 0x2fe   : > { %v10721_v49 = vpop.f32.mrf.mxu0  ;;  %v10723_v57 = vpop.f32.mrf.mxu1  ;;  %v2618_v9 = vmul.f32 %v10680_v25, %v10577_v27  ;;  %v4486_v15 = vadd.f32 %v10435_v37, %v4352_v63  ;;  %v4489_v1 = vadd.f32 %v10435_v37, %v4355_v19 }
 0x2ff   : > { %12467 = vst [vmem:[#allocation22_spill] sm:$0xff] %v10721_v49  ;;  %v2866_v49 = vmax.f32 %v10400_v51, %v2865_v35  ;;  %v4699_v7 = vpack.c.bf16 %v4613_v14, %v4612_v62  ;;  %v2617_v51 = vmul.f32 %v10680_v25, %v10548_v34  ;;  %v10760_v35 = vmax.f32 %v2875_v20, %v2876_v29 }
 0x300   : > { %v10730_v26 = vpop.f32.mrf.mxu0  ;;  %v10732_v31 = vpop.f32.mrf.mxu1  ;;  %8901 = vmatprep.mubr.msk.bf16.mxu0 %vm1542_vm2, %v4698_v0  ;;  %v2753_v14 = vmax.f32 %v2689_v12, 0.0  ;;  %v4354_v34 = vmul.f32 %v10406_v30, %v10539_v8  ;;  %v2690_v29 = vadd.f32 %v10698_v11, %v2620_v60  ;;  %v2688_v0 = vadd.f32 %v10698_v11, %v2618_v9 }
 0x301   : > { %12468 = vst [vmem:[#allocation23_spill] sm:$0xff] %v10732_v31  ;;  %v10746_v31 = vmax.f32 %v2961_v24, %v2962_v50  ;;  %v2687_v20 = vadd.f32 %v10698_v11, %v2617_v51  ;;  %v2867_v8 = vrot.slane %v2866_v49, 2  ;;  %v2884_v50 = vmax.f32 %v10469_v39, %v2883_v59 }
 0x302   : > { %v10739_v6 = vpop.f32.mrf.mxu0  ;;  %v10741_v53 = vpop.f32.mrf.mxu1  ;;  %v2754_v32 = vmax.f32 %v2690_v29, 0.0  ;;  %v4353_v12 = vmul.f32 %v10406_v30, %v10579_v22  ;;  %v2878_v51 = vrot.slane %v10760_v35, 1  ;;  %v2894_v60 = vrot.slane %v2893_v44, 2 }
 0x303   : > { %12469 = vst [vmem:[#allocation24_spill] sm:$0xff] %v10739_v6  ;;  %8902 = vmatmul.mubr.msk.bf16.gmra.mxu0 %vm1542_vm2, %v4699_v7  ;;  %v2751_v45 = vmax.f32 %v2687_v20, 0.0  ;;  %v2979_v39 = vsel %vm2771_vm3, %v2753_v14, -inf  ;;  %v4488_v59 = vadd.f32 %v10435_v37, %v4354_v34  ;;  %v2752_v20 = vmax.f32 %v2688_v0, 0.0 }
 0x304   : > { %v10751_v47 = vpop.f32.mrf.mxu0  ;;  %v10753_v16 = vpop.f32.mrf.mxu1  ;;  %v2980_v63 = vsel %vm2771_vm3, %v2754_v32, -inf  ;;  %v4487_v19 = vadd.f32 %v10435_v37, %v4353_v12  ;;  %v2623_v29 = vmul.f32 %v10680_v25, %v10588_v5  ;;  %v4617_v14 = vmax.f32 %v4489_v1, 0.0 }
 0x305   : > { %v10810_v6 = vmax.f32 %v2979_v39, %v2980_v63  ;;  %v2970_v34 = vsel %vm2771_vm3, %v2751_v45, -inf  ;;  %v2971_v32 = vsel %vm2771_vm3, %v2752_v20, -inf  ;;  %v10818_v5 = vmax.f32 %v2893_v44, %v2894_v60 }
 0x306   : > { %v10768_v3 = vpop.f32.mrf.mxu0  ;;  %v10770_v62 = vpop.f32.mrf.mxu1  ;;  %v4615_v0 = vmax.f32 %v4487_v19, 0.0  ;;  %v2621_v39 = vmul.f32 %v10680_v25, %v10598_v58  ;;  %v4358_v20 = vmul.f32 %v10406_v30, %v10590_v18  ;;  %v10842_v19 = vmax.f32 %v10743_v55, %v2851_v43 }
 0x307   : > { %12470 = vst [vmem:[#allocation25_spill] sm:$0xff] %v10768_v3  ;;  %v2885_v3 = vrot.slane %v2884_v50, 2 }
 0x308   : > { %v10783_v24 = vpop.f32.mrf.mxu0  ;;  %v10785_v2 = vpop.f32.mrf.mxu1  ;;  %12479 = vst [vmem:[#allocation33_spill] sm:$0xff] %v10842_v19  ;;  %v2691_v58 = vadd.f32 %v10698_v11, %v2621_v39 }
 0x309   : > { %12471 = vst [vmem:[#allocation26_spill] sm:$0xff] %v10785_v2  ;;  %v2886_v60 = vmax.f32 %v2884_v50, %v2885_v3 }
 0x30a   : > { %v10793_v7 = vpop.f32.mrf.mxu0  ;;  %v10795_v27 = vpop.f32.mrf.mxu1 }
 0x30b   : > { %12472 = vst [vmem:[#allocation27_spill] sm:$0xff] %v10793_v7  ;;  %12473 = vst [vmem:[#allocation28_spill] sm:$0xff] %v10795_v27  ;;  %v10808_v7 = vmax.f32 %v2866_v49, %v2867_v8  ;;  %v4614_v27 = vmax.f32 %v4486_v15, 0.0  ;;  %v2693_v49 = vadd.f32 %v10698_v11, %v2623_v29  ;;  %v12476_v8 = vrot.slane %v10659_v54, 2 }
 0x30c   : > { %v10804_v22 = vpop.f32.mrf.mxu1  ;;  %v10806_v9 = vpop.f32.mrf.mxu0  ;;  %v10829_v15 = vmax.f32 %v10710_v33, %v2860_v41  ;;  %v10845_v33 = vmax.f32 %v10760_v35, %v2878_v51  ;;  %v2624_v41 = vmul.f32 %v10680_v25, %v10614_v38  ;;  %v4359_v35 = vmul.f32 %v10406_v30, %v10616_v10 }
 0x30d   : > { %12474 = vst [vmem:[#allocation29_spill] sm:$0xff] %v10804_v22  ;;  %12475 = vst [vmem:[#allocation30_spill] sm:$0xff] %v10806_v9  ;;  %v4616_v22 = vmax.f32 %v4488_v59, 0.0  ;;  %v10820_v9 = vmax.f32 %v2970_v34, %v2971_v32  ;;  %v10826_v1 = vmax.f32 %v10659_v54, %v12476_v8  ;;  %v4700_v45 = vpack.c.bf16 %v4615_v0, %v4614_v27 }
 0x30e   : > { %v10814_v12 = vpop.f32.mrf.mxu1  ;;  %v10816_v2 = vpop.f32.mrf.mxu0  ;;  %12478 = vst [vmem:[#allocation32_spill] sm:$0xff] %v10829_v15  ;;  %v4356_v54 = vmul.f32 %v10406_v30, %v10600_v56  ;;  %12480 = vst [vmem:[#allocation34_spill] sm:$0xff] %v10845_v33  ;;  %v2869_v18 = vrot.slane %v10808_v7, 1  ;;  %v2896_v56 = vrot.slane %v10818_v5, 1  ;;  %v2757_v55 = vmax.f32 %v2693_v49, 0.0  ;;  %v12485_v15 = vld [vmem:[#allocation13_spill] sm:$0xff] }
 0x30f   : > { %12477 = vst [vmem:[#allocation31_spill] sm:$0xff] %v10826_v1  ;;  %v4701_v59 = vpack.c.bf16 %v4617_v14, %v4616_v22  ;;  %8905 = vmatprep.mubr.msk.bf16.mxu0 %vm1542_vm2, %v4700_v45  ;;  %v2694_v38 = vadd.f32 %v10698_v11, %v2624_v41  ;;  %v2622_v27 = vmul.f32 %v10680_v25, %v10631_v52  ;;  %v2887_v14 = vrot.slane %v2886_v60, 1 }
 0x310   : > { %v10833_v63 = vpop.f32.mrf.mxu1  ;;  %v10835_v44 = vpop.f32.mrf.mxu0  ;;  %v4490_v43 = vadd.f32 %v10435_v37, %v4356_v54  ;;  %v4357_v51 = vmul.f32 %v10406_v30, %v10633_v40  ;;  %v2910_v34 = vrot.slane %v10526_v48, 4  ;;  %v4492_v10 = vadd.f32 %v10435_v37, %v4358_v20 }
 0x311   : > { %8906 = vmatmul.mubr.msk.bf16.gmra.mxu0 %vm1542_vm2, %v4701_v59  ;;  %v4493_v32 = vadd.f32 %v10435_v37, %v4359_v35  ;;  %v2755_v0 = vmax.f32 %v2691_v58, 0.0  ;;  %v2758_v49 = vmax.f32 %v2694_v38, 0.0  ;;  %v2692_v8 = vadd.f32 %v10698_v11, %v2622_v27 }
 0x312   : > { %v10851_v3 = vpop.f32.mrf.mxu1  ;;  %v10853_v50 = vpop.f32.mrf.mxu0  ;;  %v4491_v52 = vadd.f32 %v10435_v37, %v4357_v51  ;;  %v2928_v40 = vrot.slane %v10594_v13, 4  ;;  %v2997_v39 = vsel %vm2771_vm3, %v2757_v55, -inf  ;;  %v2627_v54 = vmul.f32 %v10680_v25, %v10642_v61  ;;  %v12484_v51 = vld [vmem:[#allocation11_spill] sm:$0xff] }
 0x313   : > { %v4621_v59 = vmax.f32 %v4493_v32, 0.0  ;;  %v4618_v41 = vmax.f32 %v4490_v43, 0.0  ;;  %v2998_v20 = vsel %vm2771_vm3, %v2758_v49, -inf  ;;  %v2756_v35 = vmax.f32 %v2692_v8, 0.0 }
 0x314   : > { %v10866_v29 = vpop.f32.mrf.mxu1  ;;  %v10868_v22 = vpop.f32.mrf.mxu0  ;;  %v4619_v58 = vmax.f32 %v4491_v52, 0.0  ;;  %v2901_v33 = vrot.slane %v12484_v51, 4  ;;  %v2919_v19 = vrot.slane %v12485_v15, 4  ;;  %v4620_v1 = vmax.f32 %v4492_v10, 0.0 }
 0x315   : > { %12481 = vst [vmem:[#allocation35_spill] sm:$0xff] %v10868_v22  ;;  %v2988_v55 = vsel %vm2771_vm3, %v2755_v0, -inf  ;;  %v2989_v61 = vsel %vm2771_vm3, %v2756_v35, -inf  ;;  %v2697_v32 = vadd.f32 %v10698_v11, %v2627_v54  ;;  %v10896_v8 = vmax.f32 %v10808_v7, %v2869_v18 }
 0x316   : > { %v10875_v45 = vpop.f32.mrf.mxu0  ;;  %v10882_v38 = vpop.f32.mrf.mxu1  ;;  %v4702_v43 = vpack.c.bf16 %v4619_v58, %v4618_v41  ;;  %v2911_v52 = vmax.f32 %v10526_v48, %v2910_v34  ;;  %v10899_v22 = vmax.f32 %v2988_v55, %v2989_v61  ;;  %v2929_v10 = vmax.f32 %v10594_v13, %v2928_v40  ;;  %v12490_v34 = vld [vmem:[#allocation16_spill] sm:$0xff] }
 0x317   : > { %12482 = vst [vmem:[#allocation36_spill] sm:$0xff] %v10875_v45  ;;  %v10888_v45 = vmax.f32 %v2997_v39, %v2998_v20  ;;  %12486 = vst [vmem:[#allocation11_spill] sm:$0xff] %v10896_v8  ;;  %v12487_v39 = vld [vmem:[#allocation18_spill] sm:$0xff]  ;;  %v2628_v41 = vmul.f32 %v10680_v25, %v10666_v17  ;;  %v4363_v54 = vmul.f32 %v10406_v30, %v10668_v28  ;;  %v2946_v28 = vrot.slane %v10662_v36, 4 }
 0x318   : > { %v10884_v27 = vpop.f32.mrf.mxu0  ;;  %v4360_v0 = vmul.f32 %v10406_v30, %v12487_v39  ;;  %8909 = vmatprep.mubr.msk.bf16.mxu0 %vm1542_vm2, %v4702_v43  ;;  %v10909_v7 = vpop.f32.mrf.mxu1  ;;  %v10914_v48 = vmax.f32 %v10818_v5, %v2896_v56  ;;  %v2920_v13 = vmax.f32 %v12485_v15, %v2919_v19  ;;  %v4362_v40 = vmul.f32 %v10406_v30, %v12490_v34 }
 0x319   : > { %12483 = vst [vmem:[#allocation37_spill] sm:$0xff] %v10884_v27  ;;  %v4703_v27 = vpack.c.bf16 %v4621_v59, %v4620_v1  ;;  %v10916_v1 = vmax.f32 %v2886_v60, %v2887_v14  ;;  %v2902_v17 = vmax.f32 %v12484_v51, %v2901_v33  ;;  %v2761_v59 = vmax.f32 %v2697_v32, 0.0 }
 0x31a   : > { %v10893_v49 = vpop.f32.mrf.mxu0  ;;  %12488 = vst [vmem:[#allocation13_spill] sm:$0xff] %v10914_v48  ;;  %v2698_v20 = vadd.f32 %v10698_v11, %v2628_v41  ;;  %v2937_v5 = vrot.slane %v10670_v21, 4  ;;  %v2964_v60 = vrot.slane %v10746_v31, 4  ;;  %v4497_v15 = vadd.f32 %v10435_v37, %v4363_v54 }
 0x31b   : > { %12489 = vst [vmem:[#allocation18_spill] sm:$0xff] %v10916_v1  ;;  %8910 = vmatmul.mubr.msk.bf16.gmra.mxu0 %vm1542_vm2, %v4703_v27  ;;  %v4361_v19 = vmul.f32 %v10406_v30, %v10686_v23  ;;  %v2912_v56 = vrot.slane %v2911_v52, 2  ;;  %v2930_v14 = vrot.slane %v2929_v10, 2  ;;  %v4494_v33 = vadd.f32 %v10435_v37, %v4360_v0  ;;  %v10933_v27 = vpop.f32.mrf.mxu1 }
 0x31c   : > { %v10911_v18 = vpop.f32.mrf.mxu0  ;;  %v2762_v58 = vmax.f32 %v2698_v20, 0.0  ;;  %v2921_v55 = vrot.slane %v2920_v13, 2  ;;  %v4496_v61 = vadd.f32 %v10435_v37, %v4362_v40  ;;  %v2631_v32 = vmul.f32 %v10680_v25, %v10706_v46 }
 0x31d   : > { %v4495_v43 = vadd.f32 %v10435_v37, %v4361_v19  ;;  %v2903_v39 = vrot.slane %v2902_v17, 2  ;;  %v2947_v23 = vmax.f32 %v10662_v36, %v2946_v28  ;;  %v3015_v41 = vsel %vm2771_vm3, %v2761_v59, -inf }
 0x31e   : > { %v10925_v35 = vpop.f32.mrf.mxu0  ;;  %v3016_v0 = vsel %vm2771_vm3, %v2762_v58, -inf  ;;  %v2938_v34 = vmax.f32 %v10670_v21, %v2937_v5  ;;  %v2965_v20 = vmax.f32 %v10746_v31, %v2964_v60  ;;  %v4625_v40 = vmax.f32 %v4497_v15, 0.0 }
 0x31f   : > { %v10948_v48 = vmax.f32 %v3015_v41, %v3016_v0  ;;  %v2931_v19 = vmax.f32 %v2929_v10, %v2930_v14  ;;  %v2955_v1 = vrot.slane %v10756_v4, 4  ;;  %v4622_v46 = vmax.f32 %v4494_v33, 0.0 }
 0x320   : > { %v10935_v51 = vpop.f32.mrf.mxu0  ;;  %v4623_v8 = vmax.f32 %v4495_v43, 0.0  ;;  %v10955_v28 = vmax.f32 %v2911_v52, %v2912_v56  ;;  %v2922_v59 = vmax.f32 %v2920_v13, %v2921_v55  ;;  %v4624_v58 = vmax.f32 %v4496_v61, 0.0 }
 0x321   : > { %12491 = vst [vmem:[#allocation16_spill] sm:$0xff] %v10935_v51  ;;  %v10951_v51 = vpop.f32.mrf.mxu1  ;;  %v2701_v21 = vadd.f32 %v10698_v11, %v2631_v32  ;;  %v2948_v5 = vrot.slane %v2947_v23, 2  ;;  %v4366_v60 = vmul.f32 %v10406_v30, %v10708_v42  ;;  %v4364_v10 = vmul.f32 %v10406_v30, %v10723_v57 }
 0x322   : > { %v10944_v54 = vpop.f32.mrf.mxu0  ;;  %12492 = vst [vmem:[#allocation38_spill] sm:$0xff] %v10955_v28  ;;  %v4704_v31 = vpack.c.bf16 %v4623_v8, %v4622_v46  ;;  %v2939_v14 = vrot.slane %v2938_v34, 2  ;;  %v2966_v33 = vrot.slane %v2965_v20, 2  ;;  %v4705_v43 = vpack.c.bf16 %v4625_v40, %v4624_v58  ;;  %v12494_v8 = vld [vmem:[#allocation23_spill] sm:$0xff] }
 0x323   : > { %v2632_v52 = vmul.f32 %v10680_v25, %v10730_v26  ;;  %v10966_v13 = vmax.f32 %v2902_v17, %v2903_v39  ;;  %v2932_v56 = vrot.slane %v2931_v19, 1  ;;  %v2956_v55 = vmax.f32 %v10756_v4, %v2955_v1  ;;  %v10972_v42 = vpop.f32.mrf.mxu1 }
 0x324   : > { %v10953_v36 = vpop.f32.mrf.mxu0  ;;  %v4367_v61 = vmul.f32 %v10406_v30, %v12494_v8  ;;  %8913 = vmatprep.mubr.msk.bf16.mxu0 %vm1542_vm2, %v4704_v31  ;;  %v2765_v32 = vmax.f32 %v2701_v21, 0.0  ;;  %v4498_v41 = vadd.f32 %v10435_v37, %v4364_v10  ;;  %v4365_v26 = vmul.f32 %v10406_v30, %v10741_v53 }
 0x325   : > { %12493 = vst [vmem:[#allocation39_spill] sm:$0xff] %v10966_v13  ;;  %v2702_v0 = vadd.f32 %v10698_v11, %v2632_v52  ;;  %8914 = vmatmul.mubr.msk.bf16.gmra.mxu0 %vm1542_vm2, %v4705_v43  ;;  %v2923_v4 = vrot.slane %v2922_v59, 1  ;;  %v2949_v1 = vmax.f32 %v2947_v23, %v2948_v5  ;;  %v4500_v17 = vadd.f32 %v10435_v37, %v4366_v60  ;;  %v12495_v52 = vld [vmem:[#allocation20_spill] sm:$0xff]  ;;  %v10990_v23 = vpop.f32.mrf.mxu1 }
 0x326   : > { %v10962_v15 = vpop.f32.mrf.mxu0  ;;  %v4501_v39 = vadd.f32 %v10435_v37, %v4367_v61  ;;  %v2940_v46 = vmax.f32 %v2938_v34, %v2939_v14  ;;  %v2967_v58 = vmax.f32 %v2965_v20, %v2966_v33  ;;  %v4499_v31 = vadd.f32 %v10435_v37, %v4365_v26  ;;  %v12498_v33 = vld [vmem:[#allocation17_spill] sm:$0xff] }
 0x327   : > { %v2766_v21 = vmax.f32 %v2702_v0, 0.0  ;;  %v2957_v10 = vrot.slane %v2956_v55, 2  ;;  %v2626_v8 = vmul.f32 %v10680_v25, %v12495_v52  ;;  %v2635_v43 = vmul.f32 %v10680_v25, %v10751_v47 }
 0x328   : > { %v10974_v57 = vpop.f32.mrf.mxu0  ;;  %v4629_v53 = vmax.f32 %v4501_v39, 0.0  ;;  %v3033_v60 = vsel %vm2771_vm3, %v2765_v32, -inf  ;;  %v4626_v61 = vmax.f32 %v4498_v41, 0.0  ;;  %v4627_v20 = vmax.f32 %v4499_v31, 0.0 }
 0x329   : > { %v3034_v34 = vsel %vm2771_vm3, %v2766_v21, -inf  ;;  %v10996_v14 = vmax.f32 %v2931_v19, %v2932_v56  ;;  %v2625_v0 = vmul.f32 %v10680_v25, %v12498_v33  ;;  %v4628_v26 = vmax.f32 %v4500_v17, 0.0  ;;  %v11008_v56 = vpop.f32.mrf.mxu1 }
 0x32a   : > { %v10983_v40 = vpop.f32.mrf.mxu0  ;;  %v11000_v39 = vmax.f32 %v3033_v60, %v3034_v34  ;;  %v11004_v47 = vmax.f32 %v2922_v59, %v2923_v4  ;;  %v2950_v28 = vrot.slane %v2949_v1, 1  ;;  %v4706_v13 = vpack.c.bf16 %v4627_v20, %v4626_v61 }
 0x32b   : > { %12497 = vst [vmem:[#allocation20_spill] sm:$0xff] %v10996_v14  ;;  %v2705_v32 = vadd.f32 %v10698_v11, %v2635_v43  ;;  %v2941_v41 = vrot.slane %v2940_v46, 1  ;;  %v2982_v21 = vrot.slane %v10810_v6, 4  ;;  %v4707_v19 = vpack.c.bf16 %v4629_v53, %v4628_v26  ;;  %v12500_v43 = vld [vmem:[#allocation26_spill] sm:$0xff] }
 0x32c   : > { %v10992_v5 = vpop.f32.mrf.mxu0  ;;  %12499 = vst [vmem:[#allocation17_spill] sm:$0xff] %v11004_v47  ;;  %v2968_v17 = vrot.slane %v2967_v58, 1  ;;  %v2696_v60 = vadd.f32 %v10698_v11, %v2626_v8  ;;  %v4368_v59 = vmul.f32 %v10406_v30, %v10770_v62  ;;  %v2636_v4 = vmul.f32 %v10680_v25, %v10783_v24  ;;  %8917 = vmatprep.mubr.msk.bf16.mxu0 %vm1542_vm2, %v4706_v13 }
 0x32d   : > { %12496 = vst [vmem:[#allocation23_spill] sm:$0xff] %v10992_v5  ;;  %v2958_v5 = vmax.f32 %v2956_v55, %v2957_v10  ;;  %v2973_v55 = vrot.slane %v10820_v9, 4  ;;  %v2695_v10 = vadd.f32 %v10698_v11, %v2625_v0  ;;  %v4370_v53 = vmul.f32 %v10406_v30, %v10753_v16  ;;  %8918 = vmatmul.mubr.msk.bf16.gmra.mxu0 %vm1542_vm2, %v4707_v19 }
 0x32e   : > { %v11002_v52 = vpop.f32.mrf.mxu0  ;;  %v4371_v61 = vmul.f32 %v10406_v30, %v12500_v43  ;;  %v11027_v62 = vmax.f32 %v2949_v1, %v2950_v28  ;;  %v3000_v24 = vrot.slane %v10888_v45, 4  ;;  %v2769_v34 = vmax.f32 %v2705_v32, 0.0  ;;  %v11037_v30 = vpop.f32.mrf.mxu1  ;;  %v11045_v32 = vld [vmem:[%s12408_s12] ss:$0 sm:$0xff] }
 0x32f   : > { %v2706_v13 = vadd.f32 %v10698_v11, %v2636_v4  ;;  %v11031_v20 = vmax.f32 %v2940_v46, %v2941_v41  ;;  %v2959_v33 = vrot.slane %v2958_v5, 1  ;;  %v11034_v0 = vmax.f32 %v10810_v6, %v2982_v21  ;;  %v12504_v46 = vld [vmem:[#allocation28_spill] sm:$0xff] }
 0x330   : > { %v11010_v31 = vpop.f32.mrf.mxu0  ;;  %12501 = vst [vmem:[#allocation26_spill] sm:$0xff] %v11027_v62  ;;  %v4505_v16 = vadd.f32 %v10435_v37, %v4371_v61  ;;  %v2760_v19 = vmax.f32 %v2696_v60, 0.0  ;;  %v4502_v28 = vadd.f32 %v10435_v37, %v4368_v59  ;;  %v4369_v41 = vmul.f32 %v11045_v32, %v12504_v46 }
 0x331   : > { %12502 = vst [vmem:[#allocation40_spill] sm:$0xff] %v11031_v20  ;;  %12503 = vst [vmem:[#allocation41_spill] sm:$0xff] %v11034_v0  ;;  %v2770_v1 = vmax.f32 %v2706_v13, 0.0  ;;  %v11049_v6 = vmax.f32 %v2967_v58, %v2968_v17  ;;  %v11052_v21 = vmax.f32 %v10820_v9, %v2973_v55  ;;  %v2759_v4 = vmax.f32 %v2695_v10, 0.0  ;;  %v11066_v58 = vld [vmem:[%s12411_s15] ss:$0 sm:$0xff] }
 0x332   : > { %v11025_v8 = vpop.f32.mrf.mxu0  ;;  %v4504_v43 = vadd.f32 %v10435_v37, %v4370_v53  ;;  %v11058_v59 = vmax.f32 %v10888_v45, %v3000_v24  ;;  %v3051_v61 = vsel %vm2771_vm3, %v2769_v34, -inf  ;;  %v4503_v62 = vadd.f32 %v10435_v37, %v4369_v41  ;;  %v11073_v45 = vpop.f32.mrf.mxu1  ;;  %v12510_v41 = vld [vmem:[#allocation29_spill] sm:$0xff] }
 0x333   : > { %12505 = vst [vmem:[#allocation28_spill] sm:$0xff] %v11049_v6  ;;  %12506 = vst [vmem:[#allocation42_spill] sm:$0xff] %v11052_v21  ;;  %v3052_v13 = vsel %vm2771_vm3, %v2770_v1, -inf  ;;  %v11068_v9 = vmax.f32 %v2958_v5, %v2959_v33  ;;  %v4633_v10 = vmax.f32 %v4505_v16, 0.0  ;;  %v2991_v24 = vrot.slane %v10899_v22, 4  ;;  %v12511_v33 = vld [vmem:[#allocation30_spill] sm:$0xff] }
 0x334   : > { %v11039_v26 = vpop.f32.mrf.mxu0  ;;  %12507 = vst [vmem:[#allocation43_spill] sm:$0xff] %v11058_v59  ;;  %v11071_v55 = vmax.f32 %v3051_v61, %v3052_v13  ;;  %v3007_v37 = vsel %vm2771_vm3, %v2760_v19, -inf  ;;  %v4630_v34 = vmax.f32 %v4502_v28, 0.0  ;;  %v4631_v1 = vmax.f32 %v4503_v62, 0.0  ;;  %v11093_v62 = vld [vmem:[%s12412_s16] ss:$0 sm:$0xff]  ;;  %v11101_v13 = vpop.f32.mrf.mxu1 }
 0x335   : > { %12508 = vst [vmem:[#allocation44_spill] sm:$0xff] %v11068_v9  ;;  %v4632_v46 = vmax.f32 %v4504_v43, 0.0  ;;  %v4374_v5 = vmul.f32 %v11045_v32, %v12510_v41  ;;  %v5485_v17 = vmul.f32 %v12511_v33, %v11066_v58  ;;  %v4372_v16 = vmul.f32 %v11045_v32, %v10814_v12  ;;  %v12512_v41 = vld [vmem:[#allocation22_spill] sm:$0xff] }
 0x336   : > { %v11055_v60 = vpop.f32.mrf.mxu0  ;;  %12509 = vst [vmem:[#allocation45_spill] sm:$0xff] %v11071_v55  ;;  %v3006_v19 = vsel %vm2771_vm3, %v2759_v4, -inf  ;;  %v4708_v28 = vpack.c.bf16 %v4631_v1, %v4630_v34  ;;  %v2629_v33 = vmul.f32 %v10680_v25, %v12512_v41  ;;  %v5483_v9 = vmul.f32 %v11066_v58, %v10816_v2  ;;  %v11108_v4 = vld [vmem:[%s12409_s13] ss:$0 sm:$0xff] }
 0x337   : > { %v11095_v43 = vmax.f32 %v3006_v19, %v3007_v37  ;;  %v4709_v12 = vpack.c.bf16 %v4633_v10, %v4632_v46  ;;  %v4506_v34 = vadd.f32 %v11108_v4, %v4372_v16  ;;  %v4375_v37 = vmul.f32 %v11045_v32, %v10833_v63 }
 0x338   : > { %v11075_v53 = vpop.f32.mrf.mxu0  ;;  %v5486_v10 = vmul.f32 %v10835_v44, %v11066_v58  ;;  %v4373_v2 = vmul.f32 %v11045_v32, %v10851_v3  ;;  %8921 = vmatprep.mubr.msk.bf16.mxu0 %vm1542_vm2, %v4708_v28  ;;  %v11119_v1 = vmax.f32 %v10899_v22, %v2991_v24  ;;  %v4508_v19 = vadd.f32 %v11108_v4, %v4374_v5 }
 0x339   : > { %v5619_v16 = vadd.f32 %v11093_v62, %v5485_v17  ;;  %8922 = vmatmul.mubr.msk.bf16.gmra.mxu0 %vm1542_vm2, %v4709_v12  ;;  %v5617_v44 = vadd.f32 %v11093_v62, %v5483_v9  ;;  %v4509_v41 = vadd.f32 %v11108_v4, %v4375_v37  ;;  %v2699_v24 = vadd.f32 %v10698_v11, %v2629_v33  ;;  %v11137_v12 = vpop.f32.mrf.mxu1  ;;  %v12514_v9 = vld [vmem:[#allocation24_spill] sm:$0xff] }
 0x33a   : > { %v11085_v61 = vpop.f32.mrf.mxu0  ;;  %v5620_v3 = vadd.f32 %v11093_v62, %v5486_v10  ;;  %v4507_v28 = vadd.f32 %v11108_v4, %v4373_v2  ;;  %v5484_v5 = vmul.f32 %v11066_v58, %v10853_v50  ;;  %v4378_v17 = vmul.f32 %v11045_v32, %v10866_v29 }
 0x33b   : > { %v2630_v37 = vmul.f32 %v10680_v25, %v12514_v9  ;;  %v4634_v10 = vmax.f32 %v4506_v34, 0.0  ;;  %v4637_v20 = vmax.f32 %v4509_v41, 0.0  ;;  %v4636_v14 = vmax.f32 %v4508_v19, 0.0  ;;  %v12515_v34 = vld [vmem:[#allocation35_spill] sm:$0xff] }
 0x33c   : > { %v11103_v6 = vpop.f32.mrf.mxu0  ;;  %v4635_v2 = vmax.f32 %v4507_v28, 0.0  ;;  %v5747_v22 = vmax.f32 %v5619_v16, 0.0  ;;  %v5618_v33 = vadd.f32 %v11093_v62, %v5484_v5  ;;  %v4376_v50 = vmul.f32 %v11045_v32, %v10882_v38  ;;  %v11152_v16 = vpop.f32.mrf.mxu1  ;;  %v12516_v5 = vld [vmem:[#allocation36_spill] sm:$0xff] }
 0x33d   : > { %12513 = vst [vmem:[#allocation29_spill] sm:$0xff] %v11103_v6  ;;  %v5745_v29 = vmax.f32 %v5617_v44, 0.0  ;;  %v5748_v55 = vmax.f32 %v5620_v3, 0.0  ;;  %v4512_v0 = vadd.f32 %v11108_v4, %v4378_v17  ;;  %v4711_v59 = vpack.c.bf16 %v4637_v20, %v4636_v14  ;;  %v12517_v3 = vld [vmem:[#allocation37_spill] sm:$0xff] }
 0x33e   : > { %v11125_v63 = vpop.f32.mrf.mxu0  ;;  %v4710_v21 = vpack.c.bf16 %v4635_v2, %v4634_v10  ;;  %v5746_v6 = vmax.f32 %v5618_v33, 0.0  ;;  %v5489_v41 = vmul.f32 %v12515_v34, %v11066_v58  ;;  %v4510_v19 = vadd.f32 %v11108_v4, %v4376_v50 }
 0x33f   : > { %v5487_v38 = vmul.f32 %v11066_v58, %v12516_v5  ;;  %v4379_v44 = vmul.f32 %v11045_v32, %v10909_v7  ;;  %v5490_v17 = vmul.f32 %v12517_v3, %v11066_v58  ;;  %v4377_v14 = vmul.f32 %v11045_v32, %v10933_v27 }
 0x340   : > { %v11139_v46 = vpop.f32.mrf.mxu0  ;;  %8925 = vmatprep.mubr.msk.bf16.mxu0 %vm1542_vm2, %v4710_v21  ;;  %v2763_v20 = vmax.f32 %v2699_v24, 0.0  ;;  %v11166_v9 = vadd.f32 %v10698_v11, %v2630_v37  ;;  %v5873_v10 = vpack.c.bf16 %v5746_v6, %v5745_v29  ;;  %v5488_v2 = vmul.f32 %v11066_v58, %v10893_v49  ;;  %v11178_v6 = vpop.f32.mrf.mxu1 }
 0x341   : > { %8926 = vmatmul.mubr.msk.bf16.gmra.mxu0 %vm1542_vm2, %v4711_v59  ;;  %v5874_v7 = vpack.c.bf16 %v5748_v55, %v5747_v22  ;;  %v5621_v50 = vadd.f32 %v11093_v62, %v5487_v38  ;;  %v4513_v34 = vadd.f32 %v11108_v4, %v4379_v44  ;;  %v4511_v27 = vadd.f32 %v11108_v4, %v4377_v14 }
 0x342   : > { %v11146_v47 = vpop.f32.mrf.mxu0  ;;  %v4640_v21 = vmax.f32 %v4512_v0, 0.0  ;;  %v5624_v24 = vadd.f32 %v11093_v62, %v5490_v17  ;;  %v5622_v37 = vadd.f32 %v11093_v62, %v5488_v2  ;;  %v5623_v59 = vadd.f32 %v11093_v62, %v5489_v41  ;;  %8955 = vmatprep.mubr.msk.bf16.mxu1 %vm5963_vm4, %v5873_v10 }
 0x343   : > { %v4638_v29 = vmax.f32 %v4510_v19, 0.0  ;;  %v4641_v55 = vmax.f32 %v4513_v34, 0.0  ;;  %v4639_v22 = vmax.f32 %v4511_v27, 0.0  ;;  %v5749_v5 = vmax.f32 %v5621_v50, 0.0  ;;  %8956 = vmatmul.mubr.msk.bf16.vlgmr.msra.gmra.mxu1 %vm5963_vm4, %v5874_v7  ;;  %v11199_v7 = vpop.f32.mrf.mxu1 }
 0x344   : > { %v11154_v28 = vpop.f32.mrf.mxu0  ;;  %v5750_v38 = vmax.f32 %v5622_v37, 0.0  ;;  %v4382_v0 = vmul.f32 %v11045_v32, %v10951_v51  ;;  %v4380_v44 = vmul.f32 %v11045_v32, %v10972_v42  ;;  %v11192_v17 = vsel %vm2771_vm3, %v2763_v20, -inf }
 0x345   : > { %v2764_v41 = vmax.f32 %v11166_v9, 0.0  ;;  %v4712_v19 = vpack.c.bf16 %v4639_v22, %v4638_v29  ;;  %v5491_v14 = vmul.f32 %v11066_v58, %v10925_v35  ;;  %v4713_v10 = vpack.c.bf16 %v4641_v55, %v4640_v21  ;;  %v12518_v9 = vld [vmem:[#allocation16_spill] sm:$0xff] }
 0x346   : > { %v11171_v33 = vpop.f32.mrf.mxu0  ;;  %v5752_v2 = vmax.f32 %v5624_v24, 0.0  ;;  %v5875_v50 = vpack.c.bf16 %v5750_v38, %v5749_v5  ;;  %v5493_v51 = vmul.f32 %v10911_v18, %v11066_v58  ;;  %v4514_v34 = vadd.f32 %v11108_v4, %v4380_v44 }
 0x347   : > { %v4383_v20 = vmul.f32 %v11045_v32, %v10990_v23  ;;  %v5494_v27 = vmul.f32 %v12518_v9, %v11066_v58  ;;  %v4381_v35 = vmul.f32 %v11045_v32, %v11008_v56  ;;  %8929 = vmatprep.mubr.msk.bf16.mxu0 %vm1542_vm2, %v4712_v19  ;;  %v5751_v21 = vmax.f32 %v5623_v59, 0.0 }
 0x348   : > { %v11180_v49 = vpop.f32.mrf.mxu0  ;;  %v4516_v18 = vadd.f32 %v11108_v4, %v4382_v0  ;;  %v5625_v24 = vadd.f32 %v11093_v62, %v5491_v14  ;;  %v5492_v37 = vmul.f32 %v11066_v58, %v10944_v54  ;;  %8959 = vmatprep.mubr.msk.bf16.mxu1 %vm5963_vm4, %v5875_v50  ;;  %v4386_v59 = vmul.f32 %v11045_v32, %v11037_v30  ;;  %v4234_v0 = vpop.f32.mrf.mxu1 }
 0x349   : > { %8930 = vmatmul.mubr.msk.bf16.gmra.mxu0 %vm1542_vm2, %v4713_v10  ;;  %v4517_v29 = vadd.f32 %v11108_v4, %v4383_v20  ;;  %v5628_v56 = vadd.f32 %v11093_v62, %v5494_v27  ;;  %v4515_v55 = vadd.f32 %v11108_v4, %v4381_v35  ;;  %v5876_v22 = vpack.c.bf16 %v5752_v2, %v5751_v21 }
 0x34a   : > { %v11189_v3 = vpop.f32.mrf.mxu0  ;;  %v5627_v5 = vadd.f32 %v11093_v62, %v5493_v51  ;;  %v5626_v54 = vadd.f32 %v11093_v62, %v5492_v37  ;;  %v4384_v38 = vmul.f32 %v11045_v32, %v11073_v45  ;;  %v4642_v19 = vmax.f32 %v4514_v34, 0.0 }
 0x34b   : > { %v4645_v14 = vmax.f32 %v4517_v29, 0.0  ;;  %v4643_v10 = vmax.f32 %v4515_v55, 0.0  ;;  %v5495_v50 = vmul.f32 %v11066_v58, %v10962_v15  ;;  %v4644_v20 = vmax.f32 %v4516_v18, 0.0  ;;  %8960 = vmatmul.mubr.msk.bf16.gmra.mxu1 %vm5963_vm4, %v5876_v22 }
 0x34c   : > { %v11201_v42 = vpop.f32.mrf.mxu0  ;;  %v5753_v9 = vmax.f32 %v5625_v24, 0.0  ;;  %v5754_v30 = vmax.f32 %v5626_v54, 0.0  ;;  %v5497_v2 = vmul.f32 %v10953_v36, %v11066_v58  ;;  %v5756_v45 = vmax.f32 %v5628_v56, 0.0  ;;  %v11243_v24 = vpop.f32.mrf.mxu1 }
 0x34d   : > { %v4714_v27 = vpack.c.bf16 %v4643_v10, %v4642_v19  ;;  %v4520_v35 = vadd.f32 %v11108_v4, %v4386_v59  ;;  %v4518_v34 = vadd.f32 %v11108_v4, %v4384_v38  ;;  %v4715_v21 = vpack.c.bf16 %v4645_v14, %v4644_v20 }
 0x34e   : > { %v11217_v23 = vpop.f32.mrf.mxu0  ;;  %v5877_v37 = vpack.c.bf16 %v5754_v30, %v5753_v9  ;;  %v4387_v15 = vmul.f32 %v11045_v32, %v11101_v13  ;;  %v5498_v18 = vmul.f32 %v10974_v57, %v11066_v58  ;;  %v11248_v29 = vsel %vm2771_vm3, %v2764_v41, -inf  ;;  %v4247_v20 = vpop.f32.mrf.mxu1 }
 0x34f   : > { %v5629_v56 = vadd.f32 %v11093_v62, %v5495_v50  ;;  %v4385_v55 = vmul.f32 %v11045_v32, %v11137_v12  ;;  %v5496_v59 = vmul.f32 %v11066_v58, %v10983_v40  ;;  %8933 = vmatprep.mubr.msk.bf16.mxu0 %vm1542_vm2, %v4714_v27  ;;  %v5755_v13 = vmax.f32 %v5627_v5, 0.0 }
 0x350   : > { %v11228_v44 = vpop.f32.mrf.mxu0  ;;  %v5631_v57 = vadd.f32 %v11093_v62, %v5497_v2  ;;  %v4521_v22 = vadd.f32 %v11108_v4, %v4387_v15  ;;  %v5632_v54 = vadd.f32 %v11093_v62, %v5498_v18  ;;  %8963 = vmatprep.mubr.msk.bf16.mxu1 %vm5963_vm4, %v5877_v37  ;;  %v4648_v38 = vmax.f32 %v4520_v35, 0.0  ;;  %v12520_v15 = vld [vmem:[#allocation27_spill] sm:$0xff] }
 0x351   : > { %8934 = vmatmul.mubr.msk.bf16.gmra.mxu0 %vm1542_vm2, %v4715_v21  ;;  %v4519_v12 = vadd.f32 %v11108_v4, %v4385_v55  ;;  %v5630_v40 = vadd.f32 %v11093_v62, %v5496_v59  ;;  %v4388_v5 = vmul.f32 %v11045_v32, %v11178_v6  ;;  %v5878_v19 = vpack.c.bf16 %v5756_v45, %v5755_v13  ;;  %v12519_v21 = vld [vmem:[#allocation25_spill] sm:$0xff] }
 0x352   : > { %v11235_v51 = vpop.f32.mrf.mxu0  ;;  %v4646_v14 = vmax.f32 %v4518_v34, 0.0  ;;  %v4649_v10 = vmax.f32 %v4521_v22, 0.0  ;;  %v5499_v50 = vmul.f32 %v11066_v58, %v11002_v52  ;;  %v5757_v30 = vmax.f32 %v5629_v56, 0.0 }
 0x353   : > { %v4647_v2 = vmax.f32 %v4519_v12, 0.0  ;;  %v5758_v27 = vmax.f32 %v5630_v40, 0.0  ;;  %v4390_v35 = vmul.f32 %v11045_v32, %v11152_v16  ;;  %v2633_v37 = vmul.f32 %v10680_v25, %v12519_v21  ;;  %8964 = vmatmul.mubr.msk.bf16.gmra.mxu1 %vm5963_vm4, %v5878_v19 }
 0x354   : > { %v11245_v36 = vpop.f32.mrf.mxu0  ;;  %v2634_v6 = vmul.f32 %v10680_v25, %v12520_v15  ;;  %v5760_v45 = vmax.f32 %v5632_v54, 0.0  ;;  %v4522_v52 = vadd.f32 %v11108_v4, %v4388_v5  ;;  %v4717_v18 = vpack.c.bf16 %v4649_v10, %v4648_v38  ;;  %v8816_v54 = vpop.f32.mrf.mxu1  ;;  %v12521_v5 = vld [vmem:[#allocation23_spill] sm:$0xff] }
 0x355   : > { %v4716_v56 = vpack.c.bf16 %v4647_v2, %v4646_v14  ;;  %v5879_v55 = vpack.c.bf16 %v5758_v27, %v5757_v30  ;;  %v4391_v59 = vmul.f32 %v11045_v32, %v11199_v7  ;;  %v5633_v16 = vadd.f32 %v11093_v62, %v5499_v50 }
 0x356   : > { %v11261_v41 = vpop.f32.mrf.mxu0  ;;  %v5502_v13 = vmul.f32 %v11010_v31, %v11066_v58  ;;  %v4389_v25 = vmul.f32 %v11045_v32, %v4234_v0  ;;  %v5500_v22 = vmul.f32 %v11066_v58, %v11025_v8  ;;  %v5759_v40 = vmax.f32 %v5631_v57, 0.0  ;;  %v4250_v15 = vpop.f32.mrf.mxu1 }
 0x357   : > { %v4524_v38 = vadd.f32 %v11108_v4, %v4390_v35  ;;  %v5501_v19 = vmul.f32 %v12521_v5, %v11066_v58  ;;  %v4525_v7 = vadd.f32 %v11108_v4, %v4391_v59  ;;  %8937 = vmatprep.mubr.msk.bf16.mxu0 %vm1542_vm2, %v4716_v56  ;;  %8967 = vmatprep.mubr.msk.bf16.mxu1 %vm5963_vm4, %v5879_v55  ;;  %v4650_v50 = vmax.f32 %v4522_v52, 0.0 }
 0x358   : > { %v11269_v9 = vpop.f32.mrf.mxu0  ;;  %v11298_v31 = vadd.f32 %v10698_v11, %v2634_v6  ;;  %v5636_v8 = vadd.f32 %v11093_v62, %v5502_v13  ;;  %v4523_v0 = vadd.f32 %v11108_v4, %v4389_v25  ;;  %v5634_v57 = vadd.f32 %v11093_v62, %v5500_v22 }
 0x359   : > { %8938 = vmatmul.mubr.msk.bf16.gmra.mxu0 %vm1542_vm2, %v4717_v18  ;;  %v5880_v10 = vpack.c.bf16 %v5760_v45, %v5759_v40  ;;  %v4392_v30 = vmul.f32 %v11045_v32, %v4247_v20  ;;  %v5503_v2 = vmul.f32 %v11066_v58, %v11055_v60  ;;  %v5761_v27 = vmax.f32 %v5633_v16, 0.0  ;;  %v9246_v45 = vld [vmem:[%s12406_s10] ss:$0 sm:$0xff] }
 0x35a   : > { %v11279_v34 = vpop.f32.mrf.mxu0  ;;  %v4653_v11 = vmax.f32 %v4525_v7, 0.0  ;;  %v4651_v35 = vmax.f32 %v4523_v0, 0.0  ;;  %v5762_v21 = vmax.f32 %v5634_v57, 0.0  ;;  %v3026_v56 = vmax.f32 %v11192_v17, %v11248_v29 }
 0x35b   : > { %v11316_v52 = vadd.f32 %v9246_v45, %v2633_v37  ;;  %v4652_v20 = vmax.f32 %v4524_v38, 0.0  ;;  %v5635_v18 = vadd.f32 %v11093_v62, %v5501_v19  ;;  %v5764_v60 = vmax.f32 %v5636_v8, 0.0  ;;  %8968 = vmatmul.mubr.msk.bf16.gmra.mxu1 %vm5963_vm4, %v5880_v10 }
 0x35c   : > { %v11289_v12 = vpop.f32.mrf.mxu0  ;;  %v4718_v55 = vpack.c.bf16 %v4651_v35, %v4650_v50  ;;  %v5881_v59 = vpack.c.bf16 %v5762_v21, %v5761_v27  ;;  %v4394_v16 = vmul.f32 %v11045_v32, %v11243_v24  ;;  %v4526_v17 = vadd.f32 %v11108_v4, %v4392_v30 }
 0x35d   : > { %v5637_v29 = vadd.f32 %v11093_v62, %v5503_v2  ;;  %v4395_v37 = vmul.f32 %v11045_v32, %v8816_v54  ;;  %v4393_v25 = vmul.f32 %v11045_v32, %v4250_v15  ;;  %v2768_v22 = vmax.f32 %v11298_v31, 0.0 }
 0x35e   : > { %v11304_v14 = vpop.f32.mrf.mxu0  ;;  %v4719_v40 = vpack.c.bf16 %v4653_v11, %v4652_v20  ;;  %v5506_v38 = vmul.f32 %v11075_v53, %v11066_v58  ;;  %v5504_v24 = vmul.f32 %v11066_v58, %v11085_v61  ;;  %8941 = vmatprep.mubr.msk.bf16.mxu0 %vm1542_vm2, %v4718_v55  ;;  %8971 = vmatprep.mubr.msk.bf16.mxu1 %vm5963_vm4, %v5881_v59  ;;  %v5763_v5 = vmax.f32 %v5635_v18, 0.0 }
 0x35f   : > { %v4529_v19 = vadd.f32 %v11108_v4, %v4395_v37  ;;  %v4527_v54 = vadd.f32 %v11108_v4, %v4393_v25  ;;  %v5507_v32 = vmul.f32 %v11066_v58, %v11125_v63  ;;  %v4528_v7 = vadd.f32 %v11108_v4, %v4394_v16 }
 0x360   : > { %v11309_v6 = vpop.f32.mrf.mxu0  ;;  %v5505_v53 = vmul.f32 %v11039_v26, %v11066_v58  ;;  %v5638_v31 = vadd.f32 %v11093_v62, %v5504_v24  ;;  %v5508_v61 = vmul.f32 %v11066_v58, %v11146_v47  ;;  %v5882_v0 = vpack.c.bf16 %v5764_v60, %v5763_v5 }
 0x361   : > { %8942 = vmatmul.mubr.msk.bf16.gmra.mxu0 %vm1542_vm2, %v4719_v40  ;;  %v4654_v57 = vmax.f32 %v4526_v17, 0.0  ;;  %v5765_v10 = vmax.f32 %v5637_v29, 0.0  ;;  %v4655_v50 = vmax.f32 %v4527_v54, 0.0  ;;  %v4657_v30 = vmax.f32 %v4529_v19, 0.0  ;;  %v12524_v54 = vld [vmem:[#allocation29_spill] sm:$0xff] }
 0x362   : > { %v11322_v13 = vpop.f32.mrf.mxu0  ;;  %v5640_v63 = vadd.f32 %v11093_v62, %v5506_v38  ;;  %v5766_v4 = vmax.f32 %v5638_v31, 0.0  ;;  %v5642_v2 = vadd.f32 %v11093_v62, %v5508_v61  ;;  %v3036_v27 = vrot.slane %v11000_v39, 4 }
 0x363   : > { %v3027_v11 = vrot.slane %v3026_v56, 4  ;;  %v4720_v35 = vpack.c.bf16 %v4655_v50, %v4654_v57  ;;  %v5641_v47 = vadd.f32 %v11093_v62, %v5507_v32  ;;  %v2767_v21 = vmax.f32 %v11316_v52, 0.0  ;;  %8972 = vmatmul.mubr.msk.bf16.gmra.mxu1 %vm5963_vm4, %v5882_v0 }
 0x364   : > { %v11346_v8 = vpop.f32.mrf.mxu0  ;;  %v4656_v15 = vmax.f32 %v4528_v7, 0.0  ;;  %v5639_v45 = vadd.f32 %v11093_v62, %v5505_v53  ;;  %v5883_v20 = vpack.c.bf16 %v5766_v4, %v5765_v10  ;;  %v12522_v60 = vrot.slane %v10948_v48, 4  ;;  %v12525_v53 = vld [vmem:[#allocation43_spill] sm:$0xff]  ;;  %v12527_v10 = vld [vmem:[#allocation41_spill] sm:$0xff] }
 0x365   : > { %v12523_v59 = vrot.slane %v11095_v43, 4  ;;  %v5770_v17 = vmax.f32 %v5642_v2, 0.0  ;;  %8945 = vmatprep.mubr.msk.bf16.mxu0 %vm1542_vm2, %v4720_v35  ;;  %v5512_v52 = vmul.f32 %v11066_v58, %v11189_v3  ;;  %v3043_v29 = vsel %vm2771_vm3, %v2768_v22, -inf }
 0x366   : > { %v11350_v26 = vpop.f32.mrf.mxu0  ;;  %v3019_v55 = vmax.f32 %v10948_v48, %v12522_v60  ;;  %v4721_v37 = vpack.c.bf16 %v4657_v30, %v4656_v15  ;;  %v5768_v25 = vmax.f32 %v5640_v63, 0.0  ;;  %v5510_v40 = vmul.f32 %v11139_v46, %v11066_v58  ;;  %8975 = vmatprep.mubr.msk.bf16.mxu1 %vm5963_vm4, %v5883_v20  ;;  %v12531_v15 = vld [vmem:[#allocation45_spill] sm:$0xff] }
 0x367   : > { %v3010_v16 = vmax.f32 %v11095_v43, %v12523_v59  ;;  %v3037_v48 = vmax.f32 %v11000_v39, %v3036_v27  ;;  %v3028_v38 = vmax.f32 %v3026_v56, %v3027_v11  ;;  %v5769_v24 = vmax.f32 %v5641_v47, 0.0  ;;  %v12529_v11 = vld [vmem:[#allocation42_spill] sm:$0xff] }
 0x368   : > { %v11357_v18 = vpop.f32.mrf.mxu0  ;;  %v5511_v43 = vmul.f32 %v11066_v58, %v11171_v33  ;;  %v2993_v3 = vrot.slane %v11119_v1, 2  ;;  %v3042_v22 = vsel %vm2771_vm3, %v2767_v21, -inf  ;;  %v5767_v19 = vmax.f32 %v5639_v45, 0.0 }
 0x369   : > { %v5509_v32 = vmul.f32 %v12524_v54, %v11066_v58  ;;  %8946 = vmatmul.mubr.msk.bf16.gmra.mxu0 %vm1542_vm2, %v4721_v37  ;;  %v3020_v46 = vrot.slane %v3019_v55, 2  ;;  %v3044_v7 = vmax.f32 %v3042_v22, %v3043_v29  ;;  %v5885_v39 = vpack.c.bf16 %v5770_v17, %v5769_v24 }
 0x36a   : > { %v11375_v5 = vpop.f32.mrf.mxu0  ;;  %v5646_v56 = vadd.f32 %v11093_v62, %v5512_v52  ;;  %v12526_v31 = vrot.slane %v12525_v53, 2  ;;  %v3011_v61 = vrot.slane %v3010_v16, 2  ;;  %v5884_v0 = vpack.c.bf16 %v5768_v25, %v5767_v19 }
 0x36b   : > { %v5644_v57 = vadd.f32 %v11093_v62, %v5510_v40  ;;  %v12528_v50 = vrot.slane %v12527_v10, 2  ;;  %v3038_v63 = vrot.slane %v3037_v48, 2  ;;  %v3029_v4 = vrot.slane %v3028_v38, 2 }
 0x36c   : > { %v3003_v33 = vmax.f32 %v12525_v53, %v12526_v31  ;;  %v5645_v2 = vadd.f32 %v11093_v62, %v5511_v43  ;;  %v11393_v27 = vpop.f32.mrf.mxu0  ;;  %v12530_v35 = vrot.slane %v12529_v11, 2  ;;  %v2994_v21 = vmax.f32 %v11119_v1, %v2993_v3  ;;  %8976 = vmatmul.mubr.msk.bf16.gmra.mxu1 %vm5963_vm4, %v5884_v0 }
 0x36d   : > { %v11390_v30 = vmax.f32 %v12527_v10, %v12528_v50  ;;  %v3054_v45 = vrot.slane %v12531_v15, 4  ;;  %v5643_v20 = vadd.f32 %v11093_v62, %v5509_v32  ;;  %v3021_v60 = vmax.f32 %v3019_v55, %v3020_v46  ;;  %8979 = vmatprep.mubr.msk.bf16.mxu1 %vm5963_vm4, %v5885_v39 }
 0x36e   : > { %v11398_v47 = vmax.f32 %v12529_v11, %v12530_v35  ;;  %v3045_v59 = vrot.slane %v3044_v7, 4  ;;  %v5774_v17 = vmax.f32 %v5646_v56, 0.0  ;;  %v5516_v52 = vmul.f32 %v11066_v58, %v11235_v51  ;;  %v11407_v29 = vpop.f32.mrf.mxu0 }
 0x36f   : > { %v3004_v37 = vrot.slane %v3003_v33, 1  ;;  %v3012_v25 = vmax.f32 %v3010_v16, %v3011_v61  ;;  %v5772_v40 = vmax.f32 %v5644_v57, 0.0  ;;  %v5514_v1 = vmul.f32 %v11180_v49, %v11066_v58 }
 0x370   : > { %v3039_v24 = vmax.f32 %v3037_v48, %v3038_v63  ;;  %v3030_v43 = vmax.f32 %v3028_v38, %v3029_v4  ;;  %v5773_v3 = vmax.f32 %v5645_v2, 0.0  ;;  %v5515_v55 = vmul.f32 %v11066_v58, %v11217_v23  ;;  %v11413_v22 = vpop.f32.mrf.mxu0 }
 0x371   : > { %v2995_v19 = vrot.slane %v2994_v21, 1  ;;  %v3055_v51 = vmax.f32 %v12531_v15, %v3054_v45  ;;  %v5771_v54 = vmax.f32 %v5643_v20, 0.0  ;;  %v5513_v16 = vmul.f32 %v11154_v28, %v11066_v58 }
 0x372   : > { %v3022_v32 = vrot.slane %v3021_v60, 1  ;;  %v3046_v46 = vmax.f32 %v3044_v7, %v3045_v59  ;;  %v5887_v49 = vpack.c.bf16 %v5774_v17, %v5773_v3  ;;  %v5650_v48 = vadd.f32 %v11093_v62, %v5516_v52  ;;  %v11425_v0 = vpop.f32.mrf.mxu0  ;;  %v12532_v52 = vld [vmem:[#allocation31_spill] sm:$0xff] }
 0x373   : > { %v3013_v38 = vrot.slane %v3012_v25, 1  ;;  %v5886_v39 = vpack.c.bf16 %v5772_v40, %v5771_v54  ;;  %v5648_v56 = vadd.f32 %v11093_v62, %v5514_v1  ;;  %v5517_v23 = vmul.f32 %v11201_v42, %v11066_v58  ;;  %v12533_v1 = vld [vmem:[#allocation10_spill] sm:$0xff]  ;;  %v12535_v3 = vld [vmem:[#allocation39_spill] sm:$0xff] }
 0x374   : > { %v3040_v53 = vrot.slane %v3039_v24, 1  ;;  %v3031_v31 = vrot.slane %v3030_v43, 1  ;;  %v5649_v61 = vadd.f32 %v11093_v62, %v5515_v55  ;;  %v5518_v28 = vmul.f32 %v11228_v44, %v11066_v58  ;;  %v11448_v20 = vpop.f32.mrf.mxu0 }
 0x375   : > { %v11427_v7 = vmax.f32 %v3003_v33, %v3004_v37  ;;  %v3056_v57 = vrot.slane %v3055_v51, 2  ;;  %v5647_v10 = vadd.f32 %v11093_v62, %v5513_v16  ;;  %8980 = vmatmul.mubr.msk.bf16.gmra.mxu1 %vm5963_vm4, %v5886_v39  ;;  %v5520_v42 = vmul.f32 %v11066_v58, %v11279_v34  ;;  %v12536_v16 = vld [vmem:[#allocation21_spill] sm:$0xff] }
 0x376   : > { %v11433_v50 = vmax.f32 %v2994_v21, %v2995_v19  ;;  %v11435_v63 = vmax.f32 %v3021_v60, %v3022_v32  ;;  %v3047_v4 = vrot.slane %v3046_v46, 2  ;;  %v5778_v44 = vmax.f32 %v5650_v48, 0.0  ;;  %8983 = vmatprep.mubr.msk.bf16.mxu1 %vm5963_vm4, %v5887_v49  ;;  %v11456_v40 = vpop.f32.mrf.mxu0 }
 0x377   : > { %v11438_v33 = vmax.f32 %v3012_v25, %v3013_v38  ;;  %v5776_v2 = vmax.f32 %v5648_v56, 0.0  ;;  %v5651_v11 = vadd.f32 %v11093_v62, %v5517_v23  ;;  %v5519_v35 = vmul.f32 %v11066_v58, %v11261_v41  ;;  %v12537_v38 = vld [vmem:[#allocation14_spill] sm:$0xff]  ;;  %v12538_v56 = vld [vmem:[#allocation33_spill] sm:$0xff]  ;;  %v12539_v23 = vld [vmem:[#allocation32_spill] sm:$0xff] }
 0x378   : > { %v11443_v34 = vmax.f32 %v3039_v24, %v3040_v53  ;;  %v11445_v21 = vmax.f32 %v3030_v43, %v3031_v31  ;;  %v5777_v15 = vmax.f32 %v5649_v61, 0.0  ;;  %v5652_v45 = vadd.f32 %v11093_v62, %v5518_v28  ;;  %v12534_v24 = vld [vmem:[#allocation9_spill] sm:$0xff]  ;;  %v11466_v48 = vpop.f32.mrf.mxu0 }
 0x379   : > { %v11450_v60 = vmax.f32 %v3055_v51, %v3056_v57  ;;  %v5775_v59 = vmax.f32 %v5647_v10, 0.0  ;;  %v5654_v17 = vadd.f32 %v11093_v62, %v5520_v42  ;;  %v2833_v37 = vrot.slane %v12532_v52, 1  ;;  %v12540_v57 = vld [vmem:[#allocation38_spill] sm:$0xff]  ;;  %v12541_v42 = vld [vmem:[#allocation12_spill] sm:$0xff] }
 0x37a   : > { %v11454_v25 = vmax.f32 %v3046_v46, %v3047_v4  ;;  %v5889_v41 = vpack.c.bf16 %v5778_v44, %v5777_v15  ;;  %v7546_v43 = vsel %vm7545_vm5, %v12534_v24, %v12533_v1  ;;  %v2905_v55 = vrot.slane %v12535_v3, 1  ;;  %v11488_v15 = vpop.f32.mrf.mxu0  ;;  %v12546_v1 = vld [vmem:[#allocation18_spill] sm:$0xff] }
 0x37b   : > { %v5888_v19 = vpack.c.bf16 %v5776_v2, %v5775_v59  ;;  %v5779_v54 = vmax.f32 %v5651_v11, 0.0  ;;  %v5653_v51 = vadd.f32 %v11093_v62, %v5519_v35  ;;  %v2842_v32 = vrot.slane %v12536_v16, 1  ;;  %v12542_v2 = vld [vmem:[#allocation11_spill] sm:$0xff] }
 0x37c   : > { %v5780_v49 = vmax.f32 %v5652_v45, 0.0  ;;  %v5521_v46 = vmul.f32 %v11245_v36, %v11066_v58  ;;  %v7548_v39 = vsel %vm7547_vm6, %v12537_v38, %v7546_v43  ;;  %v7559_v53 = vsel %vm7545_vm5, %v12539_v23, %v12538_v56  ;;  %v12543_v45 = vld [vmem:[#allocation19_spill] sm:$0xff]  ;;  %v11510_v23 = vpop.f32.mrf.mxu0 }
 0x37d   : > { %8984 = vmatmul.mubr.msk.bf16.gmra.mxu1 %vm5963_vm4, %v5888_v19  ;;  %v5522_v31 = vmul.f32 %v11269_v9, %v11066_v58  ;;  %v5782_v61 = vmax.f32 %v5654_v17, 0.0  ;;  %v2834_v28 = vmax.f32 %v12532_v52, %v2833_v37  ;;  %v2914_v10 = vrot.slane %v12540_v57, 1  ;;  %v12544_v17 = vld [vmem:[#allocation34_spill] sm:$0xff]  ;;  %v12545_v37 = vld [vmem:[#allocation15_spill] sm:$0xff]  ;;  %v12547_v19 = vld [vmem:[#allocation13_spill] sm:$0xff] }
 0x37e   : > { %8987 = vmatprep.mubr.msk.bf16.mxu1 %vm5963_vm4, %v5889_v41  ;;  %v5524_v36 = vmul.f32 %v11066_v58, %v11322_v13  ;;  %v7550_v4 = vsel %vm7549_vm7, %v12541_v42, %v7548_v39  ;;  %v2906_v44 = vmax.f32 %v12535_v3, %v2905_v55  ;;  %v7560_v11 = vsel %vm7547_vm6, %v12542_v2, %v7559_v53  ;;  %v12551_v2 = vld [vmem:[#allocation26_spill] sm:$0xff] }
 0x37f   : > { %v5781_v35 = vmax.f32 %v5653_v51, 0.0  ;;  %v5523_v9 = vmul.f32 %v11066_v58, %v11304_v14  ;;  %v7552_v59 = vsel %vm7551_vm8, %v12543_v45, %v7550_v4  ;;  %v7561_v13 = vsel %vm7549_vm7, %v12544_v17, %v7560_v11  ;;  %v12550_v4 = vld [vmem:[#allocation40_spill] sm:$0xff] }
 0x380   : > { %v2843_v52 = vmax.f32 %v12536_v16, %v2842_v32  ;;  %v7554_v41 = vsel %vm7553_vm9, %v12545_v37, %v7552_v59  ;;  %v7562_v24 = vsel %vm7551_vm8, %v12546_v1, %v7561_v13  ;;  %v2977_v43 = vrot.slane %v11398_v47, 1  ;;  %v12552_v59 = vld [vmem:[#allocation44_spill] sm:$0xff] }
 0x381   : > { %v5656_v14 = vadd.f32 %v11093_v62, %v5522_v31  ;;  %v7556_v3 = vsel %vm7555_vm10, %v2834_v28, %v7554_v41  ;;  %v2915_v55 = vmax.f32 %v12540_v57, %v2914_v10  ;;  %v7563_v51 = vsel %vm7553_vm9, %v12547_v19, %v7562_v24  ;;  %v12548_v28 = vld [vmem:[#allocation17_spill] sm:$0xff]  ;;  %v12549_v57 = vld [vmem:[#allocation20_spill] sm:$0xff] }
 0x382   : > { %v5891_v38 = vpack.c.bf16 %v5782_v61, %v5781_v35  ;;  %v5658_v16 = vadd.f32 %v11093_v62, %v5524_v36  ;;  %v11507_v32 = vsel %vm7557_vm11, %v2843_v52, %v7556_v3  ;;  %v7564_v39 = vsel %vm7555_vm10, %v2906_v44, %v7563_v51  ;;  %v11525_v44 = vpop.f32.mrf.mxu0  ;;  %v12553_v37 = vld [vmem:[#allocation28_spill] sm:$0xff] }
 0x383   : > { %v5890_v56 = vpack.c.bf16 %v5780_v49, %v5779_v54  ;;  %v11513_v53 = vsel %vm7557_vm11, %v2915_v55, %v7564_v39  ;;  %v2986_v31 = vrot.slane %v11390_v30, 1  ;;  %v7566_v10 = vsel %vm7545_vm5, %v12549_v57, %v12548_v28 }
 0x384   : > { %v5655_v61 = vadd.f32 %v11093_v62, %v5521_v46  ;;  %v5657_v36 = vadd.f32 %v11093_v62, %v5523_v9  ;;  %v2978_v42 = vmax.f32 %v11398_v47, %v2977_v43  ;;  %v7567_v54 = vsel %vm7547_vm6, %v12550_v4, %v7566_v10  ;;  %v11540_v13 = vpop.f32.mrf.mxu0 }
 0x385   : > { %v5784_v49 = vmax.f32 %v5656_v14, 0.0  ;;  %8988 = vmatmul.mubr.msk.bf16.gmra.mxu1 %vm5963_vm4, %v5890_v56  ;;  %v7568_v11 = vsel %vm7549_vm7, %v12551_v2, %v7567_v54  ;;  %v7573_v35 = vsel %vm7545_vm5, %v11427_v7, %v11433_v50  ;;  %v3049_v46 = vrot.slane %v11454_v25, 1 }
 0x386   : > { %v5526_v47 = vmul.f32 %v11309_v6, %v11066_v58  ;;  %v5786_v9 = vmax.f32 %v5658_v16, 0.0  ;;  %8991 = vmatprep.mubr.msk.bf16.mxu1 %vm5963_vm4, %v5891_v38  ;;  %v5528_v45 = vmul.f32 %v11066_v58, %v11375_v5  ;;  %v7569_v17 = vsel %vm7551_vm8, %v12552_v59, %v7568_v11  ;;  %v5193_v19 = vpop.f32.mrf.mxu0 }
 0x387   : > { %v2987_v52 = vmax.f32 %v11390_v30, %v2986_v31  ;;  %v7570_v7 = vsel %vm7553_vm9, %v12553_v37, %v7569_v17  ;;  %v3058_v50 = vrot.slane %v11450_v60, 1  ;;  %v7574_v6 = vsel %vm7547_vm6, %v11438_v33, %v7573_v35 }
 0x388   : > { %v5785_v41 = vmax.f32 %v5657_v36, 0.0  ;;  %v5527_v1 = vmul.f32 %v11066_v58, %v11350_v26  ;;  %v7571_v5 = vsel %vm7555_vm10, %v2978_v42, %v7570_v7  ;;  %v3050_v24 = vmax.f32 %v11454_v25, %v3049_v46  ;;  %v11576_v31 = vpop.f32.mrf.mxu0 }
 0x389   : > { %v5783_v43 = vmax.f32 %v5655_v61, 0.0  ;;  %v5525_v30 = vmul.f32 %v11289_v12, %v11066_v58  ;;  %v11555_v14 = vsel %vm7557_vm11, %v2987_v52, %v7571_v5  ;;  %v7575_v3 = vsel %vm7549_vm7, %v11435_v63, %v7574_v6 }
 0x38a   : > { %v5893_v55 = vpack.c.bf16 %v5786_v9, %v5785_v41  ;;  %v5662_v33 = vadd.f32 %v11093_v62, %v5528_v45  ;;  %v7576_v26 = vsel %vm7551_vm8, %v11445_v21, %v7575_v3  ;;  %v5660_v25 = vadd.f32 %v11093_v62, %v5526_v47  ;;  %v5206_v61 = vpop.f32.mrf.mxu0 }
 0x38b   : > { %v5892_v51 = vpack.c.bf16 %v5784_v49, %v5783_v43  ;;  %v3059_v38 = vmax.f32 %v11450_v60, %v3058_v50  ;;  %v7577_v12 = vsel %vm7553_vm9, %v11443_v34, %v7576_v26  ;;  %v5661_v16 = vadd.f32 %v11093_v62, %v5527_v1 }
 0x38c   : > { %v7578_v39 = vsel %vm7555_vm10, %v3050_v24, %v7577_v12  ;;  %v5659_v63 = vadd.f32 %v11093_v62, %v5525_v30  ;;  %v5790_v21 = vmax.f32 %v5662_v33, 0.0  ;;  %v5532_v60 = vmul.f32 %v11066_v58, %v11425_v0  ;;  %v11585_v49 = vpop.f32.mrf.mxu0 }
 0x38d   : > { %8992 = vmatmul.mubr.msk.bf16.gmra.mxu1 %vm5963_vm4, %v5892_v51  ;;  %v11571_v56 = vsel %vm7557_vm11, %v3059_v38, %v7578_v39  ;;  %v5788_v34 = vmax.f32 %v5660_v25, 0.0  ;;  %v5530_v28 = vmul.f32 %v11357_v18, %v11066_v58  ;;  %v5789_v57 = vmax.f32 %v5661_v16, 0.0 }
 0x38e   : > { %8995 = vmatprep.mubr.msk.bf16.mxu1 %vm5963_vm4, %v5893_v55  ;;  %v5531_v10 = vmul.f32 %v11066_v58, %v11407_v29  ;;  %v5787_v36 = vmax.f32 %v5659_v63, 0.0  ;;  %v5529_v42 = vmul.f32 %v11346_v8, %v11066_v58  ;;  %v5666_v54 = vadd.f32 %v11093_v62, %v5532_v60  ;;  %v5209_v18 = vpop.f32.mrf.mxu0  ;;  %v11629_v63 = vld [vmem:[%s12411_s15] ss:$0 sm:$0xff] }
 0x38f   : > { %v5895_v4 = vpack.c.bf16 %v5790_v21, %v5789_v57  ;;  %v5664_v2 = vadd.f32 %v11093_v62, %v5530_v28  ;;  %v5536_v8 = vmul.f32 %v11066_v58, %v11488_v15  ;;  %v5534_v47 = vmul.f32 %v11413_v22, %v11066_v58 }
 0x390   : > { %v5894_v0 = vpack.c.bf16 %v5788_v34, %v5787_v36  ;;  %v5665_v11 = vadd.f32 %v11093_v62, %v5531_v10  ;;  %v5663_v35 = vadd.f32 %v11093_v62, %v5529_v42  ;;  %v5794_v29 = vmax.f32 %v5666_v54, 0.0  ;;  %v11596_v9 = vpop.f32.mrf.mxu0 }
 0x391   : > { %v5792_v46 = vmax.f32 %v5664_v2, 0.0  ;;  %v5535_v59 = vmul.f32 %v11066_v58, %v11456_v40  ;;  %v5533_v52 = vmul.f32 %v11393_v27, %v11066_v58  ;;  %v5670_v50 = vadd.f32 %v11093_v62, %v5536_v8 }
 0x392   : > { %v5793_v45 = vmax.f32 %v5665_v11, 0.0  ;;  %v5791_v17 = vmax.f32 %v5663_v35, 0.0  ;;  %v5222_v37 = vpop.f32.mrf.mxu0  ;;  %v5668_v15 = vadd.f32 %v11093_v62, %v5534_v47  ;;  %v5540_v27 = vmul.f32 %v11066_v58, %v5193_v19 }
 0x393   : > { %v5669_v22 = vadd.f32 %v11093_v62, %v5535_v59  ;;  %v5667_v1 = vadd.f32 %v11093_v62, %v5533_v52  ;;  %v5798_v40 = vmax.f32 %v5670_v50, 0.0  ;;  %v5538_v24 = vmul.f32 %v11466_v48, %v11066_v58  ;;  %v11653_v59 = vld [vmem:[%s12412_s16] ss:$0 sm:$0xff] }
 0x394   : > { %v5897_v7 = vpack.c.bf16 %v5794_v29, %v5793_v45  ;;  %v5896_v6 = vpack.c.bf16 %v5792_v46, %v5791_v17  ;;  %v11604_v41 = vpop.f32.mrf.mxu0  ;;  %v5796_v5 = vmax.f32 %v5668_v15, 0.0  ;;  %v5539_v3 = vmul.f32 %v11066_v58, %v11525_v44 }
 0x395   : > { %8996 = vmatmul.mubr.msk.bf16.gmra.mxu1 %vm5963_vm4, %v5894_v0  ;;  %v5797_v30 = vmax.f32 %v5669_v22, 0.0  ;;  %v5795_v55 = vmax.f32 %v5667_v1, 0.0  ;;  %v5537_v33 = vmul.f32 %v11448_v20, %v11066_v58  ;;  %v5674_v51 = vadd.f32 %v11093_v62, %v5540_v27 }
 0x396   : > { %8999 = vmatprep.mubr.msk.bf16.mxu1 %vm5963_vm4, %v5895_v4  ;;  %v5225_v43 = vpop.f32.mrf.mxu0  ;;  %v5672_v38 = vadd.f32 %v11093_v62, %v5538_v24  ;;  %v5673_v12 = vadd.f32 %v11093_v62, %v5539_v3  ;;  %v5544_v20 = vmul.f32 %v11066_v58, %v5209_v18  ;;  %v5542_v21 = vmul.f32 %v11629_v63, %v11540_v13 }
 0x397   : > { %v5899_v26 = vpack.c.bf16 %v5798_v40, %v5797_v30  ;;  %v5898_v25 = vpack.c.bf16 %v5796_v5, %v5795_v55  ;;  %v5671_v48 = vadd.f32 %v11093_v62, %v5537_v33  ;;  %v5802_v44 = vmax.f32 %v5674_v51, 0.0 }
 0x398   : > { %v5800_v39 = vmax.f32 %v5672_v38, 0.0  ;;  %v5801_v34 = vmax.f32 %v5673_v12, 0.0  ;;  %v5543_v28 = vmul.f32 %v11629_v63, %v5206_v61  ;;  %v5541_v10 = vmul.f32 %v11629_v63, %v11510_v23 }
 0x399   : > { %v5799_v57 = vmax.f32 %v5671_v48, 0.0  ;;  %v5678_v58 = vadd.f32 %v11093_v62, %v5544_v20  ;;  %v5676_v54 = vadd.f32 %v11093_v62, %v5542_v21  ;;  %v5548_v23 = vmul.f32 %v11629_v63, %v5225_v43 }
 0x39a   : > { %v11619_v19 = vpop.f32.mrf.mxu0  ;;  %v5901_v42 = vpack.c.bf16 %v5802_v44, %v5801_v34  ;;  %v5677_v0 = vadd.f32 %v11093_v62, %v5543_v28  ;;  %v5675_v2 = vadd.f32 %v11093_v62, %v5541_v10  ;;  %v5546_v18 = vmul.f32 %v11629_v63, %v11585_v49 }
 0x39b   : > { %v5900_v4 = vpack.c.bf16 %v5800_v39, %v5799_v57  ;;  %v5806_v61 = vmax.f32 %v5678_v58, 0.0  ;;  %v5804_v11 = vmax.f32 %v5676_v54, 0.0  ;;  %v5547_v8 = vmul.f32 %v11629_v63, %v5222_v37 }
 0x39c   : > { %v5238_v16 = vpop.f32.mrf.mxu0  ;;  %v5805_v29 = vmax.f32 %v5677_v0, 0.0  ;;  %v5803_v46 = vmax.f32 %v5675_v2, 0.0  ;;  %v5545_v62 = vmul.f32 %v11629_v63, %v11576_v31  ;;  %v5682_v17 = vadd.f32 %v11653_v59, %v5548_v23 }
 0x39d   : > { %9000 = vmatmul.mubr.msk.bf16.gmra.mxu1 %vm5963_vm4, %v5896_v6  ;;  %v5680_v49 = vadd.f32 %v11653_v59, %v5546_v18  ;;  %v5550_v22 = vmul.f32 %v11629_v63, %v11604_v41  ;;  %v5551_v40 = vmul.f32 %v11629_v63, %v5238_v16  ;;  %v5549_v24 = vmul.f32 %v11629_v63, %v11596_v9 }
 0x39e   : > { %9003 = vmatprep.mubr.msk.bf16.mxu1 %vm5963_vm4, %v5897_v7  ;;  %v8892_v60 = vpop.f32.mrf.mxu0  ;;  %v5903_v45 = vpack.c.bf16 %v5806_v61, %v5805_v29  ;;  %v5902_v52 = vpack.c.bf16 %v5804_v11, %v5803_v46  ;;  %v5681_v7 = vadd.f32 %v11653_v59, %v5547_v8  ;;  %v5679_v37 = vadd.f32 %v11653_v59, %v5545_v62 }
 0x39f   : > { %v5810_v31 = vmax.f32 %v5682_v17, 0.0  ;;  %v5808_v15 = vmax.f32 %v5680_v49, 0.0  ;;  %v5684_v33 = vadd.f32 %v11653_v59, %v5550_v22  ;;  %v5683_v41 = vadd.f32 %v11653_v59, %v5549_v24 }
 0x3a0   : > { %v5241_v36 = vpop.f32.mrf.mxu0  ;;  %v5809_v1 = vmax.f32 %v5681_v7, 0.0  ;;  %v5807_v5 = vmax.f32 %v5679_v37, 0.0  ;;  %v5554_v48 = vmul.f32 %v11629_v63, %v8892_v60  ;;  %v5553_v39 = vmul.f32 %v11629_v63, %v11619_v19 }
 0x3a1   : > { %v5552_v6 = vmul.f32 %v11629_v63, %v5241_v36  ;;  %v5812_v12 = vmax.f32 %v5684_v33, 0.0  ;;  %v5811_v20 = vmax.f32 %v5683_v41, 0.0 }
 0x3a2   : > { %v5905_v43 = vpack.c.bf16 %v5810_v31, %v5809_v1  ;;  %v5904_v55 = vpack.c.bf16 %v5808_v15, %v5807_v5  ;;  %v5688_v10 = vadd.f32 %v11653_v59, %v5554_v48  ;;  %v5687_v58 = vadd.f32 %v11653_v59, %v5553_v39 }
 0x3a3   : > { %v5686_v30 = vadd.f32 %v11653_v59, %v5552_v6  ;;  %v5906_v57 = vpack.c.bf16 %v5812_v12, %v5811_v20 }
 0x3a4   : > { %v11641_v13 = vpop.f32.mrf.mxu0  ;;  %v5816_v54 = vmax.f32 %v5688_v10, 0.0  ;;  %v5815_v23 = vmax.f32 %v5687_v58, 0.0 }
 0x3a5   : > { %9004 = vmatmul.mubr.msk.bf16.gmra.mxu1 %vm5963_vm4, %v5898_v25  ;;  %v5814_v25 = vmax.f32 %v5686_v30, 0.0  ;;  %v5557_v11 = vmul.f32 %v11629_v63, %v11641_v13 }
 0x3a6   : > { %9007 = vmatprep.mubr.msk.bf16.mxu1 %vm5963_vm4, %v5899_v26  ;;  %v5254_v35 = vpop.f32.mrf.mxu0  ;;  %v5685_v26 = vadd.f32 %v11653_v59, %v5551_v40  ;;  %v5908_v8 = vpack.c.bf16 %v5816_v54, %v5815_v23 }
 0x3a7   : > { %v5555_v44 = vmul.f32 %v11629_v63, %v5254_v35 }
 0x3a8   : > { %v8896_v47 = vpop.f32.mrf.mxu0  ;;  %v5813_v16 = vmax.f32 %v5685_v26, 0.0 }
 0x3a9   : > { %v5689_v36 = vadd.f32 %v11653_v59, %v5555_v44  ;;  %v5558_v0 = vmul.f32 %v11629_v63, %v8896_v47 }
 0x3aa   : > { %v5257_v50 = vpop.f32.mrf.mxu0  ;;  %v5907_v21 = vpack.c.bf16 %v5814_v25, %v5813_v16 }
 0x3ab   : > { %v5556_v38 = vmul.f32 %v11629_v63, %v5257_v50  ;;  %v5817_v2 = vmax.f32 %v5689_v36, 0.0  ;;  %v5692_v46 = vadd.f32 %v11653_v59, %v5558_v0 }
 0x3ad   : > { %9008 = vmatmul.mubr.msk.bf16.gmra.mxu1 %vm5963_vm4, %v5900_v4  ;;  %v5690_v34 = vadd.f32 %v11653_v59, %v5556_v38  ;;  %v5820_v13 = vmax.f32 %v5692_v46, 0.0 }
 0x3ae   : > { %9011 = vmatprep.mubr.msk.bf16.mxu1 %vm5963_vm4, %v5901_v42 }
 0x3af   : > { %v5818_v60 = vmax.f32 %v5690_v34, 0.0 }
 0x3b1   : > { %v5909_v18 = vpack.c.bf16 %v5818_v60, %v5817_v2 }
 0x3b5   : > { %9012 = vmatmul.mubr.msk.bf16.gmra.mxu1 %vm5963_vm4, %v5902_v52 }
 0x3b6   : > { %9015 = vmatprep.mubr.msk.bf16.mxu1 %vm5963_vm4, %v5903_v45  ;;  %v5691_v45 = vadd.f32 %v11653_v59, %v5557_v11 }
 0x3b8   : > { %v5819_v31 = vmax.f32 %v5691_v45, 0.0 }
 0x3ba   : > { %v5910_v40 = vpack.c.bf16 %v5820_v13, %v5819_v31 }
 0x3bb   : > { %v8899_v27 = vpop.f32.mrf.mxu0 }
 0x3bc   : > { %v5561_v6 = vmul.f32 %v11629_v63, %v8899_v27 }
 0x3bd   : > { %v5270_v3 = vpop.f32.mrf.mxu0  ;;  %9016 = vmatmul.mubr.msk.bf16.gmra.mxu1 %vm5963_vm4, %v5904_v55 }
 0x3be   : > { %9019 = vmatprep.mubr.msk.bf16.mxu1 %vm5963_vm4, %v5905_v43  ;;  %v5559_v61 = vmul.f32 %v11629_v63, %v5270_v3  ;;  %v5695_v30 = vadd.f32 %v11653_v59, %v5561_v6 }
 0x3bf   : > { %v8900_v51 = vpop.f32.mrf.mxu0 }
 0x3c0   : > { %v5693_v62 = vadd.f32 %v11653_v59, %v5559_v61  ;;  %v5562_v49 = vmul.f32 %v11629_v63, %v8900_v51  ;;  %v5823_v25 = vmax.f32 %v5695_v30, 0.0 }
 0x3c1   : > { %v5273_v9 = vpop.f32.mrf.mxu0 }
 0x3c2   : > { %v5560_v4 = vmul.f32 %v11629_v63, %v5273_v9  ;;  %v5821_v7 = vmax.f32 %v5693_v62, 0.0  ;;  %v5696_v5 = vadd.f32 %v11653_v59, %v5562_v49 }
 0x3c3   : > { %v8903_v28 = vpop.f32.mrf.mxu0 }
 0x3c4   : > { %v5694_v35 = vadd.f32 %v11653_v59, %v5560_v4  ;;  %v5824_v27 = vmax.f32 %v5696_v5, 0.0  ;;  %v5565_v38 = vmul.f32 %v11629_v63, %v8903_v28 }
 0x3c5   : > { %v5286_v42 = vpop.f32.mrf.mxu0  ;;  %9020 = vmatmul.mubr.msk.bf16.gmra.mxu1 %vm5963_vm4, %v5906_v57 }
 0x3c6   : > { %9023 = vmatprep.mubr.msk.bf16.mxu1 %vm5963_vm4, %v5907_v21  ;;  %v5822_v47 = vmax.f32 %v5694_v35, 0.0  ;;  %v5563_v50 = vmul.f32 %v11629_v63, %v5286_v42  ;;  %v5912_v16 = vpack.c.bf16 %v5824_v27, %v5823_v25  ;;  %v5699_v21 = vadd.f32 %v11653_v59, %v5565_v38 }
 0x3c7   : > { %v8904_v19 = vpop.f32.mrf.mxu0 }
 0x3c8   : > { %v5911_v15 = vpack.c.bf16 %v5822_v47, %v5821_v7  ;;  %v5697_v24 = vadd.f32 %v11653_v59, %v5563_v50  ;;  %v5566_v33 = vmul.f32 %v11629_v63, %v8904_v19  ;;  %v5827_v60 = vmax.f32 %v5699_v21, 0.0 }
 0x3c9   : > { %v5289_v29 = vpop.f32.mrf.mxu0 }
 0x3ca   : > { %v5564_v17 = vmul.f32 %v11629_v63, %v5289_v29  ;;  %v5825_v26 = vmax.f32 %v5697_v24, 0.0  ;;  %v5700_v44 = vadd.f32 %v11653_v59, %v5566_v33 }
 0x3cc   : > { %v5698_v22 = vadd.f32 %v11653_v59, %v5564_v17  ;;  %v5828_v10 = vmax.f32 %v5700_v44, 0.0 }
 0x3cd   : > { %9024 = vmatmul.mubr.msk.bf16.gmra.mxu1 %vm5963_vm4, %v5908_v8 }
 0x3ce   : > { %9027 = vmatprep.mubr.msk.bf16.mxu1 %vm5963_vm4, %v5909_v18  ;;  %v5826_v3 = vmax.f32 %v5698_v22, 0.0  ;;  %v5914_v0 = vpack.c.bf16 %v5828_v10, %v5827_v60 }
 0x3d0   : > { %v5913_v9 = vpack.c.bf16 %v5826_v3, %v5825_v26 }
 0x3d1   : > { %v8907_v52 = vpop.f32.mrf.mxu0 }
 0x3d2   : > { %v5569_v4 = vmul.f32 %v11629_v63, %v8907_v52 }
 0x3d3   : > { %v5302_v37 = vpop.f32.mrf.mxu0 }
 0x3d4   : > { %v5567_v51 = vmul.f32 %v11629_v63, %v5302_v37  ;;  %v5703_v11 = vadd.f32 %v11653_v59, %v5569_v4 }
 0x3d5   : > { %v8908_v1 = vpop.f32.mrf.mxu0  ;;  %9028 = vmatmul.mubr.msk.bf16.gmra.mxu1 %vm5963_vm4, %v5910_v40 }
 0x3d6   : > { %9031 = vmatprep.mubr.msk.bf16.mxu1 %vm5963_vm4, %v5911_v15  ;;  %v5701_v20 = vadd.f32 %v11653_v59, %v5567_v51  ;;  %v5570_v28 = vmul.f32 %v11629_v63, %v8908_v1  ;;  %v5831_v47 = vmax.f32 %v5703_v11, 0.0 }
 0x3d7   : > { %v5305_v43 = vpop.f32.mrf.mxu0 }
 0x3d8   : > { %v5568_v55 = vmul.f32 %v11629_v63, %v5305_v43  ;;  %v5829_v42 = vmax.f32 %v5701_v20, 0.0  ;;  %v5704_v2 = vadd.f32 %v11653_v59, %v5570_v28 }
 0x3da   : > { %v5702_v12 = vadd.f32 %v11653_v59, %v5568_v55  ;;  %v5832_v29 = vmax.f32 %v5704_v2, 0.0 }
 0x3db   : > { %v8911_v41 = vpop.f32.mrf.mxu0 }
 0x3dc   : > { %v5830_v34 = vmax.f32 %v5702_v12, 0.0  ;;  %v5573_v17 = vmul.f32 %v11629_v63, %v8911_v41  ;;  %v5916_v49 = vpack.c.bf16 %v5832_v29, %v5831_v47 }
 0x3dd   : > { %v5318_v48 = vpop.f32.mrf.mxu0  ;;  %9032 = vmatmul.mubr.msk.bf16.gmra.mxu1 %vm5963_vm4, %v5912_v16 }
 0x3de   : > { %9035 = vmatprep.mubr.msk.bf16.mxu1 %vm5963_vm4, %v5913_v9  ;;  %v5571_v58 = vmul.f32 %v11629_v63, %v5318_v48  ;;  %v5915_v19 = vpack.c.bf16 %v5830_v34, %v5829_v42  ;;  %v5707_v31 = vadd.f32 %v11653_v59, %v5573_v17 }
 0x3df   : > { %v8912_v39 = vpop.f32.mrf.mxu0 }
 0x3e0   : > { %v5705_v61 = vadd.f32 %v11653_v59, %v5571_v58  ;;  %v5574_v8 = vmul.f32 %v11629_v63, %v8912_v39  ;;  %v5835_v30 = vmax.f32 %v5707_v31, 0.0 }
 0x3e1   : > { %v5321_v57 = vpop.f32.mrf.mxu0 }
 0x3e2   : > { %v5572_v36 = vmul.f32 %v11629_v63, %v5321_v57  ;;  %v5833_v46 = vmax.f32 %v5705_v61, 0.0  ;;  %v5708_v7 = vadd.f32 %v11653_v59, %v5574_v8 }
 0x3e4   : > { %v5706_v54 = vadd.f32 %v11653_v59, %v5572_v36  ;;  %v5836_v22 = vmax.f32 %v5708_v7, 0.0 }
 0x3e5   : > { %v8915_v23 = vpop.f32.mrf.mxu0  ;;  %9036 = vmatmul.mubr.msk.bf16.gmra.mxu1 %vm5963_vm4, %v5914_v0 }
 0x3e6   : > { %v5834_v18 = vmax.f32 %v5706_v54, 0.0  ;;  %9039 = vmatprep.mubr.msk.bf16.mxu1 %vm5963_vm4, %v5915_v19  ;;  %v5577_v3 = vmul.f32 %v11629_v63, %v8915_v23  ;;  %v5918_v33 = vpack.c.bf16 %v5836_v22, %v5835_v30 }
 0x3e7   : > { %v5334_v35 = vpop.f32.mrf.mxu0 }
 0x3e8   : > { %v5575_v62 = vmul.f32 %v11629_v63, %v5334_v35  ;;  %v5917_v52 = vpack.c.bf16 %v5834_v18, %v5833_v46  ;;  %v5711_v38 = vadd.f32 %v11653_v59, %v5577_v3 }
 0x3e9   : > { %v8916_v45 = vpop.f32.mrf.mxu0 }
 0x3ea   : > { %v5709_v37 = vadd.f32 %v11653_v59, %v5575_v62  ;;  %v5578_v1 = vmul.f32 %v11629_v63, %v8916_v45  ;;  %v5839_v20 = vmax.f32 %v5711_v38, 0.0  ;;  %v11761_v62 = vld [vmem:[%s12414_s18] ss:$0 sm:$0xff] }
 0x3eb   : > { %v5337_v13 = vpop.f32.mrf.mxu0 }
 0x3ec   : > { %v5576_v50 = vmul.f32 %v11629_v63, %v5337_v13  ;;  %v5837_v24 = vmax.f32 %v5709_v37, 0.0  ;;  %v5712_v26 = vadd.f32 %v11653_v59, %v5578_v1 }
 0x3ed   : > { %9040 = vmatmul.mubr.msk.bf16.gmra.mxu1 %vm5963_vm4, %v5916_v49  ;;  %v8919_v15 = vpop.f32.mrf.mxu0 }
 0x3ee   : > { %v5710_v6 = vadd.f32 %v11653_v59, %v5576_v50  ;;  %9043 = vmatprep.mubr.msk.bf16.mxu1 %vm5963_vm4, %v5917_v52  ;;  %v5840_v12 = vmax.f32 %v5712_v26, 0.0  ;;  %v5581_v39 = vmul.f32 %v11629_v63, %v8919_v15 }
 0x3ef   : > { %v5350_v5 = vpop.f32.mrf.mxu0 }
 0x3f0   : > { %v5838_v40 = vmax.f32 %v5710_v6, 0.0  ;;  %v5579_v43 = vmul.f32 %v11629_v63, %v5350_v5  ;;  %v5920_v57 = vpack.c.bf16 %v5840_v12, %v5839_v20  ;;  %v5715_v42 = vadd.f32 %v11653_v59, %v5581_v39  ;;  %v11771_v6 = vld [vmem:[%s12415_s19] ss:$0 sm:$0xff] }
 0x3f1   : > { %v8920_v55 = vpop.f32.mrf.mxu0 }
 0x3f2   : > { %v5919_v27 = vpack.c.bf16 %v5838_v40, %v5837_v24  ;;  %v5713_v41 = vadd.f32 %v11653_v59, %v5579_v43  ;;  %v5582_v48 = vmul.f32 %v11629_v63, %v8920_v55  ;;  %v5843_v2 = vmax.f32 %v5715_v42, 0.0 }
 0x3f3   : > { %v5353_v51 = vpop.f32.mrf.mxu0 }
 0x3f4   : > { %v5580_v25 = vmul.f32 %v11629_v63, %v5353_v51  ;;  %v5841_v16 = vmax.f32 %v5713_v41, 0.0  ;;  %v5716_v10 = vadd.f32 %v11653_v59, %v5582_v48 }
 0x3f5   : > { %9044 = vmatmul.mubr.msk.bf16.gmra.mxu1 %vm5963_vm4, %v5918_v33 }
 0x3f6   : > { %v5714_v9 = vadd.f32 %v11653_v59, %v5580_v25  ;;  %9047 = vmatprep.mubr.msk.bf16.mxu1 %vm5963_vm4, %v5919_v27  ;;  %v5844_v60 = vmax.f32 %v5716_v10, 0.0 }
 0x3f8   : > { %v5842_v44 = vmax.f32 %v5714_v9, 0.0  ;;  %v5922_v18 = vpack.c.bf16 %v5844_v60, %v5843_v2 }
 0x3f9   : > { %v8923_v21 = vpop.f32.mrf.mxu0 }
 0x3fa   : > { %v5921_v34 = vpack.c.bf16 %v5842_v44, %v5841_v16  ;;  %v5585_v61 = vmul.f32 %v11629_v63, %v8923_v21 }
 0x3fb   : > { %v5366_v28 = vpop.f32.mrf.mxu0 }
 0x3fc   : > { %v5583_v36 = vmul.f32 %v11629_v63, %v5366_v28  ;;  %v5719_v47 = vadd.f32 %v11653_v59, %v5585_v61 }
 0x3fd   : > { %9048 = vmatmul.mubr.msk.bf16.gmra.mxu1 %vm5963_vm4, %v5920_v57  ;;  %v8924_v58 = vpop.f32.mrf.mxu0 }
 0x3fe   : > { %9051 = vmatprep.mubr.msk.bf16.mxu1 %vm5963_vm4, %v5921_v34  ;;  %v5586_v4 = vmul.f32 %v11629_v63, %v8924_v58  ;;  %v5717_v54 = vadd.f32 %v11653_v59, %v5583_v36  ;;  %v5847_v1 = vmax.f32 %v5719_v47, 0.0 }
 0x3ff   : > { %v5369_v19 = vpop.f32.mrf.mxu0 }
 0x400   : > { %v5584_v0 = vmul.f32 %v11629_v63, %v5369_v19  ;;  %v5720_v35 = vadd.f32 %v11653_v59, %v5586_v4  ;;  %v5845_v8 = vmax.f32 %v5717_v54, 0.0 }
 0x401   : > { %v8927_v23 = vpop.f32.mrf.mxu0 }
 0x402   : > { %v5718_v11 = vadd.f32 %v11653_v59, %v5584_v0  ;;  %v5848_v49 = vmax.f32 %v5720_v35, 0.0  ;;  %v5589_v40 = vmul.f32 %v11629_v63, %v8927_v23 }
 0x403   : > { %v5382_v29 = vpop.f32.mrf.mxu0  ;;  %v8957_v17 = vpop.f32.mrf.mxu1 }
 0x404   : > { %v5846_v46 = vmax.f32 %v5718_v11, 0.0  ;;  %v5587_v45 = vmul.f32 %v11629_v63, %v5382_v29  ;;  %v6709_v7 = vmul.f32 %v8957_v17, %v11761_v62  ;;  %v5924_v3 = vpack.c.bf16 %v5848_v49, %v5847_v1 }
 0x405   : > { %9052 = vmatmul.mubr.msk.bf16.gmra.mxu1 %vm5963_vm4, %v5922_v18  ;;  %v8928_v52 = vpop.f32.mrf.mxu0  ;;  %v6190_v50 = vpop.f32.mrf.mxu1  ;;  %v5723_v38 = vadd.f32 %v11653_v59, %v5589_v40 }
 0x406   : > { %v5923_v13 = vpack.c.bf16 %v5846_v46, %v5845_v8  ;;  %v5590_v37 = vmul.f32 %v11629_v63, %v8928_v52  ;;  %v5721_v15 = vadd.f32 %v11653_v59, %v5587_v45  ;;  %v6707_v5 = vmul.f32 %v11761_v62, %v6190_v50 }
 0x407   : > { %v5385_v31 = vpop.f32.mrf.mxu0  ;;  %v8958_v24 = vpop.f32.mrf.mxu1  ;;  %v6843_v55 = vadd.f32 %v11771_v6, %v6709_v7  ;;  %v5851_v4 = vmax.f32 %v5723_v38, 0.0 }
 0x408   : > { %v5588_v22 = vmul.f32 %v11629_v63, %v5385_v31  ;;  %9055 = vmatprep.mubr.msk.bf16.mxu1 %vm5963_vm4, %v5923_v13  ;;  %v5724_v27 = vadd.f32 %v11653_v59, %v5590_v37  ;;  %v5849_v51 = vmax.f32 %v5721_v15, 0.0  ;;  %v6710_v41 = vmul.f32 %v8958_v24, %v11761_v62 }
 0x409   : > { %v8931_v43 = vpop.f32.mrf.mxu0  ;;  %v6193_v33 = vpop.f32.mrf.mxu1  ;;  %v6841_v9 = vadd.f32 %v11771_v6, %v6707_v5  ;;  %v6971_v39 = vmax.f32 %v6843_v55, 0.0 }
 0x40a   : > { %v5722_v30 = vadd.f32 %v11653_v59, %v5588_v22  ;;  %v6708_v12 = vmul.f32 %v11761_v62, %v6193_v33  ;;  %v5852_v21 = vmax.f32 %v5724_v27, 0.0  ;;  %v6844_v36 = vadd.f32 %v11771_v6, %v6710_v41 }
 0x40b   : > { %v5398_v26 = vpop.f32.mrf.mxu0  ;;  %v8961_v48 = vpop.f32.mrf.mxu1  ;;  %v5593_v42 = vmul.f32 %v11629_v63, %v8931_v43  ;;  %v6969_v19 = vmax.f32 %v6841_v9, 0.0  ;;  %v7100_v47 = vsel %vm2771_vm3, %v6971_v39, -inf }
 0x40c   : > { %v5850_v25 = vmax.f32 %v5722_v30, 0.0  ;;  %v5591_v16 = vmul.f32 %v11629_v63, %v5398_v26  ;;  %v6842_v34 = vadd.f32 %v11771_v6, %v6708_v12  ;;  %v6713_v23 = vmul.f32 %v8961_v48, %v11761_v62 }
 0x40d   : > { %9056 = vmatmul.mubr.msk.bf16.gmra.mxu1 %vm5963_vm4, %v5924_v3  ;;  %v8932_v44 = vpop.f32.mrf.mxu0  ;;  %v6206_v57 = vpop.f32.mrf.mxu1  ;;  %v5926_v35 = vpack.c.bf16 %v5852_v21, %v5851_v4  ;;  %v6972_v17 = vmax.f32 %v6844_v36, 0.0  ;;  %v5727_v52 = vadd.f32 %v11653_v59, %v5593_v42  ;;  %v7097_v13 = vsel %vm2771_vm3, %v6969_v19, -inf }
 0x40e   : > { %v5925_v20 = vpack.c.bf16 %v5850_v25, %v5849_v51  ;;  %v5594_v10 = vmul.f32 %v11629_v63, %v8932_v44  ;;  %v6711_v58 = vmul.f32 %v11761_v62, %v6206_v57  ;;  %v6970_v54 = vmax.f32 %v6842_v34, 0.0 }
 0x40f   : > { %v5401_v28 = vpop.f32.mrf.mxu0  ;;  %v5725_v0 = vadd.f32 %v11653_v59, %v5591_v16  ;;  %v8962_v2 = vpop.f32.mrf.mxu1  ;;  %v6847_v22 = vadd.f32 %v11771_v6, %v6713_v23  ;;  %v7102_v27 = vsel %vm2771_vm3, %v6972_v17, -inf  ;;  %v5855_v33 = vmax.f32 %v5727_v52, 0.0 }
 0x410   : > { %v5592_v60 = vmul.f32 %v11629_v63, %v5401_v28  ;;  %9059 = vmatprep.mubr.msk.bf16.mxu1 %vm5963_vm4, %v5925_v20  ;;  %v5728_v11 = vadd.f32 %v11653_v59, %v5594_v10  ;;  %v7098_v29 = vsel %vm2771_vm3, %v6970_v54, -inf  ;;  %v6845_v8 = vadd.f32 %v11771_v6, %v6711_v58 }
 0x411   : > { %v8935_v61 = vpop.f32.mrf.mxu0  ;;  %v6209_v46 = vpop.f32.mrf.mxu1  ;;  %v5853_v49 = vmax.f32 %v5725_v0, 0.0  ;;  %v7099_v15 = vmax.f32 %v7097_v13, %v7098_v29  ;;  %v6714_v40 = vmul.f32 %v8962_v2, %v11761_v62  ;;  %v6975_v44 = vmax.f32 %v6847_v22, 0.0 }
 0x412   : > { %v5726_v18 = vadd.f32 %v11653_v59, %v5592_v60  ;;  %v6712_v50 = vmul.f32 %v11761_v62, %v6209_v46  ;;  %v5856_v1 = vmax.f32 %v5728_v11, 0.0  ;;  %v6973_v5 = vmax.f32 %v6845_v8, 0.0 }
 0x413   : > { %v5414_v45 = vpop.f32.mrf.mxu0  ;;  %v8965_v37 = vpop.f32.mrf.mxu1  ;;  %v5597_v26 = vmul.f32 %v11629_v63, %v8935_v61  ;;  %v7101_v16 = vmax.f32 %v7099_v15, %v7100_v47  ;;  %v6848_v39 = vadd.f32 %v11771_v6, %v6714_v40 }
 0x414   : > { %v5854_v7 = vmax.f32 %v5726_v18, 0.0  ;;  %v6846_v43 = vadd.f32 %v11771_v6, %v6712_v50  ;;  %v5595_v30 = vmul.f32 %v11629_v63, %v5414_v45  ;;  %v5928_v20 = vpack.c.bf16 %v5856_v1, %v5855_v33 }
 0x415   : > { %9060 = vmatmul.mubr.msk.bf16.gmra.mxu1 %vm5963_vm4, %v5926_v35  ;;  %v8936_v31 = vpop.f32.mrf.mxu0  ;;  %v6222_v3 = vpop.f32.mrf.mxu1  ;;  %v7110_v21 = vsel %vm2771_vm3, %v6973_v5, -inf  ;;  %v5731_v58 = vadd.f32 %v11653_v59, %v5597_v26  ;;  %v6717_v60 = vmul.f32 %v8965_v37, %v11761_v62  ;;  %v7103_v11 = vmax.f32 %v7101_v16, %v7102_v27 }
 0x416   : > { %v5927_v24 = vpack.c.bf16 %v5854_v7, %v5853_v49  ;;  %v6715_v51 = vmul.f32 %v11761_v62, %v6222_v3  ;;  %v6974_v41 = vmax.f32 %v6846_v43, 0.0  ;;  %v5729_v25 = vadd.f32 %v11653_v59, %v5595_v30 }
 0x417   : > { %v5417_v55 = vpop.f32.mrf.mxu0  ;;  %v5598_v38 = vmul.f32 %v11629_v63, %v8936_v31  ;;  %v8966_v9 = vpop.f32.mrf.mxu1  ;;  %v6976_v18 = vmax.f32 %v6848_v39, 0.0  ;;  %v7113_v35 = vsel %vm2771_vm3, %v6975_v44, -inf  ;;  %v5859_v52 = vmax.f32 %v5731_v58, 0.0 }
 0x418   : > { %v5596_v12 = vmul.f32 %v11629_v63, %v5417_v55  ;;  %9063 = vmatprep.mubr.msk.bf16.mxu1 %vm5963_vm4, %v5927_v24  ;;  %v7111_v34 = vsel %vm2771_vm3, %v6974_v41, -inf  ;;  %v6849_v4 = vadd.f32 %v11771_v6, %v6715_v51  ;;  %v5857_v19 = vmax.f32 %v5729_v25, 0.0 }
 0x419   : > { %v8939_v48 = vpop.f32.mrf.mxu0  ;;  %v5732_v57 = vadd.f32 %v11653_v59, %v5598_v38  ;;  %v6225_v28 = vpop.f32.mrf.mxu1  ;;  %v7112_v42 = vmax.f32 %v7110_v21, %v7111_v34  ;;  %v6718_v54 = vmul.f32 %v8966_v9, %v11761_v62  ;;  %v6851_v13 = vadd.f32 %v11771_v6, %v6717_v60 }
 0x41a   : > { %v5730_v10 = vadd.f32 %v11653_v59, %v5596_v12  ;;  %v6716_v2 = vmul.f32 %v11761_v62, %v6225_v28  ;;  %v6977_v49 = vmax.f32 %v6849_v4, 0.0  ;;  %v7104_v22 = vrot.slane %v7103_v11, 4 }
 0x41b   : > { %v5430_v36 = vpop.f32.mrf.mxu0  ;;  %v8969_v61 = vpop.f32.mrf.mxu1  ;;  %v5860_v29 = vmax.f32 %v5732_v57, 0.0  ;;  %v7114_v17 = vmax.f32 %v7112_v42, %v7113_v35  ;;  %v6852_v7 = vadd.f32 %v11771_v6, %v6718_v54  ;;  %v7115_v1 = vsel %vm2771_vm3, %v6976_v18, -inf }
 0x41c   : > { %v5858_v0 = vmax.f32 %v5730_v10, 0.0  ;;  %v6850_v46 = vadd.f32 %v11771_v6, %v6716_v2  ;;  %v5599_v40 = vmul.f32 %v11629_v63, %v5430_v36  ;;  %v5601_v43 = vmul.f32 %v11629_v63, %v8939_v48 }
 0x41d   : > { %9064 = vmatmul.mubr.msk.bf16.gmra.mxu1 %vm5963_vm4, %v5928_v20  ;;  %v8940_v23 = vpop.f32.mrf.mxu0  ;;  %v6238_v45 = vpop.f32.mrf.mxu1  ;;  %v5930_v5 = vpack.c.bf16 %v5860_v29, %v5859_v52  ;;  %v7116_v27 = vmax.f32 %v7114_v17, %v7115_v1  ;;  %v6979_v33 = vmax.f32 %v6851_v13, 0.0  ;;  %v6721_v26 = vmul.f32 %v8969_v61, %v11761_v62 }
 0x41e   : > { %v5929_v8 = vpack.c.bf16 %v5858_v0, %v5857_v19  ;;  %v6978_v50 = vmax.f32 %v6850_v46, 0.0  ;;  %v6719_v37 = vmul.f32 %v11761_v62, %v6238_v45  ;;  %v5602_v30 = vmul.f32 %v11629_v63, %v8940_v23 }
 0x41f   : > { %v5433_v47 = vpop.f32.mrf.mxu0  ;;  %v8970_v31 = vpop.f32.mrf.mxu1  ;;  %v7123_v51 = vsel %vm2771_vm3, %v6977_v49, -inf  ;;  %v6980_v41 = vmax.f32 %v6852_v7, 0.0  ;;  %v5733_v16 = vadd.f32 %v11653_v59, %v5599_v40  ;;  %v11845_v20 = vmax.f32 %v7103_v11, %v7104_v22 }
 0x420   : > { %9067 = vmatprep.mubr.msk.bf16.mxu1 %vm5963_vm4, %v5929_v8  ;;  %v7124_v24 = vsel %vm2771_vm3, %v6978_v50, -inf  ;;  %v6853_v25 = vadd.f32 %v11771_v6, %v6719_v37  ;;  %v5736_v38 = vadd.f32 %v11653_v59, %v5602_v30  ;;  %v5600_v44 = vmul.f32 %v11629_v63, %v5433_v47 }
 0x421   : > { %v8943_v15 = vpop.f32.mrf.mxu0  ;;  %v6241_v3 = vpop.f32.mrf.mxu1  ;;  %v7125_v48 = vmax.f32 %v7123_v51, %v7124_v24  ;;  %v5735_v39 = vadd.f32 %v11653_v59, %v5601_v43  ;;  %v7117_v10 = vrot.slane %v7116_v27, 4  ;;  %v7126_v28 = vsel %vm2771_vm3, %v6979_v33, -inf }
 0x422   : > { %v6720_v21 = vmul.f32 %v11761_v62, %v6241_v3  ;;  %v6855_v36 = vadd.f32 %v11771_v6, %v6721_v26  ;;  %v5734_v42 = vadd.f32 %v11653_v59, %v5600_v44  ;;  %v7128_v58 = vsel %vm2771_vm3, %v6980_v41, -inf }
 0x423   : > { %v5446_v55 = vpop.f32.mrf.mxu0  ;;  %v8973_v9 = vpop.f32.mrf.mxu1  ;;  %v6981_v60 = vmax.f32 %v6853_v25, 0.0  ;;  %v5864_v4 = vmax.f32 %v5736_v38, 0.0  ;;  %v7127_v2 = vmax.f32 %v7125_v48, %v7126_v28  ;;  %v5861_v61 = vmax.f32 %v5733_v16, 0.0 }
 0x424   : > { %v6854_v19 = vadd.f32 %v11771_v6, %v6720_v21  ;;  %v6722_v23 = vmul.f32 %v8970_v31, %v11761_v62  ;;  %v5862_v11 = vmax.f32 %v5734_v42, 0.0  ;;  %v5863_v18 = vmax.f32 %v5735_v39, 0.0 }
 0x425   : > { %9068 = vmatmul.mubr.msk.bf16.gmra.mxu1 %vm5963_vm4, %v5930_v5  ;;  %v8944_v12 = vpop.f32.mrf.mxu0  ;;  %v6254_v34 = vpop.f32.mrf.mxu1  ;;  %v5605_v29 = vmul.f32 %v11629_v63, %v8943_v15  ;;  %v5603_v8 = vmul.f32 %v11629_v63, %v5446_v55  ;;  %v11857_v45 = vmax.f32 %v7116_v27, %v7117_v10  ;;  %v6983_v47 = vmax.f32 %v6855_v36, 0.0 }
 0x426   : > { %v6982_v35 = vmax.f32 %v6854_v19, 0.0  ;;  %v5931_v17 = vpack.c.bf16 %v5862_v11, %v5861_v61  ;;  %v6725_v52 = vmul.f32 %v8973_v9, %v11761_v62  ;;  %v7136_v49 = vsel %vm2771_vm3, %v6981_v60, -inf }
 0x427   : > { %v5449_v57 = vpop.f32.mrf.mxu0  ;;  %v8974_v54 = vpop.f32.mrf.mxu1  ;;  %v5932_v7 = vpack.c.bf16 %v5864_v4, %v5863_v18  ;;  %v6723_v37 = vmul.f32 %v11761_v62, %v6254_v34  ;;  %v11863_v22 = vmax.f32 %v7127_v2, %v7128_v58  ;;  %v6856_v15 = vadd.f32 %v11771_v6, %v6722_v23 }
 0x428   : > { %v7137_v50 = vsel %vm2771_vm3, %v6982_v35, -inf  ;;  %v5606_v1 = vmul.f32 %v11629_v63, %v8944_v12  ;;  %v6726_v40 = vmul.f32 %v8974_v54, %v11761_v62  ;;  %9071 = vmatprep.mubr.msk.bf16.mxu1 %vm5963_vm4, %v5931_v17  ;;  %v5739_v5 = vadd.f32 %v11653_v59, %v5605_v29 }
 0x429   : > { %v8947_v0 = vpop.f32.mrf.mxu0  ;;  %v6257_v46 = vpop.f32.mrf.mxu1  ;;  %v5737_v24 = vadd.f32 %v11653_v59, %v5603_v8  ;;  %v6857_v43 = vadd.f32 %v11771_v6, %v6723_v37  ;;  %v5604_v30 = vmul.f32 %v11629_v63, %v5449_v57  ;;  %v7138_v55 = vmax.f32 %v7136_v49, %v7137_v50 }
 0x42a   : > { %v6859_v27 = vadd.f32 %v11771_v6, %v6725_v52  ;;  %v5740_v33 = vadd.f32 %v11653_v59, %v5606_v1  ;;  %v6860_v26 = vadd.f32 %v11771_v6, %v6726_v40  ;;  %v7139_v41 = vsel %vm2771_vm3, %v6983_v47, -inf }
 0x42b   : > { %v5462_v13 = vpop.f32.mrf.mxu0  ;;  %v6985_v25 = vmax.f32 %v6857_v43, 0.0  ;;  %v5738_v38 = vadd.f32 %v11653_v59, %v5604_v30  ;;  %v6724_v9 = vmul.f32 %v11761_v62, %v6257_v46  ;;  %v7130_v48 = vrot.slane %v11863_v22, 4 }
 0x42c   : > { %v8977_v31 = vpop.f32.mrf.mxu1  ;;  %v6984_v16 = vmax.f32 %v6856_v15, 0.0  ;;  %v5868_v44 = vmax.f32 %v5740_v33, 0.0  ;;  %v5609_v39 = vmul.f32 %v11629_v63, %v8947_v0  ;;  %v5867_v21 = vmax.f32 %v5739_v5, 0.0 }
 0x42d   : > { %9072 = vmatmul.mubr.msk.bf16.gmra.mxu1 %vm5963_vm4, %v5932_v7  ;;  %v8948_v51 = vpop.f32.mrf.mxu0  ;;  %v5865_v34 = vmax.f32 %v5737_v24, 0.0  ;;  %v5866_v57 = vmax.f32 %v5738_v38, 0.0  ;;  %v6858_v10 = vadd.f32 %v11771_v6, %v6724_v9  ;;  %v7140_v36 = vmax.f32 %v7138_v55, %v7139_v41 }
 0x42e   : > { %v6270_v3 = vpop.f32.mrf.mxu1  ;;  %v6987_v42 = vmax.f32 %v6859_v27, 0.0  ;;  %v7149_v58 = vsel %vm2771_vm3, %v6985_v25, -inf  ;;  %v6988_v60 = vmax.f32 %v6860_v26, 0.0  ;;  %v6729_v2 = vmul.f32 %v8977_v31, %v11761_v62 }
 0x42f   : > { %v5465_v4 = vpop.f32.mrf.mxu0  ;;  %v5933_v19 = vpack.c.bf16 %v5866_v57, %v5865_v34  ;;  %v6986_v54 = vmax.f32 %v6858_v10, 0.0  ;;  %v5607_v61 = vmul.f32 %v11629_v63, %v5462_v13  ;;  %v5934_v0 = vpack.c.bf16 %v5868_v44, %v5867_v21 }
 0x430   : > { %v8978_v12 = vpop.f32.mrf.mxu1  ;;  %v5743_v11 = vadd.f32 %v11653_v59, %v5609_v39  ;;  %v6727_v18 = vmul.f32 %v11761_v62, %v6270_v3  ;;  %v5610_v35 = vmul.f32 %v11629_v63, %v8948_v51  ;;  %v5608_v47 = vmul.f32 %v11629_v63, %v5465_v4 }
 0x431   : > { %v7150_v29 = vsel %vm2771_vm3, %v6986_v54, -inf  ;;  %v5741_v8 = vadd.f32 %v11653_v59, %v5607_v61  ;;  %v6730_v46 = vmul.f32 %v8978_v12, %v11761_v62  ;;  %9075 = vmatprep.mubr.msk.bf16.mxu1 %vm5963_vm4, %v5933_v19  ;;  %v7141_v52 = vsel %vm2771_vm3, %v6984_v16, -inf }
 0x432   : > { %v6273_v28 = vpop.f32.mrf.mxu1  ;;  %v7152_v13 = vsel %vm2771_vm3, %v6987_v42, -inf  ;;  %v7151_v49 = vmax.f32 %v7149_v58, %v7150_v29  ;;  %v6861_v7 = vadd.f32 %v11771_v6, %v6727_v18  ;;  %v7142_v50 = vmax.f32 %v7140_v36, %v7141_v52 }
 0x433   : > { %v6863_v37 = vadd.f32 %v11771_v6, %v6729_v2  ;;  %v5744_v31 = vadd.f32 %v11653_v59, %v5610_v35  ;;  %v5742_v15 = vadd.f32 %v11653_v59, %v5608_v47  ;;  %v7154_v1 = vsel %vm2771_vm3, %v6988_v60, -inf }
 0x434   : > { %v7153_v40 = vmax.f32 %v7151_v49, %v7152_v13  ;;  %v5871_v5 = vmax.f32 %v5743_v11, 0.0  ;;  %v6864_v24 = vadd.f32 %v11771_v6, %v6730_v46  ;;  %v5869_v43 = vmax.f32 %v5741_v8, 0.0 }
 0x435   : > { %v8981_v23 = vpop.f32.mrf.mxu1  ;;  %9076 = vmatmul.mubr.msk.bf16.gmra.mxu1 %vm5963_vm4, %v5934_v0  ;;  %v5872_v30 = vmax.f32 %v5744_v31, 0.0  ;;  %v5870_v3 = vmax.f32 %v5742_v15, 0.0  ;;  %v6728_v55 = vmul.f32 %v11761_v62, %v6273_v28  ;;  %v6989_v26 = vmax.f32 %v6861_v7, 0.0 }
 0x436   : > { %v7155_v33 = vmax.f32 %v7153_v40, %v7154_v1  ;;  %v6733_v51 = vmul.f32 %v8981_v23, %v11761_v62  ;;  %v7143_v59 = vrot.slane %v7142_v50, 4  ;;  %v6991_v25 = vmax.f32 %v6863_v37, 0.0 }
 0x437   : > { %v6286_v17 = vpop.f32.mrf.mxu1  ;;  %v5935_v38 = vpack.c.bf16 %v5870_v3, %v5869_v43  ;;  %v6862_v9 = vadd.f32 %v11771_v6, %v6728_v55  ;;  %v5936_v16 = vpack.c.bf16 %v5872_v30, %v5871_v5  ;;  %v6992_v44 = vmax.f32 %v6864_v24, 0.0 }
 0x438   : > { %v6731_v41 = vmul.f32 %v11761_v62, %v6286_v17  ;;  %v7156_v34 = vrot.slane %v7155_v33, 4  ;;  %v6867_v10 = vadd.f32 %v11771_v6, %v6733_v51  ;;  %v7131_v42 = vmax.f32 %v11863_v22, %v7130_v48 }
 0x439   : > { %v8982_v63 = vpop.f32.mrf.mxu1  ;;  %v6990_v57 = vmax.f32 %v6862_v9, 0.0  ;;  %9079 = vmatprep.mubr.msk.bf16.mxu1 %vm5963_vm4, %v5935_v38  ;;  %v7162_v58 = vsel %vm2771_vm3, %v6989_v26, -inf  ;;  %v7144_v0 = vmax.f32 %v7142_v50, %v7143_v59  ;;  %v7165_v11 = vsel %vm2771_vm3, %v6991_v25, -inf }
 0x43a   : > { %v6865_v39 = vadd.f32 %v11771_v6, %v6731_v41  ;;  %v6734_v21 = vmul.f32 %v8982_v63, %v11761_v62  ;;  %v7167_v22 = vsel %vm2771_vm3, %v6992_v44, -inf  ;;  %v7157_v18 = vmax.f32 %v7155_v33, %v7156_v34 }
 0x43b   : > { %v6289_v27 = vpop.f32.mrf.mxu1  ;;  %v7163_v19 = vsel %vm2771_vm3, %v6990_v57, -inf  ;;  %v6995_v35 = vmax.f32 %v6867_v10, 0.0  ;;  %v7106_v5 = vrot.slane %v11845_v20, 2  ;;  %v7119_v24 = vrot.slane %v11857_v45, 2 }
 0x43c   : > { %v6732_v28 = vmul.f32 %v11761_v62, %v6289_v27  ;;  %v6993_v60 = vmax.f32 %v6865_v39, 0.0  ;;  %v6868_v54 = vadd.f32 %v11771_v6, %v6734_v21  ;;  %v7164_v48 = vmax.f32 %v7162_v58, %v7163_v19 }
 0x43d   : > { %v8985_v12 = vpop.f32.mrf.mxu1  ;;  %9080 = vmatmul.mubr.msk.bf16.gmra.mxu1 %vm5963_vm4, %v5936_v16  ;;  %v7132_v43 = vrot.slane %v7131_v42, 2  ;;  %v7178_v30 = vsel %vm2771_vm3, %v6995_v35, -inf  ;;  %v7145_v51 = vrot.slane %v7144_v0, 2  ;;  %v7158_v41 = vrot.slane %v7157_v18, 2 }
 0x43e   : > { %v6737_v4 = vmul.f32 %v8985_v12, %v11761_v62  ;;  %v6866_v2 = vadd.f32 %v11771_v6, %v6732_v28  ;;  %v7166_v47 = vmax.f32 %v7164_v48, %v7165_v11  ;;  %v7175_v49 = vsel %vm2771_vm3, %v6993_v60, -inf }
 0x43f   : > { %v6302_v36 = vpop.f32.mrf.mxu1  ;;  %v6996_v7 = vmax.f32 %v6868_v54, 0.0  ;;  %v7107_v39 = vmax.f32 %v11845_v20, %v7106_v5  ;;  %v7120_v21 = vmax.f32 %v11857_v45, %v7119_v24  ;;  %v7133_v10 = vmax.f32 %v7131_v42, %v7132_v43 }
 0x440   : > { %v6735_v61 = vmul.f32 %v11761_v62, %v6302_v36  ;;  %v6994_v29 = vmax.f32 %v6866_v2, 0.0  ;;  %v6871_v17 = vadd.f32 %v11771_v6, %v6737_v4  ;;  %v7168_v15 = vmax.f32 %v7166_v47, %v7167_v22 }
 0x441   : > { %v8986_v23 = vpop.f32.mrf.mxu1  ;;  %v7180_v59 = vsel %vm2771_vm3, %v6996_v7, -inf  ;;  %v7146_v60 = vmax.f32 %v7144_v0, %v7145_v51  ;;  %v7159_v2 = vmax.f32 %v7157_v18, %v7158_v41  ;;  %v7108_v48 = vrot.slane %v7107_v39, 1 }
 0x442   : > { %v6869_v8 = vadd.f32 %v11771_v6, %v6735_v61  ;;  %v6738_v52 = vmul.f32 %v8986_v23, %v11761_v62  ;;  %v7176_v50 = vsel %vm2771_vm3, %v6994_v29, -inf  ;;  %v7169_v55 = vrot.slane %v7168_v15, 4 }
 0x443   : > { %v6305_v46 = vpop.f32.mrf.mxu1  ;;  %v7177_v63 = vmax.f32 %v7175_v49, %v7176_v50  ;;  %v6999_v33 = vmax.f32 %v6871_v17, 0.0  ;;  %v7121_v23 = vrot.slane %v7120_v21, 1  ;;  %v7134_v45 = vrot.slane %v7133_v10, 1 }
 0x444   : > { %v6736_v13 = vmul.f32 %v11761_v62, %v6305_v46  ;;  %v6997_v37 = vmax.f32 %v6869_v8, 0.0  ;;  %v6872_v1 = vadd.f32 %v11771_v6, %v6738_v52  ;;  %v7170_v9 = vmax.f32 %v7168_v15, %v7169_v55 }
 0x445   : > { %v11930_v31 = vpop.f32.mrf.mxu1  ;;  %v7179_v27 = vmax.f32 %v7177_v63, %v7178_v30  ;;  %v7191_v36 = vsel %vm2771_vm3, %v6999_v33, -inf  ;;  %v7147_v29 = vrot.slane %v7146_v60, 1  ;;  %v7160_v46 = vrot.slane %v7159_v2, 1 }
 0x446   : > { %v6870_v40 = vadd.f32 %v11771_v6, %v6736_v13  ;;  %v7188_v25 = vsel %vm2771_vm3, %v6997_v37, -inf  ;;  %v7000_v16 = vmax.f32 %v6872_v1, 0.0  ;;  %v7171_v58 = vrot.slane %v7170_v9, 2 }
 0x447   : > { %v6318_v3 = vpop.f32.mrf.mxu1  ;;  %v7181_v12 = vmax.f32 %v7179_v27, %v7180_v59  ;;  %v7122_v47 = vmax.f32 %v7120_v21, %v7121_v23  ;;  %v7109_v49 = vmax.f32 %v7107_v39, %v7108_v48  ;;  %v7135_v7 = vmax.f32 %v7133_v10, %v7134_v45 }
 0x448   : > { %v6998_v26 = vmax.f32 %v6870_v40, 0.0  ;;  %v7193_v54 = vsel %vm2771_vm3, %v7000_v16, -inf  ;;  %v7172_v20 = vmax.f32 %v7170_v9, %v7171_v58  ;;  %v7148_v37 = vmax.f32 %v7146_v60, %v7147_v29 }
 0x449   : > { %v11939_v38 = vpop.f32.mrf.mxu1  ;;  %v7182_v28 = vrot.slane %v7181_v12, 4  ;;  %v7161_v1 = vmax.f32 %v7159_v2, %v7160_v46  ;;  %v6739_v40 = vmul.f32 %v11761_v62, %v6318_v3  ;;  %v7616_v30 = vsel %vm7545_vm5, %v7122_v47, %v7109_v49 }
 0x44a   : > { %v7189_v44 = vsel %vm2771_vm3, %v6998_v26, -inf  ;;  %v7173_v0 = vrot.slane %v7172_v20, 1  ;;  %v7617_v27 = vsel %vm7547_vm6, %v7135_v7, %v7616_v30  ;;  %v6741_v3 = vmul.f32 %v11930_v31, %v11761_v62 }
 0x44b   : > { %v7190_v34 = vmax.f32 %v7188_v25, %v7189_v44  ;;  %v6321_v57 = vpop.f32.mrf.mxu1  ;;  %v7183_v61 = vmax.f32 %v7181_v12, %v7182_v28  ;;  %v7618_v41 = vsel %vm7549_vm7, %v7148_v37, %v7617_v27  ;;  %v6873_v25 = vadd.f32 %v11771_v6, %v6739_v40 }
 0x44c   : > { %v6740_v18 = vmul.f32 %v11761_v62, %v6321_v57  ;;  %v7174_v24 = vmax.f32 %v7172_v20, %v7173_v0  ;;  %v7619_v59 = vsel %vm7551_vm8, %v7161_v1, %v7618_v41  ;;  %v6742_v57 = vmul.f32 %v11939_v38, %v11761_v62 }
 0x44d   : > { %v7192_v4 = vmax.f32 %v7190_v34, %v7191_v36  ;;  %v8993_v19 = vpop.f32.mrf.mxu1  ;;  %v7184_v42 = vrot.slane %v7183_v61, 2  ;;  %v6875_v31 = vadd.f32 %v11771_v6, %v6741_v3  ;;  %v7001_v28 = vmax.f32 %v6873_v25, 0.0 }
 0x44e   : > { %v6874_v33 = vadd.f32 %v11771_v6, %v6740_v18  ;;  %v7620_v16 = vsel %vm7553_vm9, %v7174_v24, %v7619_v59  ;;  %v6745_v10 = vmul.f32 %v8993_v19, %v11761_v62  ;;  %v6876_v38 = vadd.f32 %v11771_v6, %v6742_v57 }
 0x44f   : > { %v7194_v11 = vmax.f32 %v7192_v4, %v7193_v54  ;;  %v6334_v22 = vpop.f32.mrf.mxu1  ;;  %v7185_v52 = vmax.f32 %v7183_v61, %v7184_v42  ;;  %v7003_v23 = vmax.f32 %v6875_v31, 0.0 }
 0x450   : > { %v7002_v39 = vmax.f32 %v6874_v33, 0.0  ;;  %v6743_v36 = vmul.f32 %v11761_v62, %v6334_v22  ;;  %v6879_v19 = vadd.f32 %v11771_v6, %v6745_v10  ;;  %v7004_v46 = vmax.f32 %v6876_v38, 0.0 }
 0x451   : > { %v8994_v35 = vpop.f32.mrf.mxu1  ;;  %v7195_v8 = vrot.slane %v7194_v11, 4  ;;  %v7186_v15 = vrot.slane %v7185_v52, 1 }
 0x452   : > { %v6746_v4 = vmul.f32 %v8994_v35, %v11761_v62  ;;  %v7202_v54 = vsel %vm2771_vm3, %v7002_v39, -inf  ;;  %v6877_v20 = vadd.f32 %v11771_v6, %v6743_v36  ;;  %v7007_v47 = vmax.f32 %v6879_v19, 0.0 }
 0x453   : > { %v6337_v17 = vpop.f32.mrf.mxu1  ;;  %v7196_v13 = vmax.f32 %v7194_v11, %v7195_v8  ;;  %v7187_v55 = vmax.f32 %v7185_v52, %v7186_v15  ;;  %v7201_v11 = vsel %vm2771_vm3, %v7001_v28, -inf  ;;  %v7204_v52 = vsel %vm2771_vm3, %v7003_v23, -inf }
 0x454   : > { %v6744_v58 = vmul.f32 %v11761_v62, %v6337_v17  ;;  %v7203_v45 = vmax.f32 %v7201_v11, %v7202_v54  ;;  %v6880_v35 = vadd.f32 %v11771_v6, %v6746_v4  ;;  %v7206_v24 = vsel %vm2771_vm3, %v7004_v46, -inf }
 0x455   : > { %v8997_v50 = vpop.f32.mrf.mxu1  ;;  %v7197_v63 = vrot.slane %v7196_v13, 2  ;;  %v7621_v44 = vsel %vm7555_vm10, %v7187_v55, %v7620_v16 }
 0x456   : > { %v6878_v22 = vadd.f32 %v11771_v6, %v6744_v58  ;;  %v6749_v29 = vmul.f32 %v8997_v50, %v11761_v62  ;;  %v7205_v37 = vmax.f32 %v7203_v45, %v7204_v52  ;;  %v7008_v15 = vmax.f32 %v6880_v35, 0.0 }
 0x457   : > { %v6350_v5 = vpop.f32.mrf.mxu1  ;;  %v7198_v43 = vmax.f32 %v7196_v13, %v7197_v63  ;;  %v7005_v13 = vmax.f32 %v6877_v20, 0.0 }
 0x458   : > { %v6747_v42 = vmul.f32 %v11761_v62, %v6350_v5  ;;  %v7006_v49 = vmax.f32 %v6878_v22, 0.0  ;;  %v6883_v63 = vadd.f32 %v11771_v6, %v6749_v29  ;;  %v11994_v3 = vmax.f32 %v7205_v37, %v7206_v24 }
 0x459   : > { %v11951_v26 = vpop.f32.mrf.mxu1  ;;  %v7199_v51 = vrot.slane %v7198_v43, 1  ;;  %v7214_v27 = vsel %vm2771_vm3, %v7005_v13, -inf  ;;  %v11997_v25 = vsel %vm2771_vm3, %v7008_v15, -inf }
 0x45a   : > { %v6881_v1 = vadd.f32 %v11771_v6, %v6747_v42  ;;  %v7215_v33 = vsel %vm2771_vm3, %v7006_v49, -inf  ;;  %v7011_v16 = vmax.f32 %v6883_v63, 0.0  ;;  %v6750_v39 = vmul.f32 %v11951_v26, %v11761_v62 }
 0x45b   : > { %v6353_v9 = vpop.f32.mrf.mxu1  ;;  %v7200_v12 = vmax.f32 %v7198_v43, %v7199_v51  ;;  %v7217_v43 = vsel %vm2771_vm3, %v7007_v47, -inf  ;;  %v7216_v57 = vmax.f32 %v7214_v27, %v7215_v33 }
 0x45c   : > { %v6748_v61 = vmul.f32 %v11761_v62, %v6353_v9  ;;  %v7230_v23 = vsel %vm2771_vm3, %v7011_v16, -inf  ;;  %v6884_v20 = vadd.f32 %v11771_v6, %v6750_v39 }
 0x45d   : > { %v9001_v21 = vpop.f32.mrf.mxu1  ;;  %v7622_v34 = vsel %vm7557_vm11, %v7200_v12, %v7621_v44  ;;  %v7009_v44 = vmax.f32 %v6881_v1, 0.0  ;;  %v7218_v63 = vmax.f32 %v7216_v57, %v7217_v43 }
 0x45e   : > { %7644 = vrot.lane.b32.xlu0 %v7622_v34, %s9313_s30  ;;  %v6882_v17 = vadd.f32 %v11771_v6, %v6748_v61  ;;  %v6753_v40 = vmul.f32 %v9001_v21, %v11761_v62 }
 0x45f   : > { %v6366_v60 = vpop.f32.mrf.mxu1  ;;  %v7227_v11 = vsel %vm2771_vm3, %v7009_v44, -inf }
 0x460   : > { %v6751_v7 = vmul.f32 %v11761_v62, %v6366_v60  ;;  %v7010_v30 = vmax.f32 %v6882_v17, 0.0  ;;  %v6887_v21 = vadd.f32 %v11771_v6, %v6753_v40 }
 0x461   : > { %v9002_v2 = vpop.f32.mrf.mxu1 }
 0x462   : > { %v6885_v51 = vadd.f32 %v11771_v6, %v6751_v7  ;;  %v7228_v10 = vsel %vm2771_vm3, %v7010_v30, -inf  ;;  %v6754_v58 = vmul.f32 %v9002_v2, %v11761_v62  ;;  %v7015_v22 = vmax.f32 %v6887_v21, 0.0 }
 0x463   : > { %v6369_v48 = vpop.f32.mrf.mxu1  ;;  %v7229_v42 = vmax.f32 %v7227_v11, %v7228_v10  ;;  %v7012_v7 = vmax.f32 %v6884_v20, 0.0 }
 0x464   : > { %v6752_v0 = vmul.f32 %v11761_v62, %v6369_v48  ;;  %v7013_v36 = vmax.f32 %v6885_v51, 0.0  ;;  %v7243_v1 = vsel %vm2771_vm3, %v7015_v22, -inf }
 0x465   : > { %v9005_v8 = vpop.f32.mrf.mxu1  ;;  %v7231_v24 = vmax.f32 %v7229_v42, %v7230_v23  ;;  %v7232_v43 = vsel %vm2771_vm3, %v7012_v7, -inf }
 0x466   : > { %v6886_v55 = vadd.f32 %v11771_v6, %v6752_v0  ;;  %v6757_v41 = vmul.f32 %v9005_v8, %v11761_v62  ;;  %v6888_v8 = vadd.f32 %v11771_v6, %v6754_v58  ;;  %v7240_v0 = vsel %vm2771_vm3, %v7013_v36, -inf }
 0x467   : > { %v6382_v18 = vpop.f32.mrf.mxu1 }
 0x468   : > { %v6755_v50 = vmul.f32 %v11761_v62, %v6382_v18  ;;  %v7014_v31 = vmax.f32 %v6886_v55, 0.0  ;;  %v6891_v60 = vadd.f32 %v11771_v6, %v6757_v41  ;;  %v7016_v30 = vmax.f32 %v6888_v8, 0.0 }
 0x469   : > { %v9006_v5 = vpop.f32.mrf.mxu1 }
 0x46a   : > { %v6889_v9 = vadd.f32 %v11771_v6, %v6755_v50  ;;  %v6758_v4 = vmul.f32 %v9006_v5, %v11761_v62  ;;  %v7241_v2 = vsel %vm2771_vm3, %v7014_v31, -inf  ;;  %v7019_v46 = vmax.f32 %v6891_v60, 0.0 }
 0x46b   : > { %v6385_v59 = vpop.f32.mrf.mxu1  ;;  %v7242_v18 = vmax.f32 %v7240_v0, %v7241_v2  ;;  %v7220_v31 = vmax.f32 %v7218_v63, %v11997_v25  ;;  %v7245_v36 = vsel %vm2771_vm3, %v7016_v30, -inf }
 0x46c   : > { %v6756_v12 = vmul.f32 %v11761_v62, %v6385_v59  ;;  %v7017_v38 = vmax.f32 %v6889_v9, 0.0  ;;  %v6892_v47 = vadd.f32 %v11771_v6, %v6758_v4  ;;  %v7256_v55 = vsel %vm2771_vm3, %v7019_v46, -inf }
 0x46d   : > { %v9009_v34 = vpop.f32.mrf.mxu1  ;;  %v7221_v2 = vrot.slane %v7220_v31, 4 }
 0x46e   : > { %v6890_v28 = vadd.f32 %v11771_v6, %v6756_v12  ;;  %v6761_v26 = vmul.f32 %v9009_v34, %v11761_v62  ;;  %v7253_v52 = vsel %vm2771_vm3, %v7017_v38, -inf  ;;  %v7020_v27 = vmax.f32 %v6892_v47, 0.0 }
 0x46f   : > { %v6398_v54 = vpop.f32.mrf.mxu1  ;;  %v7244_v12 = vmax.f32 %v7242_v18, %v7243_v1  ;;  %v12057_v18 = vld [vmem:[%s12415_s19] ss:$0 sm:$0xff] }
 0x470   : > { %v7018_v19 = vmax.f32 %v6890_v28, 0.0  ;;  %v6759_v61 = vmul.f32 %v11761_v62, %v6398_v54  ;;  %v6895_v13 = vadd.f32 %v11771_v6, %v6761_v26  ;;  %v7233_v28 = vmax.f32 %v7231_v24, %v7232_v43 }
 0x471   : > { %v9010_v48 = vpop.f32.mrf.mxu1  ;;  %v7258_v4 = vsel %vm2771_vm3, %v7020_v27, -inf  ;;  %v7246_v26 = vmax.f32 %v7244_v12, %v7245_v36 }
 0x472   : > { %v7254_v45 = vsel %vm2771_vm3, %v7018_v19, -inf  ;;  %v6893_v35 = vadd.f32 %v11771_v6, %v6759_v61  ;;  %v6762_v29 = vmul.f32 %v9010_v48, %v11761_v62  ;;  %v7023_v51 = vmax.f32 %v6895_v13, 0.0 }
 0x473   : > { %v6401_v17 = vpop.f32.mrf.mxu1  ;;  %v7255_v37 = vmax.f32 %v7253_v52, %v7254_v45  ;;  %v7234_v45 = vrot.slane %v7233_v28, 4  ;;  %v7247_v0 = vrot.slane %v7246_v26, 4 }
 0x474   : > { %v6760_v49 = vmul.f32 %v11761_v62, %v6401_v17  ;;  %v7021_v15 = vmax.f32 %v6893_v35, 0.0  ;;  %v6896_v40 = vadd.f32 %v11771_v6, %v6762_v29  ;;  %v7269_v54 = vsel %vm2771_vm3, %v7023_v51, -inf }
 0x475   : > { %v9013_v50 = vpop.f32.mrf.mxu1  ;;  %v7257_v16 = vmax.f32 %v7255_v37, %v7256_v55  ;;  %v7208_v17 = vrot.slane %v11994_v3, 4 }
 0x476   : > { %v6894_v5 = vadd.f32 %v11771_v6, %v6760_v49  ;;  %v6765_v59 = vmul.f32 %v9013_v50, %v11761_v62  ;;  %v7266_v44 = vsel %vm2771_vm3, %v7021_v15, -inf  ;;  %v7024_v21 = vmax.f32 %v6896_v40, 0.0 }
 0x477   : > { %v6414_v33 = vpop.f32.mrf.mxu1  ;;  %v7259_v61 = vmax.f32 %v7257_v16, %v7258_v4  ;;  %v7222_v50 = vmax.f32 %v7220_v31, %v7221_v2  ;;  %v7209_v27 = vmax.f32 %v11994_v3, %v7208_v17 }
 0x478   : > { %v7022_v41 = vmax.f32 %v6894_v5, 0.0  ;;  %v6763_v9 = vmul.f32 %v11761_v62, %v6414_v33  ;;  %v6899_v38 = vadd.f32 %v11771_v6, %v6765_v59  ;;  %v7271_v25 = vsel %vm2771_vm3, %v7024_v21, -inf }
 0x479   : > { %v9014_v39 = vpop.f32.mrf.mxu1  ;;  %v7260_v52 = vrot.slane %v7259_v61, 4  ;;  %v7235_v5 = vmax.f32 %v7233_v28, %v7234_v45  ;;  %v7248_v33 = vmax.f32 %v7246_v26, %v7247_v0  ;;  %v7210_v3 = vrot.slane %v7209_v27, 2 }
 0x47a   : > { %v7267_v34 = vsel %vm2771_vm3, %v7022_v41, -inf  ;;  %v6897_v57 = vadd.f32 %v11771_v6, %v6763_v9  ;;  %v6766_v10 = vmul.f32 %v9014_v39, %v11761_v62  ;;  %v7027_v42 = vmax.f32 %v6899_v38, 0.0 }
 0x47b   : > { %v7268_v58 = vmax.f32 %v7266_v44, %v7267_v34  ;;  %v6417_v60 = vpop.f32.mrf.mxu1  ;;  %v7261_v51 = vmax.f32 %v7259_v61, %v7260_v52  ;;  %v7223_v44 = vrot.slane %v7222_v50, 2  ;;  %v7249_v28 = vrot.slane %v7248_v33, 2 }
 0x47c   : > { %v6764_v19 = vmul.f32 %v11761_v62, %v6417_v60  ;;  %v7025_v11 = vmax.f32 %v6897_v57, 0.0  ;;  %v6900_v22 = vadd.f32 %v11771_v6, %v6766_v10  ;;  %v12047_v62 = vld [vmem:[%s12414_s18] ss:$0 sm:$0xff]  ;;  %v7282_v24 = vsel %vm2771_vm3, %v7027_v42, -inf }
 0x47d   : > { %v7270_v23 = vmax.f32 %v7268_v58, %v7269_v54  ;;  %v9017_v20 = vpop.f32.mrf.mxu1  ;;  %v7236_v57 = vrot.slane %v7235_v5, 2  ;;  %v7262_v60 = vrot.slane %v7261_v51, 2 }
 0x47e   : > { %v6898_v48 = vadd.f32 %v11771_v6, %v6764_v19  ;;  %v6769_v46 = vmul.f32 %v12047_v62, %v9017_v20  ;;  %v7279_v6 = vsel %vm2771_vm3, %v7025_v11, -inf  ;;  %v7028_v49 = vmax.f32 %v6900_v22, 0.0 }
 0x47f   : > { %v7272_v35 = vmax.f32 %v7270_v23, %v7271_v25  ;;  %v6430_v29 = vpop.f32.mrf.mxu1  ;;  %v7224_v19 = vmax.f32 %v7222_v50, %v7223_v44  ;;  %v7237_v20 = vmax.f32 %v7235_v5, %v7236_v57  ;;  %v7211_v22 = vmax.f32 %v7209_v27, %v7210_v3 }
 0x480   : > { %v7026_v8 = vmax.f32 %v6898_v48, 0.0  ;;  %v6767_v47 = vmul.f32 %v12047_v62, %v6430_v29  ;;  %v6903_v30 = vadd.f32 %v12057_v18, %v6769_v46  ;;  %v7284_v9 = vsel %vm2771_vm3, %v7028_v49, -inf }
 0x481   : > { %v9018_v13 = vpop.f32.mrf.mxu1  ;;  %v7273_v63 = vrot.slane %v7272_v35, 4  ;;  %v7250_v48 = vmax.f32 %v7248_v33, %v7249_v28  ;;  %v7263_v29 = vmax.f32 %v7261_v51, %v7262_v60  ;;  %v7238_v0 = vrot.slane %v7237_v20, 1 }
 0x482   : > { %v7280_v7 = vsel %vm2771_vm3, %v7026_v8, -inf  ;;  %v6901_v37 = vadd.f32 %v12057_v18, %v6767_v47  ;;  %v6770_v15 = vmul.f32 %v12047_v62, %v9018_v13  ;;  %v7031_v10 = vmax.f32 %v6903_v30, 0.0 }
 0x483   : > { %v7281_v1 = vmax.f32 %v7279_v6, %v7280_v7  ;;  %v6433_v40 = vpop.f32.mrf.mxu1  ;;  %v7274_v39 = vmax.f32 %v7272_v35, %v7273_v63  ;;  %v7225_v8 = vrot.slane %v7224_v19, 1  ;;  %v7212_v6 = vrot.slane %v7211_v22, 1 }
 0x484   : > { %v6768_v55 = vmul.f32 %v12047_v62, %v6433_v40  ;;  %v7029_v43 = vmax.f32 %v6901_v37, 0.0  ;;  %v6904_v12 = vadd.f32 %v12057_v18, %v6770_v15  ;;  %v7295_v25 = vsel %vm2771_vm3, %v7031_v10, -inf }
 0x485   : > { %v7283_v41 = vmax.f32 %v7281_v1, %v7282_v24  ;;  %v12065_v59 = vpop.f32.mrf.mxu1  ;;  %v7275_v26 = vrot.slane %v7274_v39, 2  ;;  %v7251_v13 = vrot.slane %v7250_v48, 1  ;;  %v7264_v37 = vrot.slane %v7263_v29, 1 }
 0x486   : > { %v6902_v16 = vadd.f32 %v12057_v18, %v6768_v55  ;;  %v7292_v4 = vsel %vm2771_vm3, %v7029_v43, -inf  ;;  %v7032_v54 = vmax.f32 %v6904_v12, 0.0  ;;  %v7226_v15 = vmax.f32 %v7224_v19, %v7225_v8 }
 0x487   : > { %v7285_v21 = vmax.f32 %v7283_v41, %v7284_v9  ;;  %v6446_v34 = vpop.f32.mrf.mxu1  ;;  %v7276_v17 = vmax.f32 %v7274_v39, %v7275_v26  ;;  %v7239_v40 = vmax.f32 %v7237_v20, %v7238_v0  ;;  %v7213_v24 = vmax.f32 %v7211_v22, %v7212_v6 }
 0x488   : > { %v7030_v31 = vmax.f32 %v6902_v16, 0.0  ;;  %v7297_v42 = vsel %vm2771_vm3, %v7032_v54, -inf  ;;  %v7252_v27 = vmax.f32 %v7250_v48, %v7251_v13  ;;  %v7265_v51 = vmax.f32 %v7263_v29, %v7264_v37 }
 0x489   : > { %v7286_v36 = vrot.slane %v7285_v21, 4  ;;  %v12070_v58 = vpop.f32.mrf.mxu1  ;;  %v7277_v63 = vrot.slane %v7276_v17, 1  ;;  %v6771_v41 = vmul.f32 %v12047_v62, %v6446_v34  ;;  %v7623_v16 = vsel %vm7545_vm5, %v7226_v15, %v7213_v24 }
 0x48a   : > { %v7293_v38 = vsel %vm2771_vm3, %v7030_v31, -inf  ;;  %v7624_v39 = vsel %vm7547_vm6, %v7239_v40, %v7623_v16  ;;  %v6773_v34 = vmul.f32 %v12047_v62, %v12065_v59 }
 0x48b   : > { %v7287_v61 = vmax.f32 %v7285_v21, %v7286_v36  ;;  %v7294_v23 = vmax.f32 %v7292_v4, %v7293_v38  ;;  %v6449_v11 = vpop.f32.mrf.mxu1  ;;  %v7278_v43 = vmax.f32 %v7276_v17, %v7277_v63  ;;  %v7625_v31 = vsel %vm7549_vm7, %v7252_v27, %v7624_v39 }
 0x48c   : > { %v6772_v30 = vmul.f32 %v12047_v62, %v6449_v11  ;;  %v7626_v3 = vsel %vm7551_vm8, %v7265_v51, %v7625_v31  ;;  %v6905_v28 = vadd.f32 %v12057_v18, %v6771_v41  ;;  %v6907_v59 = vadd.f32 %v12057_v18, %v6773_v34 }
 0x48d   : > { %v7296_v2 = vmax.f32 %v7294_v23, %v7295_v25  ;;  %v9025_v45 = vpop.f32.mrf.mxu1  ;;  %v7288_v35 = vrot.slane %v7287_v61, 2  ;;  %v7627_v4 = vsel %vm7553_vm9, %v7278_v43, %v7626_v3 }
 0x48e   : > { %v6906_v21 = vadd.f32 %v12057_v18, %v6772_v30  ;;  %v6777_v23 = vmul.f32 %v12047_v62, %v9025_v45  ;;  %v7033_v11 = vmax.f32 %v6905_v28, 0.0 }
 0x48f   : > { %v7298_v46 = vmax.f32 %v7296_v2, %v7297_v42  ;;  %v6462_v47 = vpop.f32.mrf.mxu1  ;;  %v7289_v52 = vmax.f32 %v7287_v61, %v7288_v35  ;;  %v6774_v61 = vmul.f32 %v12047_v62, %v12070_v58  ;;  %v7035_v42 = vmax.f32 %v6907_v59, 0.0 }
 0x490   : > { %v7034_v38 = vmax.f32 %v6906_v21, 0.0  ;;  %v6775_v20 = vmul.f32 %v12047_v62, %v6462_v47  ;;  %v6911_v58 = vadd.f32 %v12057_v18, %v6777_v23  ;;  %v7305_v8 = vsel %vm2771_vm3, %v7033_v11, -inf }
 0x491   : > { %v7299_v49 = vrot.slane %v7298_v46, 4  ;;  %v9026_v7 = vpop.f32.mrf.mxu1  ;;  %v7290_v5 = vrot.slane %v7289_v52, 1  ;;  %v6908_v29 = vadd.f32 %v12057_v18, %v6774_v61  ;;  %v7308_v63 = vsel %vm2771_vm3, %v7035_v42, -inf }
 0x492   : > { %v6778_v48 = vmul.f32 %v12047_v62, %v9026_v7  ;;  %v7306_v2 = vsel %vm2771_vm3, %v7034_v38, -inf  ;;  %v7039_v37 = vmax.f32 %v6911_v58, 0.0 }
 0x493   : > { %v6465_v50 = vpop.f32.mrf.mxu1  ;;  %v7300_v1 = vmax.f32 %v7298_v46, %v7299_v49  ;;  %v7291_v44 = vmax.f32 %v7289_v52, %v7290_v5  ;;  %v6909_v46 = vadd.f32 %v12057_v18, %v6775_v20  ;;  %v7307_v0 = vmax.f32 %v7305_v8, %v7306_v2 }
 0x494   : > { %v6776_v25 = vmul.f32 %v12047_v62, %v6465_v50  ;;  %v6912_v52 = vadd.f32 %v12057_v18, %v6778_v48  ;;  %v7036_v7 = vmax.f32 %v6908_v29, 0.0 }
 0x495   : > { %v9029_v55 = vpop.f32.mrf.mxu1  ;;  %v7301_v33 = vrot.slane %v7300_v1, 2  ;;  %v7628_v54 = vsel %vm7555_vm10, %v7291_v44, %v7627_v4  ;;  %v7309_v30 = vmax.f32 %v7307_v0, %v7308_v63 }
 0x496   : > { %v6910_v47 = vadd.f32 %v12057_v18, %v6776_v25  ;;  %v6781_v6 = vmul.f32 %v12047_v62, %v9029_v55  ;;  %v7040_v27 = vmax.f32 %v6912_v52, 0.0  ;;  %v7310_v43 = vsel %vm2771_vm3, %v7036_v7, -inf }
 0x497   : > { %v6478_v9 = vpop.f32.mrf.mxu1  ;;  %v7302_v12 = vmax.f32 %v7300_v1, %v7301_v33  ;;  %v7037_v1 = vmax.f32 %v6909_v46, 0.0  ;;  %v12124_v34 = vmax.f32 %v7309_v30, %v7310_v43 }
 0x498   : > { %v6779_v13 = vmul.f32 %v12047_v62, %v6478_v9  ;;  %v7038_v40 = vmax.f32 %v6910_v47, 0.0  ;;  %v6915_v33 = vadd.f32 %v12057_v18, %v6781_v6  ;;  %v12127_v28 = vsel %vm2771_vm3, %v7040_v27, -inf }
 0x499   : > { %v12081_v57 = vpop.f32.mrf.mxu1  ;;  %v7303_v10 = vrot.slane %v7302_v12, 1  ;;  %v7318_v39 = vsel %vm2771_vm3, %v7037_v1, -inf }
 0x49a   : > { %v6913_v51 = vadd.f32 %v12057_v18, %v6779_v13  ;;  %v7319_v21 = vsel %vm2771_vm3, %v7038_v40, -inf  ;;  %v7043_v4 = vmax.f32 %v6915_v33, 0.0  ;;  %v6782_v38 = vmul.f32 %v12047_v62, %v12081_v57 }
 0x49b   : > { %v6481_v36 = vpop.f32.mrf.mxu1  ;;  %v7304_v60 = vmax.f32 %v7302_v12, %v7303_v10  ;;  %v7321_v12 = vsel %vm2771_vm3, %v7039_v37, -inf  ;;  %v7320_v61 = vmax.f32 %v7318_v39, %v7319_v21 }
 0x49c   : > { %v6780_v45 = vmul.f32 %v12047_v62, %v6481_v36  ;;  %v7334_v42 = vsel %vm2771_vm3, %v7043_v4, -inf  ;;  %v6916_v46 = vadd.f32 %v12057_v18, %v6782_v38 }
 0x49d   : > { %v9033_v19 = vpop.f32.mrf.mxu1  ;;  %v7629_v26 = vsel %vm7557_vm11, %v7304_v60, %v7628_v54  ;;  %v7041_v54 = vmax.f32 %v6913_v51, 0.0  ;;  %v7322_v33 = vmax.f32 %v7320_v61, %v7321_v12 }
 0x49e   : > { %7646 = vrot.lane.b32.xlu0 %v7629_v26, %s9313_s30  ;;  %v6914_v15 = vadd.f32 %v12057_v18, %v6780_v45  ;;  %v6785_v41 = vmul.f32 %v12047_v62, %v9033_v19 }
 0x49f   : > { %v6494_v22 = vpop.f32.mrf.mxu1  ;;  %v7331_v8 = vsel %vm2771_vm3, %v7041_v54, -inf }
 0x4a0   : > { %v6783_v5 = vmul.f32 %v12047_v62, %v6494_v22  ;;  %v7042_v16 = vmax.f32 %v6914_v15, 0.0  ;;  %v6919_v19 = vadd.f32 %v12057_v18, %v6785_v41 }
 0x4a1   : > { %v9034_v35 = vpop.f32.mrf.mxu1 }
 0x4a2   : > { %v6917_v10 = vadd.f32 %v12057_v18, %v6783_v5  ;;  %v7332_v23 = vsel %vm2771_vm3, %v7042_v16, -inf  ;;  %v6786_v25 = vmul.f32 %v12047_v62, %v9034_v35  ;;  %v7047_v47 = vmax.f32 %v6919_v19, 0.0 }
 0x4a3   : > { %v6497_v17 = vpop.f32.mrf.mxu1  ;;  %v7333_v13 = vmax.f32 %v7331_v8, %v7332_v23  ;;  %v7044_v5 = vmax.f32 %v6916_v46, 0.0 }
 0x4a4   : > { %v6784_v50 = vmul.f32 %v12047_v62, %v6497_v17  ;;  %v7045_v20 = vmax.f32 %v6917_v10, 0.0  ;;  %v7347_v51 = vsel %vm2771_vm3, %v7047_v47, -inf }
 0x4a5   : > { %v9037_v49 = vpop.f32.mrf.mxu1  ;;  %v7335_v43 = vmax.f32 %v7333_v13, %v7334_v42  ;;  %v7336_v12 = vsel %vm2771_vm3, %v7044_v5, -inf }
 0x4a6   : > { %v6918_v44 = vadd.f32 %v12057_v18, %v6784_v50  ;;  %v6789_v31 = vmul.f32 %v12047_v62, %v9037_v49  ;;  %v6920_v49 = vadd.f32 %v12057_v18, %v6786_v25  ;;  %v7344_v50 = vsel %vm2771_vm3, %v7045_v20, -inf }
 0x4a7   : > { %v6510_v24 = vpop.f32.mrf.mxu1 }
 0x4a8   : > { %v6787_v55 = vmul.f32 %v12047_v62, %v6510_v24  ;;  %v7046_v59 = vmax.f32 %v6918_v44, 0.0  ;;  %v6923_v22 = vadd.f32 %v12057_v18, %v6789_v31  ;;  %v7048_v16 = vmax.f32 %v6920_v49, 0.0 }
 0x4a9   : > { %v9038_v9 = vpop.f32.mrf.mxu1 }
 0x4aa   : > { %v6921_v36 = vadd.f32 %v12057_v18, %v6787_v55  ;;  %v6790_v48 = vmul.f32 %v12047_v62, %v9038_v9  ;;  %v7345_v35 = vsel %vm2771_vm3, %v7046_v59, -inf  ;;  %v7051_v7 = vmax.f32 %v6923_v22, 0.0 }
 0x4ab   : > { %v6513_v3 = vpop.f32.mrf.mxu1  ;;  %v7346_v24 = vmax.f32 %v7344_v50, %v7345_v35  ;;  %v7324_v59 = vmax.f32 %v7322_v33, %v12127_v28  ;;  %v7349_v20 = vsel %vm2771_vm3, %v7048_v16, -inf }
 0x4ac   : > { %v6788_v60 = vmul.f32 %v12047_v62, %v6513_v3  ;;  %v7049_v29 = vmax.f32 %v6921_v36, 0.0  ;;  %v6924_v37 = vadd.f32 %v12057_v18, %v6790_v48  ;;  %v7360_v44 = vsel %vm2771_vm3, %v7051_v7, -inf }
 0x4ad   : > { %v9041_v26 = vpop.f32.mrf.mxu1  ;;  %v7325_v35 = vrot.slane %v7324_v59, 4 }
 0x4ae   : > { %v6922_v11 = vadd.f32 %v12057_v18, %v6788_v60  ;;  %v6793_v57 = vmul.f32 %v12047_v62, %v9041_v26  ;;  %v7357_v63 = vsel %vm2771_vm3, %v7049_v29, -inf  ;;  %v7052_v39 = vmax.f32 %v6924_v37, 0.0 }
 0x4af   : > { %v6526_v2 = vpop.f32.mrf.mxu1  ;;  %v7348_v60 = vmax.f32 %v7346_v24, %v7347_v51 }
 0x4b0   : > { %v7050_v58 = vmax.f32 %v6922_v11, 0.0  ;;  %v6791_v45 = vmul.f32 %v12047_v62, %v6526_v2  ;;  %v6927_v1 = vadd.f32 %v12057_v18, %v6793_v57  ;;  %v7337_v11 = vmax.f32 %v7335_v43, %v7336_v12 }
 0x4b1   : > { %v9042_v17 = vpop.f32.mrf.mxu1  ;;  %v7362_v48 = vsel %vm2771_vm3, %v7052_v39, -inf  ;;  %v7350_v57 = vmax.f32 %v7348_v60, %v7349_v20 }
 0x4b2   : > { %v7358_v0 = vsel %vm2771_vm3, %v7050_v58, -inf  ;;  %v6925_v52 = vadd.f32 %v12057_v18, %v6791_v45  ;;  %v6794_v6 = vmul.f32 %v12047_v62, %v9042_v17  ;;  %v7055_v10 = vmax.f32 %v6927_v1, 0.0 }
 0x4b3   : > { %v6529_v15 = vpop.f32.mrf.mxu1  ;;  %v7359_v30 = vmax.f32 %v7357_v63, %v7358_v0  ;;  %v7338_v0 = vrot.slane %v7337_v11, 4  ;;  %v7351_v50 = vrot.slane %v7350_v57, 4 }
 0x4b4   : > { %v6792_v40 = vmul.f32 %v12047_v62, %v6529_v15  ;;  %v7053_v27 = vmax.f32 %v6925_v52, 0.0  ;;  %v6928_v41 = vadd.f32 %v12057_v18, %v6794_v6  ;;  %v7373_v2 = vsel %vm2771_vm3, %v7055_v10, -inf }
 0x4b5   : > { %v9045_v55 = vpop.f32.mrf.mxu1  ;;  %v7361_v4 = vmax.f32 %v7359_v30, %v7360_v44  ;;  %v7312_v15 = vrot.slane %v12124_v34, 4 }
 0x4b6   : > { %v6926_v9 = vadd.f32 %v12057_v18, %v6792_v40  ;;  %v6797_v3 = vmul.f32 %v12047_v62, %v9045_v55  ;;  %v7370_v54 = vsel %vm2771_vm3, %v7053_v27, -inf  ;;  %v7056_v19 = vmax.f32 %v6928_v41, 0.0 }
 0x4b7   : > { %v6542_v21 = vpop.f32.mrf.mxu1  ;;  %v7363_v45 = vmax.f32 %v7361_v4, %v7362_v48  ;;  %v7326_v55 = vmax.f32 %v7324_v59, %v7325_v35  ;;  %v7313_v39 = vmax.f32 %v12124_v34, %v7312_v15 }
 0x4b8   : > { %v7054_v31 = vmax.f32 %v6926_v9, 0.0  ;;  %v6795_v36 = vmul.f32 %v12047_v62, %v6542_v21  ;;  %v6931_v29 = vadd.f32 %v12057_v18, %v6797_v3  ;;  %v7375_v28 = vsel %vm2771_vm3, %v7056_v19, -inf }
 0x4b9   : > { %v9046_v38 = vpop.f32.mrf.mxu1  ;;  %v7364_v63 = vrot.slane %v7363_v45, 4  ;;  %v7339_v9 = vmax.f32 %v7337_v11, %v7338_v0  ;;  %v7352_v21 = vmax.f32 %v7350_v57, %v7351_v50  ;;  %v7314_v59 = vrot.slane %v7313_v39, 2 }
 0x4ba   : > { %v7371_v26 = vsel %vm2771_vm3, %v7054_v31, -inf  ;;  %v6929_v61 = vadd.f32 %v12057_v18, %v6795_v36  ;;  %v6798_v23 = vmul.f32 %v12047_v62, %v9046_v38  ;;  %v7059_v13 = vmax.f32 %v6931_v29, 0.0 }
 0x4bb   : > { %v7372_v25 = vmax.f32 %v7370_v54, %v7371_v26  ;;  %v6545_v22 = vpop.f32.mrf.mxu1  ;;  %v7365_v10 = vmax.f32 %v7363_v45, %v7364_v63  ;;  %v7327_v54 = vrot.slane %v7326_v55, 2  ;;  %v7353_v11 = vrot.slane %v7352_v21, 2 }
 0x4bc   : > { %v6796_v58 = vmul.f32 %v12047_v62, %v6545_v22  ;;  %v7057_v8 = vmax.f32 %v6929_v61, 0.0  ;;  %v6932_v47 = vadd.f32 %v12057_v18, %v6798_v23  ;;  %v7386_v43 = vsel %vm2771_vm3, %v7059_v13, -inf }
 0x4bd   : > { %v7374_v42 = vmax.f32 %v7372_v25, %v7373_v2  ;;  %v9049_v46 = vpop.f32.mrf.mxu1  ;;  %v7340_v61 = vrot.slane %v7339_v9, 2  ;;  %v7366_v22 = vrot.slane %v7365_v10, 2 }
 0x4be   : > { %v6930_v17 = vadd.f32 %v12057_v18, %v6796_v58  ;;  %v6801_v7 = vmul.f32 %v12047_v62, %v9049_v46  ;;  %v7383_v1 = vsel %vm2771_vm3, %v7057_v8, -inf  ;;  %v7060_v5 = vmax.f32 %v6932_v47, 0.0 }
 0x4bf   : > { %v7376_v52 = vmax.f32 %v7374_v42, %v7375_v28  ;;  %v6558_v6 = vpop.f32.mrf.mxu1  ;;  %v7328_v58 = vmax.f32 %v7326_v55, %v7327_v54  ;;  %v7341_v46 = vmax.f32 %v7339_v9, %v7340_v61  ;;  %v7315_v47 = vmax.f32 %v7313_v39, %v7314_v59 }
 0x4c0   : > { %v7058_v49 = vmax.f32 %v6930_v17, 0.0  ;;  %v6799_v37 = vmul.f32 %v12047_v62, %v6558_v6  ;;  %v6935_v16 = vadd.f32 %v12057_v18, %v6801_v7  ;;  %v7388_v36 = vsel %vm2771_vm3, %v7060_v5, -inf }
 0x4c1   : > { %v9050_v40 = vpop.f32.mrf.mxu1  ;;  %v7377_v33 = vrot.slane %v7376_v52, 4  ;;  %v7354_v17 = vmax.f32 %v7352_v21, %v7353_v11  ;;  %v7367_v13 = vmax.f32 %v7365_v10, %v7366_v22  ;;  %v7342_v50 = vrot.slane %v7341_v46, 1 }
 0x4c2   : > { %v7384_v24 = vsel %vm2771_vm3, %v7058_v49, -inf  ;;  %v6933_v30 = vadd.f32 %v12057_v18, %v6799_v37  ;;  %v6802_v27 = vmul.f32 %v12047_v62, %v9050_v40  ;;  %v7063_v34 = vmax.f32 %v6935_v16, 0.0 }
 0x4c3   : > { %v7385_v51 = vmax.f32 %v7383_v1, %v7384_v24  ;;  %v6561_v41 = vpop.f32.mrf.mxu1  ;;  %v7378_v38 = vmax.f32 %v7376_v52, %v7377_v33  ;;  %v7329_v49 = vrot.slane %v7328_v58, 1  ;;  %v7316_v40 = vrot.slane %v7315_v47, 1 }
 0x4c4   : > { %v6800_v44 = vmul.f32 %v12047_v62, %v6561_v41  ;;  %v7061_v12 = vmax.f32 %v6933_v30, 0.0  ;;  %v6936_v60 = vadd.f32 %v12057_v18, %v6802_v27  ;;  %v7399_v28 = vsel %vm2771_vm3, %v7063_v34, -inf }
 0x4c5   : > { %v7387_v31 = vmax.f32 %v7385_v51, %v7386_v43  ;;  %v12185_v3 = vpop.f32.mrf.mxu1  ;;  %v7379_v42 = vrot.slane %v7378_v38, 2  ;;  %v7355_v30 = vrot.slane %v7354_v17, 1  ;;  %v7368_v55 = vrot.slane %v7367_v13, 1 }
 0x4c6   : > { %v6934_v4 = vadd.f32 %v12057_v18, %v6800_v44  ;;  %v7396_v48 = vsel %vm2771_vm3, %v7061_v12, -inf  ;;  %v7064_v2 = vmax.f32 %v6936_v60, 0.0  ;;  %v7330_v33 = vmax.f32 %v7328_v58, %v7329_v49 }
 0x4c7   : > { %v7389_v19 = vmax.f32 %v7387_v31, %v7388_v36  ;;  %v12190_v26 = vpop.f32.mrf.mxu1  ;;  %v7380_v15 = vmax.f32 %v7378_v38, %v7379_v42  ;;  %v7343_v43 = vmax.f32 %v7341_v46, %v7342_v50  ;;  %v7317_v44 = vmax.f32 %v7315_v47, %v7316_v40 }
 0x4c8   : > { %v7062_v23 = vmax.f32 %v6934_v4, 0.0  ;;  %v7401_v6 = vsel %vm2771_vm3, %v7064_v2, -inf  ;;  %v7356_v21 = vmax.f32 %v7354_v17, %v7355_v30  ;;  %v7369_v31 = vmax.f32 %v7367_v13, %v7368_v55 }
 0x4c9   : > { %v7390_v20 = vrot.slane %v7389_v19, 4  ;;  %v12192_v25 = vpop.f32.mrf.mxu1  ;;  %v7381_v41 = vrot.slane %v7380_v15, 1  ;;  %v7630_v60 = vsel %vm7545_vm5, %v7330_v33, %v7317_v44 }
 0x4ca   : > { %v7397_v29 = vsel %vm2771_vm3, %v7062_v23, -inf  ;;  %v7631_v54 = vsel %vm7547_vm6, %v7343_v43, %v7630_v60  ;;  %v6806_v46 = vmul.f32 %v12047_v62, %v12192_v25 }
 0x4cb   : > { %v7398_v57 = vmax.f32 %v7396_v48, %v7397_v29  ;;  %v6577_v45 = vpop.f32.mrf.mxu1  ;;  %v7391_v8 = vmax.f32 %v7389_v19, %v7390_v20  ;;  %v7382_v36 = vmax.f32 %v7380_v15, %v7381_v41  ;;  %v7632_v61 = vsel %vm7549_vm7, %v7356_v21, %v7631_v54 }
 0x4cc   : > { %v7633_v34 = vsel %vm7551_vm8, %v7369_v31, %v7632_v61  ;;  %v6804_v23 = vmul.f32 %v12047_v62, %v6577_v45  ;;  %v6803_v48 = vmul.f32 %v12047_v62, %v12190_v26  ;;  %v6805_v45 = vmul.f32 %v12047_v62, %v12185_v3 }
 0x4cd   : > { %v7400_v35 = vmax.f32 %v7398_v57, %v7399_v28  ;;  %v9057_v0 = vpop.f32.mrf.mxu1  ;;  %v7392_v52 = vrot.slane %v7391_v8, 2  ;;  %v7634_v20 = vsel %vm7553_vm9, %v7382_v36, %v7633_v34  ;;  %v6940_v49 = vadd.f32 %v12057_v18, %v6806_v46 }
 0x4ce   : > { %v6938_v58 = vadd.f32 %v12057_v18, %v6804_v23  ;;  %v6937_v42 = vadd.f32 %v12057_v18, %v6803_v48  ;;  %v6809_v26 = vmul.f32 %v12047_v62, %v9057_v0 }
 0x4cf   : > { %v7402_v7 = vmax.f32 %v7400_v35, %v7401_v6  ;;  %v6590_v37 = vpop.f32.mrf.mxu1  ;;  %v7393_v1 = vmax.f32 %v7391_v8, %v7392_v52  ;;  %v6939_v6 = vadd.f32 %v12057_v18, %v6805_v45  ;;  %v7068_v55 = vmax.f32 %v6940_v49, 0.0 }
 0x4d0   : > { %v7645_v63 = vpop.permute.xlu0 %7644  ;;  %v7066_v28 = vmax.f32 %v6938_v58, 0.0  ;;  %v6807_v47 = vmul.f32 %v12047_v62, %v6590_v37  ;;  %v7065_v3 = vmax.f32 %v6937_v42, 0.0 }
 0x4d1   : > { %v7656_v5 = vsel %vm2771_vm3, %v11507_v32, %v7645_v63  ;;  %v9058_v24 = vpop.f32.mrf.mxu1  ;;  %v7403_v27 = vrot.slane %v7402_v7, 4  ;;  %v7394_v16 = vrot.slane %v7393_v1, 1  ;;  %v7067_v40 = vmax.f32 %v6939_v6, 0.0 }
 0x4d2   : > { %7660 = vst [vmem:[%s12203_s25] sm:$0xff] %v7656_v5  ;;  %v6810_v52 = vmul.f32 %v12047_v62, %v9058_v24  ;;  %v7410_v25 = vsel %vm2771_vm3, %v7066_v28, -inf  ;;  %v6941_v0 = vadd.f32 %v12057_v18, %v6807_v47  ;;  %v7409_v5 = vsel %vm2771_vm3, %v7065_v3, -inf }
 0x4d3   : > { %v6593_v51 = vpop.f32.mrf.mxu1  ;;  %v7404_v9 = vmax.f32 %v7402_v7, %v7403_v27  ;;  %v7395_v4 = vmax.f32 %v7393_v1, %v7394_v16  ;;  %v6943_v7 = vadd.f32 %v12057_v18, %v6809_v26  ;;  %v7411_v33 = vmax.f32 %v7409_v5, %v7410_v25 }
 0x4d4   : > { %v6808_v17 = vmul.f32 %v12047_v62, %v6593_v51  ;;  %v6944_v63 = vadd.f32 %v12057_v18, %v6810_v52  ;;  %v7069_v41 = vmax.f32 %v6941_v0, 0.0 }
 0x4d5   : > { %v9061_v39 = vpop.f32.mrf.mxu1  ;;  %v7405_v10 = vrot.slane %v7404_v9, 2  ;;  %v7635_v22 = vsel %vm7555_vm10, %v7395_v4, %v7634_v20  ;;  %v7071_v51 = vmax.f32 %v6943_v7, 0.0  ;;  %v12253_v4 = vsel %vm2771_vm3, %v7068_v55, -inf }
 0x4d6   : > { %v6942_v15 = vadd.f32 %v12057_v18, %v6808_v17  ;;  %v6813_v37 = vmul.f32 %v12047_v62, %v9061_v39  ;;  %v7072_v39 = vmax.f32 %v6944_v63, 0.0 }
 0x4d7   : > { %v6606_v32 = vpop.f32.mrf.mxu1  ;;  %v7406_v12 = vmax.f32 %v7404_v9, %v7405_v10 }
 0x4d8   : > { %v6811_v24 = vmul.f32 %v12047_v62, %v6606_v32  ;;  %v7070_v9 = vmax.f32 %v6942_v15, 0.0  ;;  %v6947_v43 = vadd.f32 %v12057_v18, %v6813_v37  ;;  %v7412_v32 = vsel %vm2771_vm3, %v7067_v40, -inf }
 0x4d9   : > { %v12208_v38 = vpop.f32.mrf.mxu1  ;;  %v7407_v19 = vrot.slane %v7406_v12, 1  ;;  %v12255_v54 = vmax.f32 %v7411_v33, %v7412_v32  ;;  %v12264_v48 = vsel %vm2771_vm3, %v7072_v39, -inf }
 0x4da   : > { %v6945_v36 = vadd.f32 %v12057_v18, %v6811_v24  ;;  %v7423_v34 = vsel %vm2771_vm3, %v7070_v9, -inf  ;;  %v7075_v23 = vmax.f32 %v6947_v43, 0.0 }
 0x4db   : > { %v6609_v59 = vpop.f32.mrf.mxu1  ;;  %v7408_v11 = vmax.f32 %v7406_v12, %v7407_v19  ;;  %v7425_v19 = vsel %vm2771_vm3, %v7071_v51, -inf }
 0x4dc   : > { %v6812_v1 = vmul.f32 %v12047_v62, %v6609_v59  ;;  %v7073_v58 = vmax.f32 %v6945_v36, 0.0 }
 0x4dd   : > { %v9065_v2 = vpop.f32.mrf.mxu1  ;;  %v7636_v29 = vsel %vm7557_vm11, %v7408_v11, %v7635_v22  ;;  %v7422_v22 = vsel %vm2771_vm3, %v7069_v41, -inf }
 0x4de   : > { %7648 = vrot.lane.b32.xlu1 %v7636_v29, %s9313_s30  ;;  %v6946_v21 = vadd.f32 %v12057_v18, %v6812_v1  ;;  %v6817_v12 = vmul.f32 %v12047_v62, %v9065_v2  ;;  %v7424_v26 = vmax.f32 %v7422_v22, %v7423_v34  ;;  %v7435_v0 = vsel %vm2771_vm3, %v7073_v58, -inf }
 0x4df   : > { %v6622_v57 = vpop.f32.mrf.mxu1 }
 0x4e0   : > { %v6815_v16 = vmul.f32 %v12047_v62, %v6622_v57  ;;  %v7074_v2 = vmax.f32 %v6946_v21, 0.0  ;;  %v6814_v57 = vmul.f32 %v12047_v62, %v12208_v38  ;;  %v6951_v45 = vadd.f32 %v12057_v18, %v6817_v12 }
 0x4e1   : > { %v12223_v8 = vpop.f32.mrf.mxu1 }
 0x4e2   : > { %v6949_v59 = vadd.f32 %v12057_v18, %v6815_v16  ;;  %v6818_v6 = vmul.f32 %v12047_v62, %v12223_v8  ;;  %v7436_v38 = vsel %vm2771_vm3, %v7074_v2, -inf  ;;  %v6948_v15 = vadd.f32 %v12057_v18, %v6814_v57 }
 0x4e3   : > { %v6625_v35 = vpop.f32.mrf.mxu1  ;;  %v7079_v37 = vmax.f32 %v6951_v45, 0.0  ;;  %v7437_v24 = vmax.f32 %v7435_v0, %v7436_v38  ;;  %v7426_v16 = vmax.f32 %v7424_v26, %v7425_v19 }
 0x4e4   : > { %v6816_v30 = vmul.f32 %v12047_v62, %v6625_v35  ;;  %v7438_v35 = vsel %vm2771_vm3, %v7075_v23, -inf  ;;  %v7077_v52 = vmax.f32 %v6949_v59, 0.0 }
 0x4e5   : > { %v9069_v13 = vpop.f32.mrf.mxu1 }
 0x4e6   : > { %v6950_v60 = vadd.f32 %v12057_v18, %v6816_v30  ;;  %v6821_v11 = vmul.f32 %v12047_v62, %v9069_v13  ;;  %v7448_v30 = vsel %vm2771_vm3, %v7077_v52, -inf }
 0x4e7   : > { %v6638_v50 = vpop.f32.mrf.mxu1 }
 0x4e8   : > { %v6819_v10 = vmul.f32 %v12047_v62, %v6638_v50  ;;  %v7078_v42 = vmax.f32 %v6950_v60, 0.0  ;;  %v6955_v3 = vadd.f32 %v12057_v18, %v6821_v11  ;;  %v7439_v60 = vmax.f32 %v7437_v24, %v7438_v35 }
 0x4e9   : > { %v9070_v27 = vpop.f32.mrf.mxu1 }
 0x4ea   : > { %v6953_v29 = vadd.f32 %v12057_v18, %v6819_v10  ;;  %v6822_v7 = vmul.f32 %v12047_v62, %v9070_v27  ;;  %v7449_v50 = vsel %vm2771_vm3, %v7078_v42, -inf  ;;  %v6952_v27 = vadd.f32 %v12057_v18, %v6818_v6 }
 0x4eb   : > { %v6641_v44 = vpop.f32.mrf.mxu1  ;;  %v7083_v55 = vmax.f32 %v6955_v3, 0.0  ;;  %v7450_v39 = vmax.f32 %v7448_v30, %v7449_v50  ;;  %v7451_v10 = vsel %vm2771_vm3, %v7079_v37, -inf }
 0x4ec   : > { %v6820_v31 = vmul.f32 %v12047_v62, %v6641_v44  ;;  %v7081_v49 = vmax.f32 %v6953_v29, 0.0  ;;  %v6956_v51 = vadd.f32 %v12057_v18, %v6822_v7  ;;  %v7076_v44 = vmax.f32 %v6948_v15, 0.0 }
 0x4ed   : > { %v9073_v20 = vpop.f32.mrf.mxu1  ;;  %v7464_v34 = vsel %vm2771_vm3, %v7083_v55, -inf  ;;  %v7452_v2 = vmax.f32 %v7450_v39, %v7451_v10 }
 0x4ee   : > { %v6954_v61 = vadd.f32 %v12057_v18, %v6820_v31  ;;  %v6825_v47 = vmul.f32 %v12047_v62, %v9073_v20  ;;  %v7461_v33 = vsel %vm2771_vm3, %v7081_v49, -inf  ;;  %v7084_v59 = vmax.f32 %v6956_v51, 0.0 }
 0x4ef   : > { %v6654_v46 = vpop.f32.mrf.mxu1  ;;  %v7440_v45 = vsel %vm2771_vm3, %v7076_v44, -inf }
 0x4f0   : > { %v7082_v28 = vmax.f32 %v6954_v61, 0.0  ;;  %v6823_v17 = vmul.f32 %v12047_v62, %v6654_v46  ;;  %v6959_v1 = vadd.f32 %v12057_v18, %v6825_v47  ;;  %v7080_v61 = vmax.f32 %v6952_v27, 0.0 }
 0x4f1   : > { %v9074_v13 = vpop.f32.mrf.mxu1  ;;  %v7415_v47 = vmax.f32 %v12255_v54, %v12253_v4  ;;  %v7441_v35 = vmax.f32 %v7439_v60, %v7440_v45  ;;  %v7466_v3 = vsel %vm2771_vm3, %v7084_v59, -inf }
 0x4f2   : > { %v6957_v25 = vadd.f32 %v12057_v18, %v6823_v17  ;;  %v7462_v8 = vsel %vm2771_vm3, %v7082_v28, -inf  ;;  %v6826_v40 = vmul.f32 %v12047_v62, %v9074_v13  ;;  %v7087_v31 = vmax.f32 %v6959_v1, 0.0 }
 0x4f3   : > { %v6657_v63 = vpop.f32.mrf.mxu1  ;;  %v7463_v21 = vmax.f32 %v7461_v33, %v7462_v8  ;;  %v7428_v17 = vmax.f32 %v7426_v16, %v12264_v48  ;;  %v7453_v6 = vsel %vm2771_vm3, %v7080_v61, -inf  ;;  %v7416_v37 = vrot.slane %v7415_v47, 4 }
 0x4f4   : > { %v6824_v5 = vmul.f32 %v12047_v62, %v6657_v63  ;;  %v7085_v41 = vmax.f32 %v6957_v25, 0.0  ;;  %v6960_v32 = vadd.f32 %v12057_v18, %v6826_v40  ;;  %v7477_v42 = vsel %vm2771_vm3, %v7087_v31, -inf }
 0x4f5   : > { %v9077_v43 = vpop.f32.mrf.mxu1  ;;  %v7465_v29 = vmax.f32 %v7463_v21, %v7464_v34  ;;  %v7454_v7 = vmax.f32 %v7452_v2, %v7453_v6  ;;  %v7429_v50 = vrot.slane %v7428_v17, 4  ;;  %v7442_v1 = vrot.slane %v7441_v35, 4 }
 0x4f6   : > { %v6958_v9 = vadd.f32 %v12057_v18, %v6824_v5  ;;  %v7474_v11 = vsel %vm2771_vm3, %v7085_v41, -inf  ;;  %v6829_v20 = vmul.f32 %v12047_v62, %v9077_v43  ;;  %v7088_v46 = vmax.f32 %v6960_v32, 0.0 }
 0x4f7   : > { %v6670_v12 = vpop.f32.mrf.mxu1  ;;  %v7467_v25 = vmax.f32 %v7465_v29, %v7466_v3  ;;  %v7455_v27 = vrot.slane %v7454_v7, 4  ;;  %v7417_v44 = vmax.f32 %v7415_v47, %v7416_v37  ;;  %v7430_v39 = vmax.f32 %v7428_v17, %v7429_v50 }
 0x4f8   : > { %v7086_v36 = vmax.f32 %v6958_v9, 0.0  ;;  %v6827_v23 = vmul.f32 %v12047_v62, %v6670_v12  ;;  %v6963_v13 = vadd.f32 %v12057_v18, %v6829_v20  ;;  %v7479_v15 = vsel %vm2771_vm3, %v7088_v46, -inf }
 0x4f9   : > { %v9078_v22 = vpop.f32.mrf.mxu1  ;;  %v7468_v55 = vrot.slane %v7467_v25, 4  ;;  %v7443_v31 = vmax.f32 %v7441_v35, %v7442_v1  ;;  %v7456_v60 = vmax.f32 %v7454_v7, %v7455_v27  ;;  %v7431_v20 = vrot.slane %v7430_v39, 2 }
 0x4fa   : > { %v7475_v19 = vsel %vm2771_vm3, %v7086_v36, -inf  ;;  %v6961_v57 = vadd.f32 %v12057_v18, %v6827_v23  ;;  %v6830_v26 = vmul.f32 %v12047_v62, %v9078_v22  ;;  %v7091_v40 = vmax.f32 %v6963_v13, 0.0 }
 0x4fb   : > { %v7476_v58 = vmax.f32 %v7474_v11, %v7475_v19  ;;  %v6673_v28 = vpop.f32.mrf.mxu1  ;;  %v7469_v61 = vmax.f32 %v7467_v25, %v7468_v55  ;;  %v7418_v29 = vrot.slane %v7417_v44, 2  ;;  %v7432_v17 = vmax.f32 %v7430_v39, %v7431_v20 }
 0x4fc   : > { %v6828_v38 = vmul.f32 %v12047_v62, %v6673_v28  ;;  %v7089_v0 = vmax.f32 %v6961_v57, 0.0  ;;  %v6964_v4 = vadd.f32 %v12057_v18, %v6830_v26  ;;  %v7490_v32 = vsel %vm2771_vm3, %v7091_v40, -inf }
 0x4fd   : > { %v7478_v52 = vmax.f32 %v7476_v58, %v7477_v42  ;;  %v9081_v49 = vpop.f32.mrf.mxu1  ;;  %v7444_v58 = vrot.slane %v7443_v31, 2  ;;  %v7457_v42 = vrot.slane %v7456_v60, 2  ;;  %v7419_v6 = vmax.f32 %v7417_v44, %v7418_v29 }
 0x4fe   : > { %v6962_v54 = vadd.f32 %v12057_v18, %v6828_v38  ;;  %v6833_v24 = vmul.f32 %v12047_v62, %v9081_v49  ;;  %v7487_v33 = vsel %vm2771_vm3, %v7089_v0, -inf  ;;  %v7092_v51 = vmax.f32 %v6964_v4, 0.0 }
 0x4ff   : > { %v6686_v48 = vpop.f32.mrf.mxu1  ;;  %v7480_v63 = vmax.f32 %v7478_v52, %v7479_v15  ;;  %v7445_v3 = vmax.f32 %v7443_v31, %v7444_v58  ;;  %v7458_v49 = vmax.f32 %v7456_v60, %v7457_v42 }
 0x500   : > { %v6831_v8 = vmul.f32 %v12047_v62, %v6686_v48  ;;  %v7090_v5 = vmax.f32 %v6962_v54, 0.0  ;;  %v6967_v36 = vadd.f32 %v12057_v18, %v6833_v24  ;;  %v7492_v23 = vsel %vm2771_vm3, %v7092_v51, -inf }
 0x501   : > { %v9082_v30 = vpop.f32.mrf.mxu1  ;;  %v7481_v21 = vrot.slane %v7480_v63, 4  ;;  %v7433_v54 = vrot.slane %v7432_v17, 1  ;;  %v7446_v50 = vrot.slane %v7445_v3, 1  ;;  %v7459_v1 = vrot.slane %v7458_v49, 1 }
 0x502   : > { %v7488_v41 = vsel %vm2771_vm3, %v7090_v5, -inf  ;;  %v6965_v9 = vadd.f32 %v12057_v18, %v6831_v8  ;;  %v6834_v43 = vmul.f32 %v12047_v62, %v9082_v30  ;;  %v7095_v57 = vmax.f32 %v6967_v36, 0.0 }
 0x503   : > { %v6689_v16 = vpop.f32.mrf.mxu1  ;;  %v7489_v10 = vmax.f32 %v7487_v33, %v7488_v41  ;;  %v7482_v22 = vmax.f32 %v7480_v63, %v7481_v21  ;;  %v7420_v8 = vrot.slane %v7419_v6, 1  ;;  %v7434_v24 = vmax.f32 %v7432_v17, %v7433_v54 }
 0x504   : > { %v6832_v12 = vmul.f32 %v12047_v62, %v6689_v16  ;;  %v7093_v59 = vmax.f32 %v6965_v9, 0.0  ;;  %v6968_v11 = vadd.f32 %v12057_v18, %v6834_v43  ;;  %v7470_v62 = vrot.slane %v7469_v61, 2 }
 0x505   : > { %v7491_v34 = vmax.f32 %v7489_v10, %v7490_v32  ;;  %v7483_v35 = vrot.slane %v7482_v22, 2  ;;  %v7503_v13 = vsel %vm2771_vm3, %v7095_v57, -inf  ;;  %v7447_v55 = vmax.f32 %v7445_v3, %v7446_v50 }
 0x506   : > { %v6966_v19 = vadd.f32 %v12057_v18, %v6832_v12  ;;  %v7500_v26 = vsel %vm2771_vm3, %v7093_v59, -inf  ;;  %v7096_v28 = vmax.f32 %v6968_v11, 0.0  ;;  %v7471_v15 = vmax.f32 %v7469_v61, %v7470_v62 }
 0x507   : > { %v7493_v2 = vmax.f32 %v7491_v34, %v7492_v23  ;;  %v7484_v37 = vmax.f32 %v7482_v22, %v7483_v35  ;;  %v7460_v51 = vmax.f32 %v7458_v49, %v7459_v1 }
 0x508   : > { %v7094_v45 = vmax.f32 %v6966_v19, 0.0  ;;  %v7505_v4 = vsel %vm2771_vm3, %v7096_v28, -inf  ;;  %v7472_v5 = vrot.slane %v7471_v15, 1 }
 0x509   : > { %v7494_v46 = vrot.slane %v7493_v2, 4  ;;  %v7485_v30 = vrot.slane %v7484_v37, 1 }
 0x50a   : > { %v7501_v47 = vsel %vm2771_vm3, %v7094_v45, -inf  ;;  %v7473_v9 = vmax.f32 %v7471_v15, %v7472_v5 }
 0x50b   : > { %v7495_v52 = vmax.f32 %v7493_v2, %v7494_v46  ;;  %v7502_v18 = vmax.f32 %v7500_v26, %v7501_v47  ;;  %v7486_v43 = vmax.f32 %v7484_v37, %v7485_v30 }
 0x50d   : > { %v7504_v7 = vmax.f32 %v7502_v18, %v7503_v13  ;;  %v7496_v0 = vrot.slane %v7495_v52, 2 }
 0x50f   : > { %v7506_v48 = vmax.f32 %v7504_v7, %v7505_v4  ;;  %v7497_v63 = vmax.f32 %v7495_v52, %v7496_v0 }
 0x510   : > { %v7647_v38 = vpop.permute.xlu0 %7646 }
 0x511   : > { %v7657_v25 = vsel %vm2771_vm3, %v11513_v53, %v7647_v38  ;;  %v7507_v40 = vrot.slane %v7506_v48, 4  ;;  %v7498_v33 = vrot.slane %v7497_v63, 1  ;;  %v7421_v53 = vmax.f32 %v7419_v6, %v7420_v8 }
 0x512   : > { %7661 = vst [vmem:[%s12203_s25 + $0x8] sm:$0xff] %v7657_v25 }
 0x513   : > { %v7508_v27 = vmax.f32 %v7506_v48, %v7507_v40  ;;  %v7637_v44 = vsel %vm7545_vm5, %v7434_v24, %v7421_v53  ;;  %v7499_v39 = vmax.f32 %v7497_v63, %v7498_v33 }
 0x514   : > { %v7638_v21 = vsel %vm7547_vm6, %v7447_v55, %v7637_v44 }
 0x515   : > { %v7509_v41 = vrot.slane %v7508_v27, 2  ;;  %v7639_v31 = vsel %vm7549_vm7, %v7460_v51, %v7638_v21 }
 0x516   : > { %v7640_v32 = vsel %vm7551_vm8, %v7473_v9, %v7639_v31 }
 0x517   : > { %v7510_v16 = vmax.f32 %v7508_v27, %v7509_v41  ;;  %v7641_v12 = vsel %vm7553_vm9, %v7486_v43, %v7640_v32 }
 0x518   : > { %v7642_v60 = vsel %vm7555_vm10, %v7499_v39, %v7641_v12 }
 0x519   : > { %v7511_v10 = vrot.slane %v7510_v16, 1 }
 0x51b   : > { %v7512_v36 = vmax.f32 %v7510_v16, %v7511_v10 }
 0x51d   : > { %v7643_v61 = vsel %vm7557_vm11, %v7512_v36, %v7642_v60 }
 0x51e   : > { %7650 = vrot.lane.b32.xlu1 %v7643_v61, %s9313_s30  ;;  %s12356_s30 = scalar_lea.sflag [#allocation3], %s641_s27 }
 0x550   : > { %v7649_v34 = vpop.permute.xlu1 %7648 }
 0x551   : > { %v7658_v23 = vsel %vm2771_vm3, %v11555_v14, %v7649_v34 }
 0x552   : > { %7662 = vst [vmem:[%s12203_s25 + $0x10] sm:$0xff] %v7658_v23 }
 0x590   : > { %v7651_v59 = vpop.permute.xlu1 %7650 }
 0x591   : > { %v7659_v11 = vsel %vm2771_vm3, %v11571_v56, %v7651_v59 }
 0x592   : > { %7663 = vst [vmem:[%s12203_s25 + $0x18] sm:$0xff] %v7659_v11 }
 0x593   : > { %9264 = shalt.err (!%p9261_p3)
}
 0x594   : > { %s9265_s27 = scalar_lea.hbm %s12349_s28, 512  ;;  %s9269_s29 = scalar_lea.hbm %s12416_s20, 1024 }
 0x595   : > { %p9266_p4 = scmp.ne.s32.totalorder %s12349_s28, %s9265_s27  ;;  %p9270_p9 = scmp.lt.s32.totalorder %s12349_s28, %s12416_s20 }
 0x596   : > { %p9271_p10 = scmp.lt.s32.totalorder %s9269_s29, %s9265_s27 }
 0x597   : > { %p9267_p7 = pnand %p9266_p4, %p9460_p5 }
 0x598   : > { %p9272_p11 = por %p9271_p10, %p9270_p9 }
 0x599   : > { %p9268_p8 = pneg %p9267_p7 }
 0x59b   : > { %p9273_p12 = pnand %p9272_p11, %p9268_p8 }
 0x59d   : > { %9276 = shalt.err (!%p9273_p12)
}
 0x59e   : > { %s9315_s5 = smov 128   ;;  %s9316_s21 = smov 8  }
 0x59f   : > { %9089 = dma.vmem_to_hbm [thread:$0]  (%p9460_p5), %s12344_s26, 512, %s12349_s28, %s12356_s30, %s9315_s5, %s9315_s5, %s9316_s21  }
 0x5a0 PF: > { %p9095_p13 = scmp.ge.s32.totalorder %s9311_s24, 2  ;;  %s7693_s25 = sand.u32 1, %s9299_s1  }
 0x5a1   : > { %s7694_s27 = scalar_lea.sflag [#allocation3], %s7693_s25 }
 0x5a2   : > { %p9092_p0 = pnand %p9095_p13, %p9464_p6 }
 0x5a4   : > { %p9093_p1 = pneg %p9092_p0 }
 0x5a6   : > { %9294 = dma.done.wait (%p9093_p1), %s7694_s27, 512  }
 0x5a7   : > { %9296 = vsyncadd (%p9093_p1), %s7694_s27, 4294966784  ;;  %s12555_s24 = sld [smem:[#allocation6_spill]]  ;;  %s12558_s1 = smov %s9303_s22 }
 0x5a8   : > { %s12556_s23 = sld [smem:[#allocation5_spill]] }
 0x5a9   : > { %s12557_s29 = sld [smem:[#allocation7_spill]] }
 0x5ad   : > { %p30_p2 = scmp.ge.s32.totalorder %s12555_s24, 4  }
 0x5ae   : > { %s12559_s22 = smov %s12556_s23 }
 0x5af   : > { %s12560_s23 = smov %s12557_s29  ;;  %32 = sbr.rel (!%p30_p2) target bundleno = 10 (0xa), region = 138 }
 0x5b4   :  { %7699 = vsyncpa [#allocation3], 1 }
 0x5b5   :  { %7701 = vsyncpa [#allocation3 + $0x1], 1 }

</bundles_post_ra>
